<compile_context>
chip_gen: v7x
topology: tpu7x:2x2x1
jax: 0.10.0
libtpu: 0.0.40
codegen_flags: <defaults>
</compile_context>

<pallas_src>
import jax
import jax.numpy as jnp
from jax.experimental import pallas as pl
from jax.experimental.pallas import tpu as pltpu

K_IN = 100          # true input features
K_PAD = 128         # lane-dense padded contraction for layer 1
OUT = 784           # true output features (28*28), last dim == full array dim
H1, H2, H3 = 256, 512, 1024


def _leaky_relu(x, slope=0.2):
    return jnp.where(x > 0, x, slope * x)


def generator_kernel(z_ref,
                     w1_ref, b1_ref,
                     w2_ref, b2_ref,
                     w3_ref, b3_ref,
                     w4_ref, b4_ref,
                     out_ref):
    """Fused 4-layer MLP on one batch tile. Weights resident bf16 (single
    buffered), activations f32, MXU accumulation f32."""
    x = z_ref[...]                                                   # (TB, 128) bf16

    h = jnp.dot(x, w1_ref[...],
                preferred_element_type=jnp.float32)                  # (TB, 256)
    h = _leaky_relu(h + b1_ref[...])

    h = jnp.dot(h.astype(jnp.bfloat16), w2_ref[...],
                preferred_element_type=jnp.float32)                  # (TB, 512)
    h = _leaky_relu(h + b2_ref[...])

    h = jnp.dot(h.astype(jnp.bfloat16), w3_ref[...],
                preferred_element_type=jnp.float32)                  # (TB, 1024)
    h = _leaky_relu(h + b3_ref[...])

    h = jnp.dot(h.astype(jnp.bfloat16), w4_ref[...],
                preferred_element_type=jnp.float32)                  # (TB, 784)
    out_ref[...] = jnp.tanh(h + b4_ref[...])


def prepare_params(params):
    """Pad W1's contraction to lane-dense 128 rows (zeros), cast weights to
    bf16 (biases stay f32). W4/b4 are left at 784 columns (unpadded output)."""
    (w1, b1), (w2, b2), (w3, b3), (w4, b4) = params
    w1p = jnp.pad(w1, ((0, K_PAD - K_IN), (0, 0)))
    to_bf16 = lambda w: w.astype(jnp.bfloat16)
    return ((to_bf16(w1p), b1.astype(jnp.float32)),
            (to_bf16(w2), b2.astype(jnp.float32)),
            (to_bf16(w3), b3.astype(jnp.float32)),
            (to_bf16(w4), b4.astype(jnp.float32)))


def generator_forward(z, prepped_params):
    """z: (B, ...) reshaped to (B, 100); returns (B, 784) float32."""
    B = z.shape[0]
    z = z.reshape(B, K_IN)
    # Lane-dense contraction: pad 100 -> 128 with zeros, pre-cast to bf16 so
    # the kernel feeds the MXU directly.
    z = jnp.pad(z.astype(jnp.bfloat16), ((0, 0), (0, K_PAD - K_IN)))

    # Batch tile: single tile (rounded to sublane multiple) for small/medium
    # batches, 512-row tiles for large batches (amortizes per-step overhead).
    if B <= 512:
        TB = max(8, ((B + 7) // 8) * 8)
    else:
        TB = 512
    n_tiles = -(-B // TB)
    Bp = n_tiles * TB
    if Bp != B:
        z = jnp.pad(z, ((0, Bp - B), (0, 0)))

    (w1, b1), (w2, b2), (w3, b3), (w4, b4) = prepped_params

    # Weights/biases never change across the batch grid -> constant index map,
    # single-buffered (no point double-buffering a block that is never refetched).
    resident = lambda shape: pl.BlockSpec(
        shape, lambda i: (0, 0), pipeline_mode=pl.Buffered(1))

    in_specs = [
        pl.BlockSpec((TB, K_PAD), lambda i: (i, 0)),   # z tile (pipelined)
        resident((K_PAD, H1)), resident((1, H1)),
        resident((H1, H2)),    resident((1, H2)),
        resident((H2, H3)),    resident((1, H3)),
        resident((H3, OUT)),   resident((1, OUT)),
    ]
    # Last dim 784 == full array dim, so this is a legal (and lane-dense
    # enough) block; no post-call lane slice needed.
    out_spec = pl.BlockSpec((TB, OUT), lambda i: (i, 0))

    out_p = pl.pallas_call(
        generator_kernel,
        out_shape=jax.ShapeDtypeStruct((Bp, OUT), jnp.float32),
        grid_spec=pltpu.PrefetchScalarGridSpec(
            num_scalar_prefetch=0,
            grid=(n_tiles,),
            in_specs=in_specs,
            out_specs=out_spec,
        ),
        compiler_params=pltpu.CompilerParams(
            dimension_semantics=("parallel",),
            vmem_limit_bytes=32 << 20,
        ),
    )(z, w1, b1, w2, b2, w3, b3, w4, b4)

    return out_p if Bp == B else out_p[:B]


def init_params(key):
    """Deterministic init mirroring PyTorch nn.Linear default:
    U(-1/sqrt(fan_in), 1/sqrt(fan_in)) for both weight and bias.
    Weights stored as (in, out) so y = x @ W + b == PyTorch x @ W_pt.T + b."""
    dims = [(K_IN, H1), (H1, H2), (H2, H3), (H3, OUT)]
    params = []
    for (fin, fout) in dims:
        key, kw, kb = jax.random.split(key, 3)
        bound = 1.0 / (fin ** 0.5)
        w = jax.random.uniform(kw, (fin, fout), jnp.float32, -bound, bound)
        b = jax.random.uniform(kb, (1, fout), jnp.float32, -bound, bound)
        params.append((w, b))
    return params


def reference_forward(z, params):
    """Pure-JAX reference mirroring the kernel's bf16-weight matmuls
    (f32 accumulation, f32 activations)."""
    h = z.reshape(z.shape[0], K_IN).astype(jnp.float32)
    for i, (w, b) in enumerate(params):
        h = jnp.dot(h.astype(jnp.bfloat16), w.astype(jnp.bfloat16),
                    preferred_element_type=jnp.float32) + b
        if i < 3:
            h = jnp.where(h > 0, h, 0.2 * h)
        else:
            h = jnp.tanh(h)
    return h


if __name__ == "__main__":
    key = jax.random.PRNGKey(0)
    kp, kz = jax.random.split(key)

    params = init_params(kp)
    prepped = prepare_params(params)

    B = 8
    z = jax.random.normal(kz, (B, K_IN), dtype=jnp.float32)

    out = generator_forward(z, prepped)
    out = jax.block_until_ready(out)

    ref = reference_forward(z, params)
    assert out.shape == (B, OUT), out.shape
    assert bool(jnp.all(jnp.isfinite(out))), "non-finite output"
    assert jnp.allclose(out, ref, atol=2e-2, rtol=2e-2), \
        f"mismatch vs reference, max abs diff {float(jnp.max(jnp.abs(out - ref)))}"

    print("KERNEL_OK")
</pallas_src>

<mosaic_0001>
module attributes {stable_mosaic.version = 11 : i64} {
  func.func @generator_kernel(%arg0: i32, %arg1: memref<8x128xbf16, #tpu.memory_space<vmem>>, %arg2: memref<128x256xbf16, #tpu.memory_space<vmem>>, %arg3: memref<1x256xf32, #tpu.memory_space<vmem>>, %arg4: memref<256x512xbf16, #tpu.memory_space<vmem>>, %arg5: memref<1x512xf32, #tpu.memory_space<vmem>>, %arg6: memref<512x1024xbf16, #tpu.memory_space<vmem>>, %arg7: memref<1x1024xf32, #tpu.memory_space<vmem>>, %arg8: memref<1024x784xbf16, #tpu.memory_space<vmem>>, %arg9: memref<1x784xf32, #tpu.memory_space<vmem>>, %arg10: memref<8x784xf32, #tpu.memory_space<vmem>>) attributes {dimension_semantics = [#tpu.dimension_semantics<parallel>], iteration_bounds = array<i64: 1>, scalar_prefetch = 0 : i64, scratch_operands = 0 : i64, tpu.core_type = #tpu.core_type<tc>, window_params = [{transform_indices = @transform_0, window_bounds = array<i64: 8, 128>}, {pipeline_mode = #tpu.pipeline_mode<synchronous>, transform_indices = @transform_1, window_bounds = array<i64: 128, 256>}, {pipeline_mode = #tpu.pipeline_mode<synchronous>, transform_indices = @transform_2, window_bounds = array<i64: 1, 256>}, {pipeline_mode = #tpu.pipeline_mode<synchronous>, transform_indices = @transform_3, window_bounds = array<i64: 256, 512>}, {pipeline_mode = #tpu.pipeline_mode<synchronous>, transform_indices = @transform_4, window_bounds = array<i64: 1, 512>}, {pipeline_mode = #tpu.pipeline_mode<synchronous>, transform_indices = @transform_5, window_bounds = array<i64: 512, 1024>}, {pipeline_mode = #tpu.pipeline_mode<synchronous>, transform_indices = @transform_6, window_bounds = array<i64: 1, 1024>}, {pipeline_mode = #tpu.pipeline_mode<synchronous>, transform_indices = @transform_7, window_bounds = array<i64: 1024, 784>}, {pipeline_mode = #tpu.pipeline_mode<synchronous>, transform_indices = @transform_8, window_bounds = array<i64: 1, 784>}, {transform_indices = @transform_9, window_bounds = array<i64: 8, 784>}]} {
    %c0 = arith.constant 0 : index
    %c0_0 = arith.constant 0 : index
    %0 = vector.load %arg1[%c0, %c0_0] : memref<8x128xbf16, #tpu.memory_space<vmem>>, vector<8x128xbf16>
    %c0_1 = arith.constant 0 : index
    %c0_2 = arith.constant 0 : index
    %1 = vector.load %arg2[%c0_1, %c0_2] : memref<128x256xbf16, #tpu.memory_space<vmem>>, vector<128x256xbf16>
    %cst = arith.constant dense<0.000000e+00> : vector<8x256xf32>
    %2 = tpu.matmul %0, %1, %cst {dimension_numbers = #tpu.dot_dimension_numbers<[1], [0], [0], [1], [0, 0, 1, 1], [], []>} : vector<8x128xbf16>, vector<128x256xbf16>, vector<8x256xf32> -> vector<8x256xf32>
    %c0_3 = arith.constant 0 : index
    %c0_4 = arith.constant 0 : index
    %3 = vector.load %arg3[%c0_3, %c0_4] : memref<1x256xf32, #tpu.memory_space<vmem>>, vector<1x256xf32>
    %4 = vector.broadcast %3 : vector<1x256xf32> to vector<8x256xf32>
    %5 = arith.addf %2, %4 : vector<8x256xf32>
    %cst_5 = arith.constant 0.000000e+00 : f32
    %6 = vector.broadcast %cst_5 : f32 to vector<8x256xf32>
    %7 = arith.cmpf ogt, %5, %6 : vector<8x256xf32>
    %cst_6 = arith.constant 2.000000e-01 : f32
    %8 = vector.broadcast %cst_6 : f32 to vector<8x256xf32>
    %9 = arith.mulf %8, %5 : vector<8x256xf32>
    %10 = arith.select %7, %5, %9 : vector<8x256xi1>, vector<8x256xf32>
    %11 = arith.truncf %10 : vector<8x256xf32> to vector<8x256xbf16>
    %c0_7 = arith.constant 0 : index
    %c0_8 = arith.constant 0 : index
    %12 = vector.load %arg4[%c0_7, %c0_8] : memref<256x512xbf16, #tpu.memory_space<vmem>>, vector<256x512xbf16>
    %cst_9 = arith.constant dense<0.000000e+00> : vector<8x512xf32>
    %13 = tpu.matmul %11, %12, %cst_9 {dimension_numbers = #tpu.dot_dimension_numbers<[1], [0], [0], [1], [0, 0, 1, 1], [], []>} : vector<8x256xbf16>, vector<256x512xbf16>, vector<8x512xf32> -> vector<8x512xf32>
    %c0_10 = arith.constant 0 : index
    %c0_11 = arith.constant 0 : index
    %14 = vector.load %arg5[%c0_10, %c0_11] : memref<1x512xf32, #tpu.memory_space<vmem>>, vector<1x512xf32>
    %15 = vector.broadcast %14 : vector<1x512xf32> to vector<8x512xf32>
    %16 = arith.addf %13, %15 : vector<8x512xf32>
    %cst_12 = arith.constant 0.000000e+00 : f32
    %17 = vector.broadcast %cst_12 : f32 to vector<8x512xf32>
    %18 = arith.cmpf ogt, %16, %17 : vector<8x512xf32>
    %cst_13 = arith.constant 2.000000e-01 : f32
    %19 = vector.broadcast %cst_13 : f32 to vector<8x512xf32>
    %20 = arith.mulf %19, %16 : vector<8x512xf32>
    %21 = arith.select %18, %16, %20 : vector<8x512xi1>, vector<8x512xf32>
    %22 = arith.truncf %21 : vector<8x512xf32> to vector<8x512xbf16>
    %c0_14 = arith.constant 0 : index
    %c0_15 = arith.constant 0 : index
    %23 = vector.load %arg6[%c0_14, %c0_15] : memref<512x1024xbf16, #tpu.memory_space<vmem>>, vector<512x1024xbf16>
    %cst_16 = arith.constant dense<0.000000e+00> : vector<8x1024xf32>
    %24 = tpu.matmul %22, %23, %cst_16 {dimension_numbers = #tpu.dot_dimension_numbers<[1], [0], [0], [1], [0, 0, 1, 1], [], []>} : vector<8x512xbf16>, vector<512x1024xbf16>, vector<8x1024xf32> -> vector<8x1024xf32>
    %c0_17 = arith.constant 0 : index
    %c0_18 = arith.constant 0 : index
    %25 = vector.load %arg7[%c0_17, %c0_18] : memref<1x1024xf32, #tpu.memory_space<vmem>>, vector<1x1024xf32>
    %26 = vector.broadcast %25 : vector<1x1024xf32> to vector<8x1024xf32>
    %27 = arith.addf %24, %26 : vector<8x1024xf32>
    %cst_19 = arith.constant 0.000000e+00 : f32
    %28 = vector.broadcast %cst_19 : f32 to vector<8x1024xf32>
    %29 = arith.cmpf ogt, %27, %28 : vector<8x1024xf32>
    %cst_20 = arith.constant 2.000000e-01 : f32
    %30 = vector.broadcast %cst_20 : f32 to vector<8x1024xf32>
    %31 = arith.mulf %30, %27 : vector<8x1024xf32>
    %32 = arith.select %29, %27, %31 : vector<8x1024xi1>, vector<8x1024xf32>
    %33 = arith.truncf %32 : vector<8x1024xf32> to vector<8x1024xbf16>
    %c0_21 = arith.constant 0 : index
    %c0_22 = arith.constant 0 : index
    %34 = vector.load %arg8[%c0_21, %c0_22] : memref<1024x784xbf16, #tpu.memory_space<vmem>>, vector<1024x784xbf16>
    %cst_23 = arith.constant dense<0.000000e+00> : vector<8x784xf32>
    %35 = tpu.matmul %33, %34, %cst_23 {dimension_numbers = #tpu.dot_dimension_numbers<[1], [0], [0], [1], [0, 0, 1, 1], [], []>} : vector<8x1024xbf16>, vector<1024x784xbf16>, vector<8x784xf32> -> vector<8x784xf32>
    %c0_24 = arith.constant 0 : index
    %c0_25 = arith.constant 0 : index
    %36 = vector.load %arg9[%c0_24, %c0_25] : memref<1x784xf32, #tpu.memory_space<vmem>>, vector<1x784xf32>
    %37 = vector.broadcast %36 : vector<1x784xf32> to vector<8x784xf32>
    %38 = arith.addf %35, %37 : vector<8x784xf32>
    %39 = math.tanh %38 : vector<8x784xf32>
    %c0_26 = arith.constant 0 : index
    %c0_27 = arith.constant 0 : index
    %40 = vector.load %arg10[%c0_26, %c0_27] : memref<8x784xf32, #tpu.memory_space<vmem>>, vector<8x784xf32>
    tpu.vector_store %arg10[%c0_26, %c0_27], %39 {strides = array<i32>} : memref<8x784xf32, #tpu.memory_space<vmem>>, vector<8x784xf32>,
    return
  }
  func.func @transform_0(%arg0: i32) -> (i32, i32) {
    %c0_i32 = arith.constant 0 : i32
    %c0_i32_0 = arith.constant 0 : i32
    return %arg0, %c0_i32 : i32, i32
  }
  func.func @transform_1(%arg0: i32) -> (i32, i32) {
    %c0_i32 = arith.constant 0 : i32
    %c0_i32_0 = arith.constant 0 : i32
    %c0_i32_1 = arith.constant 0 : i32
    return %c0_i32, %c0_i32_0 : i32, i32
  }
  func.func @transform_2(%arg0: i32) -> (i32, i32) {
    %c0_i32 = arith.constant 0 : i32
    %c0_i32_0 = arith.constant 0 : i32
    %c0_i32_1 = arith.constant 0 : i32
    return %c0_i32, %c0_i32_0 : i32, i32
  }
  func.func @transform_3(%arg0: i32) -> (i32, i32) {
    %c0_i32 = arith.constant 0 : i32
    %c0_i32_0 = arith.constant 0 : i32
    %c0_i32_1 = arith.constant 0 : i32
    return %c0_i32, %c0_i32_0 : i32, i32
  }
  func.func @transform_4(%arg0: i32) -> (i32, i32) {
    %c0_i32 = arith.constant 0 : i32
    %c0_i32_0 = arith.constant 0 : i32
    %c0_i32_1 = arith.constant 0 : i32
    return %c0_i32, %c0_i32_0 : i32, i32
  }
  func.func @transform_5(%arg0: i32) -> (i32, i32) {
    %c0_i32 = arith.constant 0 : i32
    %c0_i32_0 = arith.constant 0 : i32
    %c0_i32_1 = arith.constant 0 : i32
    return %c0_i32, %c0_i32_0 : i32, i32
  }
  func.func @transform_6(%arg0: i32) -> (i32, i32) {
    %c0_i32 = arith.constant 0 : i32
    %c0_i32_0 = arith.constant 0 : i32
    %c0_i32_1 = arith.constant 0 : i32
    return %c0_i32, %c0_i32_0 : i32, i32
  }
  func.func @transform_7(%arg0: i32) -> (i32, i32) {
    %c0_i32 = arith.constant 0 : i32
    %c0_i32_0 = arith.constant 0 : i32
    %c0_i32_1 = arith.constant 0 : i32
    return %c0_i32, %c0_i32_0 : i32, i32
  }
  func.func @transform_8(%arg0: i32) -> (i32, i32) {
    %c0_i32 = arith.constant 0 : i32
    %c0_i32_0 = arith.constant 0 : i32
    %c0_i32_1 = arith.constant 0 : i32
    return %c0_i32, %c0_i32_0 : i32, i32
  }
  func.func @transform_9(%arg0: i32) -> (i32, i32) {
    %c0_i32 = arith.constant 0 : i32
    %c0_i32_0 = arith.constant 0 : i32
    return %arg0, %c0_i32 : i32, i32
  }
}

</mosaic_0001>

<bundles_post_ra>
// kernel: tpu_custom_call.1
= control target key start
LH: loop header
LB: loop body
LE: loop exit
PB: predicated region body
PF: predicated region fallthrough
CT: control target
= control target key end

     0   :  { %v7906_v2 = vmov 0   ;;  %s10510_s0 = inlined_call_operand.vmem [shape: bf16[8,128], index: 0, kind: input, shape index: {}]   ;;  %s10511_s1 = inlined_call_operand.vmem [shape: bf16[128,256], index: 1, kind: input, shape index: {}]   ;;  %s10512_s2 = inlined_call_operand.vmem [shape: f32[1,256], index: 2, kind: input, shape index: {}]   ;;  %s10513_s3 = inlined_call_operand.vmem [shape: bf16[256,512], index: 3, kind: input, shape index: {}]   ;;  %s10514_s4 = inlined_call_operand.vmem [shape: f32[1,512], index: 4, kind: input, shape index: {}]   ;;  %s10515_s5 = inlined_call_operand.vmem [shape: bf16[512,1024], index: 5, kind: input, shape index: {}]   ;;  %s10516_s6 = inlined_call_operand.vmem [shape: f32[1,1024], index: 6, kind: input, shape index: {}]   ;;  %s10517_s7 = inlined_call_operand.vmem [shape: bf16[1024,784], index: 7, kind: input, shape index: {}]   ;;  %s10518_s8 = inlined_call_operand.vmem [shape: f32[1,784], index: 8, kind: input, shape index: {}]   ;;  %s10519_s9 = inlined_call_operand.hbm [shape: f32[8,784], index: 9, kind: output, shape index: {}]  }
   0x1   :  { %v7108_v0 = vld [vmem:[%s10511_s1 + $0x4] ss:$8 sps:$4 sm:$0xff]   ;;  %v7110_v1 = vld [vmem:[%s10511_s1] ss:$8 sps:$4 sm:$0xff]   ;;  %175 = vmatprep.mubr.bf16.mxu0 %v7906_v2  ;;  %v7111_v3 = vld [vmem:[%s10511_s1 + $0x14] ss:$8 sps:$4 sm:$0xff]  }
   0x2   :  { %143 = vmatprep.subr.bf16.mxu0 %v7108_v0  ;;  %v7113_v4 = vld [vmem:[%s10511_s1 + $0x10] ss:$8 sps:$4 sm:$0xff]   ;;  %v7114_v5 = vld [vmem:[%s10511_s1 + $0x24] ss:$8 sps:$4 sm:$0xff]   ;;  %v7116_v6 = vld [vmem:[%s10511_s1 + $0x20] ss:$8 sps:$4 sm:$0xff]  }
   0x3   :  { %144 = vmatpush1.bf16.msra.mxu0 %v7110_v1  ;;  %v7117_v7 = vld [vmem:[%s10511_s1 + $0x34] ss:$8 sps:$4 sm:$0xff]   ;;  %v7119_v8 = vld [vmem:[%s10511_s1 + $0x30] ss:$8 sps:$4 sm:$0xff]   ;;  %v7120_v9 = vld [vmem:[%s10511_s1 + $0x44] ss:$8 sps:$4 sm:$0xff]  }
   0x4   :  { %145 = vmatprep.subr.bf16.mxu0 %v7111_v3  ;;  %v7122_v10 = vld [vmem:[%s10511_s1 + $0x40] ss:$8 sps:$4 sm:$0xff]   ;;  %v7123_v11 = vld [vmem:[%s10511_s1 + $0x54] ss:$8 sps:$4 sm:$0xff]   ;;  %v7125_v12 = vld [vmem:[%s10511_s1 + $0x50] ss:$8 sps:$4 sm:$0xff]  }
   0x5   :  { %v7126_v13 = vld [vmem:[%s10511_s1 + $0x64] ss:$8 sps:$4 sm:$0xff]   ;;  %v7128_v14 = vld [vmem:[%s10511_s1 + $0x60] ss:$8 sps:$4 sm:$0xff]   ;;  %v7129_v15 = vld [vmem:[%s10511_s1 + $0x74] ss:$8 sps:$4 sm:$0xff]  }
   0x6   :  { %v7131_v16 = vld [vmem:[%s10511_s1 + $0x70] ss:$8 sps:$4 sm:$0xff]   ;;  %v7134_v17 = vld [vmem:[%s10513_s3 + $0x4] ss:$16 sps:$4 sm:$0xff]   ;;  %v34_v18 = vld [vmem:[%s10510_s0] sm:$0xf] }
   0x7   :  { %146 = vmatpush1.bf16.msra.mxu0 %v7113_v4  ;;  %v7132_v19 = vld [vmem:[%s10513_s3] ss:$16 sps:$4 sm:$0xff]   ;;  %v7137_v20 = vld [vmem:[%s10513_s3 + $0x24] ss:$16 sps:$4 sm:$0xff]   ;;  %v7182_v50 = vld [vmem:[%s10513_s3 + $0xc] ss:$16 sps:$4 sm:$0xff]  }
   0x8   :  { %147 = vmatprep.subr.bf16.mxu0 %v7114_v5  ;;  %v7135_v21 = vld [vmem:[%s10513_s3 + $0x20] ss:$16 sps:$4 sm:$0xff]   ;;  %v7140_v22 = vld [vmem:[%s10513_s3 + $0x44] ss:$16 sps:$4 sm:$0xff]  }
   0x9   :  { %v7138_v23 = vld [vmem:[%s10513_s3 + $0x40] ss:$16 sps:$4 sm:$0xff]   ;;  %v7143_v24 = vld [vmem:[%s10513_s3 + $0x64] ss:$16 sps:$4 sm:$0xff]  }
   0xa   :  { %v7141_v25 = vld [vmem:[%s10513_s3 + $0x60] ss:$16 sps:$4 sm:$0xff]   ;;  %v7146_v26 = vld [vmem:[%s10513_s3 + $0x84] ss:$16 sps:$4 sm:$0xff]  }
   0xb   :  { %148 = vmatpush1.bf16.msra.mxu0 %v7116_v6  ;;  %v7144_v27 = vld [vmem:[%s10513_s3 + $0x80] ss:$16 sps:$4 sm:$0xff]   ;;  %v7149_v28 = vld [vmem:[%s10513_s3 + $0xa4] ss:$16 sps:$4 sm:$0xff]  }
   0xc   :  { %149 = vmatprep.subr.bf16.mxu0 %v7117_v7  ;;  %v7147_v29 = vld [vmem:[%s10513_s3 + $0xa0] ss:$16 sps:$4 sm:$0xff]   ;;  %v7152_v30 = vld [vmem:[%s10513_s3 + $0xc4] ss:$16 sps:$4 sm:$0xff]  }
   0xd   :  { %v7150_v31 = vld [vmem:[%s10513_s3 + $0xc0] ss:$16 sps:$4 sm:$0xff]   ;;  %v7155_v32 = vld [vmem:[%s10513_s3 + $0xe4] ss:$16 sps:$4 sm:$0xff]  }
   0xe   :  { %v7153_v33 = vld [vmem:[%s10513_s3 + $0xe0] ss:$16 sps:$4 sm:$0xff]   ;;  %v7158_v34 = vld [vmem:[%s10513_s3 + $0x104] ss:$16 sps:$4 sm:$0xff]  }
   0xf   :  { %150 = vmatpush1.bf16.msra.mxu0 %v7119_v8  ;;  %v7156_v35 = vld [vmem:[%s10513_s3 + $0x100] ss:$16 sps:$4 sm:$0xff]   ;;  %v7161_v36 = vld [vmem:[%s10513_s3 + $0x124] ss:$16 sps:$4 sm:$0xff]  }
  0x10   :  { %151 = vmatprep.subr.bf16.mxu0 %v7120_v9  ;;  %v7159_v37 = vld [vmem:[%s10513_s3 + $0x120] ss:$16 sps:$4 sm:$0xff]   ;;  %v7164_v38 = vld [vmem:[%s10513_s3 + $0x144] ss:$16 sps:$4 sm:$0xff]  }
  0x11   :  { %v7162_v39 = vld [vmem:[%s10513_s3 + $0x140] ss:$16 sps:$4 sm:$0xff]   ;;  %v7167_v40 = vld [vmem:[%s10513_s3 + $0x164] ss:$16 sps:$4 sm:$0xff]  }
  0x12   :  { %v7165_v41 = vld [vmem:[%s10513_s3 + $0x160] ss:$16 sps:$4 sm:$0xff]   ;;  %v7170_v42 = vld [vmem:[%s10513_s3 + $0x184] ss:$16 sps:$4 sm:$0xff]  }
  0x13   :  { %152 = vmatpush1.bf16.msra.mxu0 %v7122_v10  ;;  %v7168_v43 = vld [vmem:[%s10513_s3 + $0x180] ss:$16 sps:$4 sm:$0xff]   ;;  %v7173_v44 = vld [vmem:[%s10513_s3 + $0x1a4] ss:$16 sps:$4 sm:$0xff]  }
  0x14   :  { %153 = vmatprep.subr.bf16.mxu0 %v7123_v11  ;;  %v7171_v45 = vld [vmem:[%s10513_s3 + $0x1a0] ss:$16 sps:$4 sm:$0xff]   ;;  %v7176_v46 = vld [vmem:[%s10513_s3 + $0x1c4] ss:$16 sps:$4 sm:$0xff]  }
  0x15   :  { %v7174_v47 = vld [vmem:[%s10513_s3 + $0x1c0] ss:$16 sps:$4 sm:$0xff]   ;;  %v7179_v48 = vld [vmem:[%s10513_s3 + $0x1e4] ss:$16 sps:$4 sm:$0xff]  }
  0x16   :  { %v7177_v49 = vld [vmem:[%s10513_s3 + $0x1e0] ss:$16 sps:$4 sm:$0xff]  }
  0x17   :  { %154 = vmatpush1.bf16.msra.mxu0 %v7125_v12  ;;  %v696_v51 = vld [vmem:[%s10515_s5] sm:$0xff] }
  0x18   :  { %155 = vmatprep.subr.bf16.mxu0 %v7126_v13  ;;  %v700_v52 = vld [vmem:[%s10515_s5 + $0x20] sm:$0xff] }
  0x19   :  { %v6249_v53 = vcombine.high %v696_v51, %v700_v52  ;;  %v6248_v54 = vcombine.low %v696_v51, %v700_v52  ;;  %v704_v55 = vld [vmem:[%s10515_s5 + $0x40] sm:$0xff] }
  0x1a   :  { %v708_v56 = vld [vmem:[%s10515_s5 + $0x60] sm:$0xff] }
  0x1b   :  { %156 = vmatpush1.bf16.msra.mxu0 %v7128_v14  ;;  %v6257_v57 = vcombine.high %v704_v55, %v708_v56  ;;  %2274 = vmatprep.subr.bf16.mxu1 %v6249_v53  ;;  %v6256_v58 = vcombine.low %v704_v55, %v708_v56  ;;  %v712_v59 = vld [vmem:[%s10515_s5 + $0x80] sm:$0xff] }
  0x1c   :  { %157 = vmatprep.subr.bf16.mxu0 %v7129_v15  ;;  %2275 = vmatpush1.bf16.msra.mxu1 %v6248_v54  ;;  %v716_v60 = vld [vmem:[%s10515_s5 + $0xa0] sm:$0xff] }
  0x1d   :  { %2276 = vmatprep.subr.bf16.mxu1 %v6257_v57  ;;  %v6265_v61 = vcombine.high %v712_v59, %v716_v60  ;;  %v6264_v62 = vcombine.low %v712_v59, %v716_v60  ;;  %v720_v63 = vld [vmem:[%s10515_s5 + $0xc0] sm:$0xff] }
  0x1e   :  { %v724_v0 = vld [vmem:[%s10515_s5 + $0xe0] sm:$0xff] }
  0x1f   :  { %158 = vmatpush1.bf16.msra.mxu0 %v7131_v16  ;;  %v6273_v1 = vcombine.high %v720_v63, %v724_v0  ;;  %v6272_v2 = vcombine.low %v720_v63, %v724_v0  ;;  %v728_v3 = vld [vmem:[%s10515_s5 + $0x100] sm:$0xff] }
  0x20   :  { %598 = vmatprep.subr.bf16.mxu0 %v7134_v17  ;;  %2277 = vmatpush1.bf16.msra.mxu1 %v6256_v58  ;;  %v732_v4 = vld [vmem:[%s10515_s5 + $0x120] sm:$0xff] }
  0x21   :  { %2278 = vmatprep.subr.bf16.mxu1 %v6265_v61  ;;  %v6281_v5 = vcombine.high %v728_v3, %v732_v4  ;;  %v6280_v6 = vcombine.low %v728_v3, %v732_v4  ;;  %v736_v7 = vld [vmem:[%s10515_s5 + $0x140] sm:$0xff] }
  0x22   :  { %176 = vmatmul.mubr.bf16.vlgmr.msra.gmra.mrb[0].mxu0 %v34_v18  ;;  %v740_v8 = vld [vmem:[%s10515_s5 + $0x160] sm:$0xff] }
  0x23   :  { %599 = vmatpush1.bf16.msra.mxu0 %v7132_v19  ;;  %v6289_v9 = vcombine.high %v736_v7, %v740_v8  ;;  %v6288_v10 = vcombine.low %v736_v7, %v740_v8  ;;  %v744_v11 = vld [vmem:[%s10515_s5 + $0x180] sm:$0xff] }
  0x24   :  { %600 = vmatprep.subr.bf16.mxu0 %v7137_v20  ;;  %2279 = vmatpush1.bf16.msra.mxu1 %v6264_v62  ;;  %v748_v12 = vld [vmem:[%s10515_s5 + $0x1a0] sm:$0xff] }
  0x25   :  { %2280 = vmatprep.subr.bf16.mxu1 %v6273_v1  ;;  %v6297_v13 = vcombine.high %v744_v11, %v748_v12  ;;  %v6296_v14 = vcombine.low %v744_v11, %v748_v12  ;;  %v752_v15 = vld [vmem:[%s10515_s5 + $0x1c0] sm:$0xff] }
  0x26   :  { %v756_v16 = vld [vmem:[%s10515_s5 + $0x1e0] sm:$0xff] }
  0x27   :  { %601 = vmatpush1.bf16.msra.mxu0 %v7135_v21  ;;  %v6305_v17 = vcombine.high %v752_v15, %v756_v16  ;;  %v6304_v18 = vcombine.low %v752_v15, %v756_v16  ;;  %v760_v19 = vld [vmem:[%s10515_s5 + $0x200] sm:$0xff] }
  0x28   :  { %602 = vmatprep.subr.bf16.mxu0 %v7140_v22  ;;  %2281 = vmatpush1.bf16.msra.mxu1 %v6272_v2  ;;  %v764_v20 = vld [vmem:[%s10515_s5 + $0x220] sm:$0xff] }
  0x29   :  { %2282 = vmatprep.subr.bf16.mxu1 %v6281_v5  ;;  %v6313_v21 = vcombine.high %v760_v19, %v764_v20  ;;  %v6312_v22 = vcombine.low %v760_v19, %v764_v20 }
  0x2b   :  { %603 = vmatpush1.bf16.msra.mxu0 %v7138_v23  ;;  %v768_v23 = vld [vmem:[%s10515_s5 + $0x240] sm:$0xff] }
  0x2c   :  { %604 = vmatprep.subr.bf16.mxu0 %v7143_v24  ;;  %2283 = vmatpush1.bf16.msra.mxu1 %v6280_v6  ;;  %v772_v24 = vld [vmem:[%s10515_s5 + $0x260] sm:$0xff] }
  0x2d   :  { %2284 = vmatprep.subr.bf16.mxu1 %v6289_v9 }
  0x2f   :  { %605 = vmatpush1.bf16.msra.mxu0 %v7141_v25  ;;  %v6321_v25 = vcombine.high %v768_v23, %v772_v24 }
  0x30   :  { %606 = vmatprep.subr.bf16.mxu0 %v7146_v26  ;;  %2285 = vmatpush1.bf16.msra.mxu1 %v6288_v10  ;;  %v6320_v26 = vcombine.low %v768_v23, %v772_v24 }
  0x31   :  { %2286 = vmatprep.subr.bf16.mxu1 %v6297_v13 }
  0x33   :  { %607 = vmatpush1.bf16.msra.mxu0 %v7144_v27  ;;  %v776_v27 = vld [vmem:[%s10515_s5 + $0x280] sm:$0xff] }
  0x34   :  { %608 = vmatprep.subr.bf16.mxu0 %v7149_v28  ;;  %2287 = vmatpush1.bf16.msra.mxu1 %v6296_v14  ;;  %v780_v28 = vld [vmem:[%s10515_s5 + $0x2a0] sm:$0xff] }
  0x35   :  { %2288 = vmatprep.subr.bf16.mxu1 %v6305_v17 }
  0x37   :  { %609 = vmatpush1.bf16.msra.mxu0 %v7147_v29  ;;  %v6329_v29 = vcombine.high %v776_v27, %v780_v28 }
  0x38   :  { %610 = vmatprep.subr.bf16.mxu0 %v7152_v30  ;;  %2289 = vmatpush1.bf16.msra.mxu1 %v6304_v18  ;;  %v53_v30 = vlaneseq }
  0x39   :  { %2290 = vmatprep.subr.bf16.mxu1 %v6313_v21 }
  0x3b   :  { %611 = vmatpush1.bf16.msra.mxu0 %v7150_v31  ;;  %v6328_v31 = vcombine.low %v776_v27, %v780_v28 }
  0x3c   :  { %612 = vmatprep.subr.bf16.mxu0 %v7155_v32  ;;  %2291 = vmatpush1.bf16.msra.mxu1 %v6312_v22  ;;  %v784_v32 = vld [vmem:[%s10515_s5 + $0x2c0] sm:$0xff] }
  0x3d   :  { %2292 = vmatprep.subr.bf16.mxu1 %v6321_v25 }
  0x3f   :  { %613 = vmatpush1.bf16.msra.mxu0 %v7153_v33  ;;  %v788_v33 = vld [vmem:[%s10515_s5 + $0x2e0] sm:$0xff] }
  0x40   :  { %614 = vmatprep.subr.bf16.mxu0 %v7158_v34  ;;  %2293 = vmatpush1.bf16.msra.mxu1 %v6320_v26  ;;  %v6337_v34 = vcombine.high %v784_v32, %v788_v33 }
  0x41   :  { %2294 = vmatprep.subr.bf16.mxu1 %v6329_v29 }
  0x43   :  { %615 = vmatpush1.bf16.msra.mxu0 %v7156_v35  ;;  %v8180_v35 = vshrl.u32 %v53_v30, 7 }
  0x44   :  { %616 = vmatprep.subr.bf16.mxu0 %v7161_v36  ;;  %2295 = vmatpush1.bf16.msra.mxu1 %v6328_v31  ;;  %v6336_v36 = vcombine.low %v784_v32, %v788_v33 }
  0x45   :  { %2296 = vmatprep.subr.bf16.mxu1 %v6337_v34 }
  0x47   :  { %617 = vmatpush1.bf16.msra.mxu0 %v7159_v37  ;;  %v792_v37 = vld [vmem:[%s10515_s5 + $0x300] sm:$0xff] }
  0x48   :  { %618 = vmatprep.subr.bf16.mxu0 %v7164_v38  ;;  %v796_v38 = vld [vmem:[%s10515_s5 + $0x320] sm:$0xff]  ;;  %2297 = vmatpush1.bf16.msra.mxu1 %v6336_v36 }
  0x4b   :  { %619 = vmatpush1.bf16.msra.mxu0 %v7162_v39  ;;  %v51_v39 = vld [vmem:[%s10512_s2] sm:$0x3] }
  0x4c   :  { %620 = vmatprep.subr.bf16.mxu0 %v7167_v40  ;;  %v6345_v40 = vcombine.high %v792_v37, %v796_v38 }
  0x4e   :  { %2298 = vmatprep.subr.bf16.mxu1 %v6345_v40 }
  0x4f   :  { %621 = vmatpush1.bf16.msra.mxu0 %v7165_v41  ;;  %v8192_v41 = vsub.s32 0, %v8180_v35 }
  0x50   :  { %622 = vmatprep.subr.bf16.mxu0 %v7170_v42  ;;  %v8195_v42 = vsub.s32 1, %v8180_v35 }
  0x53   :  { %623 = vmatpush1.bf16.msra.mxu0 %v7168_v43  ;;  %v6344_v43 = vcombine.low %v792_v37, %v796_v38 }
  0x54   :  { %624 = vmatprep.subr.bf16.mxu0 %v7173_v44  ;;  %v800_v44 = vld [vmem:[%s10515_s5 + $0x340] sm:$0xff] }
  0x55   :  { %2299 = vmatpush1.bf16.msra.mxu1 %v6344_v43 }
  0x57   :  { %625 = vmatpush1.bf16.msra.mxu0 %v7171_v45  ;;  %v804_v45 = vld [vmem:[%s10515_s5 + $0x360] sm:$0xff] }
  0x58   :  { %626 = vmatprep.subr.bf16.mxu0 %v7176_v46  ;;  %v6353_v46 = vcombine.high %v800_v44, %v804_v45 }
  0x5b   :  { %627 = vmatpush1.bf16.msra.mxu0 %v7174_v47  ;;  %v56_v47 = vrot.slane %v51_v39, %v8192_v41 }
  0x5c   :  { %628 = vmatprep.subr.bf16.mxu0 %v7179_v48  ;;  %v60_v48 = vrot.slane %v51_v39, %v8195_v42 }
  0x5f   :  { %629 = vmatpush1.bf16.msra.mxu0 %v7177_v49  ;;  %v6352_v49 = vcombine.low %v800_v44, %v804_v45 }
  0x60   :  { %639 = vmatprep.subr.bf16.mxu0 %v7182_v50 }
  0x61   :  { %14 = vsyncpa [#allocation3], 0  ;;  %2300 = vmatprep.subr.bf16.mxu1 %v6353_v46  ;;  %v7180_v61 = vld [vmem:[%s10513_s3 + $0x8] ss:$16 sps:$4 sm:$0xff]   ;;  %v7185_v63 = vld [vmem:[%s10513_s3 + $0x2c] ss:$16 sps:$4 sm:$0xff]  }
  0x62   :  { %2301 = vmatpush1.bf16.msra.mxu1 %v6352_v49  ;;  %v7183_v0 = vld [vmem:[%s10513_s3 + $0x28] ss:$16 sps:$4 sm:$0xff]   ;;  %v7188_v1 = vld [vmem:[%s10513_s3 + $0x4c] ss:$16 sps:$4 sm:$0xff]   ;;  %vm6152_vm14 = vcmask 130048  }
  0x63   :  { %v7186_v2 = vld [vmem:[%s10513_s3 + $0x48] ss:$16 sps:$4 sm:$0xff]   ;;  %v7191_v3 = vld [vmem:[%s10513_s3 + $0x6c] ss:$16 sps:$4 sm:$0xff]  }
  0x64   :  { %v7189_v4 = vld [vmem:[%s10513_s3 + $0x68] ss:$16 sps:$4 sm:$0xff]   ;;  %v7194_v5 = vld [vmem:[%s10513_s3 + $0x8c] ss:$16 sps:$4 sm:$0xff]  }
  0x65   :  { %v7192_v6 = vld [vmem:[%s10513_s3 + $0x88] ss:$16 sps:$4 sm:$0xff]   ;;  %v7197_v7 = vld [vmem:[%s10513_s3 + $0xac] ss:$16 sps:$4 sm:$0xff]  }
  0x66   :  { %v7195_v8 = vld [vmem:[%s10513_s3 + $0xa8] ss:$16 sps:$4 sm:$0xff]   ;;  %v7200_v9 = vld [vmem:[%s10513_s3 + $0xcc] ss:$16 sps:$4 sm:$0xff]  }
  0x67   :  { %v7198_v10 = vld [vmem:[%s10513_s3 + $0xc8] ss:$16 sps:$4 sm:$0xff]   ;;  %v7203_v11 = vld [vmem:[%s10513_s3 + $0xec] ss:$16 sps:$4 sm:$0xff]  }
  0x68   :  { %v7201_v12 = vld [vmem:[%s10513_s3 + $0xe8] ss:$16 sps:$4 sm:$0xff]   ;;  %v7206_v13 = vld [vmem:[%s10513_s3 + $0x10c] ss:$16 sps:$4 sm:$0xff]  }
  0x69   :  { %v7204_v14 = vld [vmem:[%s10513_s3 + $0x108] ss:$16 sps:$4 sm:$0xff]   ;;  %v7209_v15 = vld [vmem:[%s10513_s3 + $0x12c] ss:$16 sps:$4 sm:$0xff]  }
  0x6a   :  { %v7207_v16 = vld [vmem:[%s10513_s3 + $0x128] ss:$16 sps:$4 sm:$0xff]   ;;  %v7212_v17 = vld [vmem:[%s10513_s3 + $0x14c] ss:$16 sps:$4 sm:$0xff]  }
  0x6b   :  { %v7210_v18 = vld [vmem:[%s10513_s3 + $0x148] ss:$16 sps:$4 sm:$0xff]   ;;  %v7215_v19 = vld [vmem:[%s10513_s3 + $0x16c] ss:$16 sps:$4 sm:$0xff]  }
  0x6c   :  { %v7213_v20 = vld [vmem:[%s10513_s3 + $0x168] ss:$16 sps:$4 sm:$0xff]   ;;  %v7218_v21 = vld [vmem:[%s10513_s3 + $0x18c] ss:$16 sps:$4 sm:$0xff]  }
  0x6d   :  { %v7216_v22 = vld [vmem:[%s10513_s3 + $0x188] ss:$16 sps:$4 sm:$0xff]   ;;  %v7221_v23 = vld [vmem:[%s10513_s3 + $0x1ac] ss:$16 sps:$4 sm:$0xff]  }
  0x6e   :  { %v7219_v24 = vld [vmem:[%s10513_s3 + $0x1a8] ss:$16 sps:$4 sm:$0xff]   ;;  %v7224_v25 = vld [vmem:[%s10513_s3 + $0x1cc] ss:$16 sps:$4 sm:$0xff]  }
  0x6f   :  { %v7222_v26 = vld [vmem:[%s10513_s3 + $0x1c8] ss:$16 sps:$4 sm:$0xff]   ;;  %v7227_v27 = vld [vmem:[%s10513_s3 + $0x1ec] ss:$16 sps:$4 sm:$0xff]  }
  0x70   :  { %v697_v28 = vld [vmem:[%s10515_s5 + $0x8] sm:$0xff] }
  0x71   :  { %v701_v29 = vld [vmem:[%s10515_s5 + $0x28] sm:$0xff] }
  0x72   :  { %v7225_v30 = vld [vmem:[%s10513_s3 + $0x1e8] ss:$16 sps:$4 sm:$0xff]   ;;  %v6251_v31 = vcombine.high %v697_v28, %v701_v29  ;;  %v6250_v34 = vcombine.low %v697_v28, %v701_v29 }
  0x73   :  { %v705_v32 = vld [vmem:[%s10515_s5 + $0x48] sm:$0xff] }
  0x74   :  { %v709_v33 = vld [vmem:[%s10515_s5 + $0x68] sm:$0xff] }
  0x75   :  { %v6259_v36 = vcombine.high %v705_v32, %v709_v33  ;;  %v713_v37 = vld [vmem:[%s10515_s5 + $0x88] sm:$0xff]  ;;  %v6258_v39 = vcombine.low %v705_v32, %v709_v33 }
  0x76   :  { %v717_v38 = vld [vmem:[%s10515_s5 + $0xa8] sm:$0xff] }
  0x77   :  { %v6267_v40 = vcombine.high %v713_v37, %v717_v38  ;;  %v721_v43 = vld [vmem:[%s10515_s5 + $0xc8] sm:$0xff]  ;;  %v6266_v45 = vcombine.low %v713_v37, %v717_v38 }
  0x78   :  { %v725_v44 = vld [vmem:[%s10515_s5 + $0xe8] sm:$0xff] }
  0x79   :  { %v6275_v46 = vcombine.high %v721_v43, %v725_v44  ;;  %v6274_v49 = vcombine.low %v721_v43, %v725_v44 }
  0xf5   :  { %v177_v50 = vpop.f32.mrb[0].mxu0 }
  0xf6   :  { %v178_v51 = vadd.f32 %v177_v50, %v56_v47  ;;  %v179_v52 = vpop.f32.mrb[1].mxu0  ;;  %v729_v47 = vld [vmem:[%s10515_s5 + $0x108] sm:$0xff] }
  0xf7   :  { %v180_v53 = vadd.f32 %v179_v52, %v60_v48  ;;  %v181_v54 = vpop.f32.mrb[2].mxu0  ;;  %v733_v48 = vld [vmem:[%s10515_s5 + $0x128] sm:$0xff] }
  0xf8   :  { %vm184_vm0 = vcmp.gt.f32.partialorder %v178_v51, 0.0  ;;  %v186_v55 = vmul.f32 0.2, %v178_v51  ;;  %v182_v56 = vpop.f32.mrb[3].mxu0  ;;  %v6283_v50 = vcombine.high %v729_v47, %v733_v48  ;;  %v741_v52 = vld [vmem:[%s10515_s5 + $0x168] sm:$0xff] }
  0xf9   :  { %vm185_vm1 = vcmp.gt.f32.partialorder %v180_v53, 0.0  ;;  %v187_v57 = vmul.f32 0.2, %v180_v53  ;;  %v749_v56 = vld [vmem:[%s10515_s5 + $0x1a8] sm:$0xff] }
  0xfa   :  { %v188_v58 = vsel %vm184_vm0, %v178_v51, %v186_v55  ;;  %v737_v51 = vld [vmem:[%s10515_s5 + $0x148] sm:$0xff] }
  0xfb   :  { %v189_v59 = vsel %vm185_vm1, %v180_v53, %v187_v57  ;;  %v8208_v62 = vpack.c.bf16 %v188_v58, %v188_v58  ;;  %v6282_v53 = vcombine.low %v729_v47, %v733_v48  ;;  %v6291_v54 = vcombine.high %v737_v51, %v741_v52  ;;  %v745_v55 = vld [vmem:[%s10515_s5 + $0x188] sm:$0xff] }
  0xfc   :  { %v191_v60 = vpack.c.bf16 %v189_v59, %v189_v59  ;;  %v6290_v57 = vcombine.low %v737_v51, %v741_v52  ;;  %v6299_v58 = vcombine.high %v745_v55, %v749_v56  ;;  %v808_v59 = vld [vmem:[%s10515_s5 + $0x380] sm:$0xff] }
  0xfd   :  { %v8441_v51 = vld [vmem:[%s10514_s4] sm:$0xf] }
  0xfe   :  { %630 = vmatprep.mubr.bf16.mxu0 %v191_v60  ;;  %v261_v52 = vrot.slane %v8441_v51, %v8192_v41 }
  0xff   :  { %631 = vmatmul.mubr.bf16.vlgmr.msra.gmra.mrb[4].mxu0 %v8208_v62 }
 0x100   :  { %640 = vmatpush1.bf16.msra.mxu0 %v7180_v61  ;;  %671 = vmatprep.mubr.bf16.mxu0 %v191_v60  ;;  %v812_v60 = vld [vmem:[%s10515_s5 + $0x3a0] sm:$0xff]  ;;  %v753_v61 = vld [vmem:[%s10515_s5 + $0x1c8] sm:$0xff] }
 0x101   :  { %641 = vmatprep.subr.bf16.mxu0 %v7185_v63  ;;  %v6361_v63 = vcombine.high %v808_v59, %v812_v60 }
 0x103   :  { %2302 = vmatprep.subr.bf16.mxu1 %v6361_v63 }
 0x104   :  { %642 = vmatpush1.bf16.msra.mxu0 %v7183_v0  ;;  %v6360_v0 = vcombine.low %v808_v59, %v812_v60 }
 0x105   :  { %643 = vmatprep.subr.bf16.mxu0 %v7188_v1  ;;  %v6298_v1 = vcombine.low %v745_v55, %v749_v56 }
 0x106   :  { %2303 = vmatpush1.bf16.msra.mxu1 %v6360_v0  ;;  %v836_v0 = vld [vmem:[%s10515_s5 + $0x460] sm:$0xff] }
 0x108   :  { %644 = vmatpush1.bf16.msra.mxu0 %v7186_v2 }
 0x109   :  { %645 = vmatprep.subr.bf16.mxu0 %v7191_v3  ;;  %v816_v3 = vld [vmem:[%s10515_s5 + $0x3c0] sm:$0xff] }
 0x10c   :  { %646 = vmatpush1.bf16.msra.mxu0 %v7189_v4  ;;  %v820_v4 = vld [vmem:[%s10515_s5 + $0x3e0] sm:$0xff] }
 0x10d   :  { %647 = vmatprep.subr.bf16.mxu0 %v7194_v5  ;;  %v761_v5 = vld [vmem:[%s10515_s5 + $0x208] sm:$0xff] }
 0x110   :  { %648 = vmatpush1.bf16.msra.mxu0 %v7192_v6  ;;  %v765_v6 = vld [vmem:[%s10515_s5 + $0x228] sm:$0xff] }
 0x111   :  { %649 = vmatprep.subr.bf16.mxu0 %v7197_v7  ;;  %v6369_v7 = vcombine.high %v816_v3, %v820_v4 }
 0x113   :  { %2304 = vmatprep.subr.bf16.mxu1 %v6369_v7 }
 0x114   :  { %650 = vmatpush1.bf16.msra.mxu0 %v7195_v8  ;;  %v6368_v8 = vcombine.low %v816_v3, %v820_v4 }
 0x115   :  { %651 = vmatprep.subr.bf16.mxu0 %v7200_v9 }
 0x116   :  { %2305 = vmatpush1.bf16.msra.mxu1 %v6368_v8  ;;  %v840_v8 = vld [vmem:[%s10515_s5 + $0x480] sm:$0xff] }
 0x118   :  { %652 = vmatpush1.bf16.msra.mxu0 %v7198_v10  ;;  %v6315_v10 = vcombine.high %v761_v5, %v765_v6 }
 0x119   :  { %653 = vmatprep.subr.bf16.mxu0 %v7203_v11  ;;  %v8371_v11 = vld [vmem:[%s10515_s5 + $0x400] sm:$0xff] }
 0x11c   :  { %654 = vmatpush1.bf16.msra.mxu0 %v7201_v12  ;;  %v8376_v12 = vld [vmem:[%s10515_s5 + $0x420] sm:$0xff] }
 0x11d   :  { %655 = vmatprep.subr.bf16.mxu0 %v7206_v13  ;;  %v8381_v13 = vld [vmem:[%s10515_s5 + $0x408] sm:$0xff] }
 0x120   :  { %656 = vmatpush1.bf16.msra.mxu0 %v7204_v14  ;;  %v769_v14 = vld [vmem:[%s10515_s5 + $0x248] sm:$0xff] }
 0x121   :  { %657 = vmatprep.subr.bf16.mxu0 %v7209_v15  ;;  %v773_v15 = vld [vmem:[%s10515_s5 + $0x268] sm:$0xff] }
 0x124   :  { %658 = vmatpush1.bf16.msra.mxu0 %v7207_v16  ;;  %v6377_v16 = vcombine.high %v8371_v11, %v8376_v12 }
 0x125   :  { %659 = vmatprep.subr.bf16.mxu0 %v7212_v17  ;;  %v8394_v17 = vld [vmem:[%s10515_s5 + $0x428] sm:$0xff] }
 0x126   :  { %2315 = vmatprep.subr.bf16.mxu1 %v6377_v16 }
 0x128   :  { %660 = vmatpush1.bf16.msra.mxu0 %v7210_v18  ;;  %v6376_v18 = vcombine.low %v8371_v11, %v8376_v12  ;;  %v849_v11 = vld [vmem:[%s10515_s5 + $0x4c8] sm:$0xff] }
 0x129   :  { %661 = vmatprep.subr.bf16.mxu0 %v7215_v19  ;;  %v6378_v19 = vcombine.low %v8381_v13, %v8394_v17  ;;  %v853_v12 = vld [vmem:[%s10515_s5 + $0x4e8] sm:$0xff] }
 0x12c   :  { %662 = vmatpush1.bf16.msra.mxu0 %v7213_v20  ;;  %v6314_v20 = vcombine.low %v761_v5, %v765_v6 }
 0x12d   :  { %663 = vmatprep.subr.bf16.mxu0 %v7218_v21  ;;  %v6323_v21 = vcombine.high %v769_v14, %v773_v15 }
 0x130   :  { %664 = vmatpush1.bf16.msra.mxu0 %v7216_v22  ;;  %v777_v22 = vld [vmem:[%s10515_s5 + $0x288] sm:$0xff] }
 0x131   :  { %665 = vmatprep.subr.bf16.mxu0 %v7221_v23  ;;  %v781_v23 = vld [vmem:[%s10515_s5 + $0x2a8] sm:$0xff] }
 0x132   :  { %v6330_v28 = vcombine.low %v777_v22, %v781_v23 }
 0x134   :  { %666 = vmatpush1.bf16.msra.mxu0 %v7219_v24  ;;  %v6322_v24 = vcombine.low %v769_v14, %v773_v15  ;;  %v845_v14 = vld [vmem:[%s10515_s5 + $0x4a8] sm:$0xff] }
 0x135   :  { %667 = vmatprep.subr.bf16.mxu0 %v7224_v25  ;;  %v6331_v25 = vcombine.high %v777_v22, %v781_v23  ;;  %v848_v22 = vld [vmem:[%s10515_s5 + $0x4c0] sm:$0xff] }
 0x136   :  { %v852_v23 = vld [vmem:[%s10515_s5 + $0x4e0] sm:$0xff] }
 0x138   :  { %668 = vmatpush1.bf16.msra.mxu0 %v7222_v26  ;;  %v785_v26 = vld [vmem:[%s10515_s5 + $0x2c8] sm:$0xff] }
 0x139   :  { %669 = vmatprep.subr.bf16.mxu0 %v7227_v27  ;;  %v789_v27 = vld [vmem:[%s10515_s5 + $0x2e8] sm:$0xff] }
 0x13a   :  { %v6339_v29 = vcombine.high %v785_v26, %v789_v27  ;;  %v6338_v32 = vcombine.low %v785_v26, %v789_v27  ;;  %v857_v26 = vld [vmem:[%s10515_s5 + $0x508] sm:$0xff] }
 0x13b   :  { %v861_v27 = vld [vmem:[%s10515_s5 + $0x528] sm:$0xff] }
 0x13c   :  { %670 = vmatpush1.bf16.msra.mxu0 %v7225_v30  ;;  %v793_v30 = vld [vmem:[%s10515_s5 + $0x308] sm:$0xff] }
 0x13d   :  { %2356 = vmatprep.subr.bf16.mxu0 %v6251_v31  ;;  %v797_v31 = vld [vmem:[%s10515_s5 + $0x328] sm:$0xff] }
 0x13e   :  { %v6347_v33 = vcombine.high %v793_v30, %v797_v31  ;;  %v6346_v37 = vcombine.low %v793_v30, %v797_v31  ;;  %v6411_v31 = vcombine.high %v857_v26, %v861_v27 }
 0x13f   :  { %672 = vmatmul.mubr.bf16.vlgmr.msra.gmra.mrb[8].mxu0 %v8208_v62  ;;  %v757_v62 = vld [vmem:[%s10515_s5 + $0x1e8] sm:$0xff] }
 0x140   :  { %2357 = vmatpush1.bf16.msra.mxu0 %v6250_v34  ;;  %v6307_v2 = vcombine.high %v753_v61, %v757_v62  ;;  %v6306_v9 = vcombine.low %v753_v61, %v757_v62  ;;  %v801_v34 = vld [vmem:[%s10515_s5 + $0x348] sm:$0xff]  ;;  %v832_v62 = vld [vmem:[%s10515_s5 + $0x440] sm:$0xff] }
 0x141   :  { %2358 = vmatprep.subr.bf16.mxu0 %v6259_v36  ;;  %v805_v36 = vld [vmem:[%s10515_s5 + $0x368] sm:$0xff]  ;;  %v6385_v6 = vcombine.high %v832_v62, %v836_v0  ;;  %v6384_v15 = vcombine.low %v832_v62, %v836_v0 }
 0x142   :  { %v6355_v38 = vcombine.high %v801_v34, %v805_v36  ;;  %v6354_v43 = vcombine.low %v801_v34, %v805_v36  ;;  %v865_v34 = vld [vmem:[%s10515_s5 + $0x548] sm:$0xff] }
 0x143   :  { %v869_v36 = vld [vmem:[%s10515_s5 + $0x568] sm:$0xff] }
 0x144   :  { %2359 = vmatpush1.bf16.msra.mxu0 %v6258_v39  ;;  %v809_v39 = vld [vmem:[%s10515_s5 + $0x388] sm:$0xff] }
 0x145   :  { %2360 = vmatprep.subr.bf16.mxu0 %v6267_v40  ;;  %v813_v40 = vld [vmem:[%s10515_s5 + $0x3a8] sm:$0xff] }
 0x146   :  { %v6363_v44 = vcombine.high %v809_v39, %v813_v40  ;;  %v6362_v47 = vcombine.low %v809_v39, %v813_v40  ;;  %v6419_v40 = vcombine.high %v865_v34, %v869_v36  ;;  %v889_v62 = vld [vmem:[%s10515_s5 + $0x608] sm:$0xff] }
 0x148   :  { %2361 = vmatpush1.bf16.msra.mxu0 %v6266_v45  ;;  %v817_v45 = vld [vmem:[%s10515_s5 + $0x3c8] sm:$0xff] }
 0x149   :  { %2362 = vmatprep.subr.bf16.mxu0 %v6275_v46  ;;  %v821_v46 = vld [vmem:[%s10515_s5 + $0x3e8] sm:$0xff] }
 0x14a   :  { %v6371_v48 = vcombine.high %v817_v45, %v821_v46 }
 0x14c   :  { %2363 = vmatpush1.bf16.msra.mxu0 %v6274_v49  ;;  %v6370_v49 = vcombine.low %v817_v45, %v821_v46  ;;  %v873_v45 = vld [vmem:[%s10515_s5 + $0x588] sm:$0xff] }
 0x14d   :  { %2364 = vmatprep.subr.bf16.mxu0 %v6283_v50  ;;  %v6379_v50 = vcombine.high %v8381_v13, %v8394_v17  ;;  %v877_v46 = vld [vmem:[%s10515_s5 + $0x5a8] sm:$0xff] }
 0x150   :  { %2365 = vmatpush1.bf16.msra.mxu0 %v6282_v53  ;;  %v265_v53 = vrot.slane %v8441_v51, %v8195_v42 }
 0x151   :  { %2366 = vmatprep.subr.bf16.mxu0 %v6291_v54 }
 0x154   :  { %2367 = vmatpush1.bf16.msra.mxu0 %v6290_v57 }
 0x155   :  { %2368 = vmatprep.subr.bf16.mxu0 %v6299_v58 }
 0x158   :  { %2369 = vmatpush1.bf16.msra.mxu0 %v6298_v1  ;;  %v833_v1 = vld [vmem:[%s10515_s5 + $0x448] sm:$0xff] }
 0x159   :  { %2370 = vmatprep.subr.bf16.mxu0 %v6307_v2  ;;  %v837_v2 = vld [vmem:[%s10515_s5 + $0x468] sm:$0xff] }
 0x15a   :  { %v6387_v7 = vcombine.high %v833_v1, %v837_v2  ;;  %v6386_v16 = vcombine.low %v833_v1, %v837_v2 }
 0x15c   :  { %2371 = vmatpush1.bf16.msra.mxu0 %v6306_v9  ;;  %v844_v9 = vld [vmem:[%s10515_s5 + $0x4a0] sm:$0xff] }
 0x15d   :  { %2372 = vmatprep.subr.bf16.mxu0 %v6315_v10  ;;  %v841_v10 = vld [vmem:[%s10515_s5 + $0x488] sm:$0xff]  ;;  %v6392_v13 = vcombine.low %v840_v8, %v844_v9 }
 0x15e   :  { %v6394_v17 = vcombine.low %v841_v10, %v845_v14 }
 0x160   :  { %2373 = vmatpush1.bf16.msra.mxu0 %v6314_v20  ;;  %v6393_v20 = vcombine.high %v840_v8, %v844_v9  ;;  %v897_v8 = vld [vmem:[%s10515_s5 + $0x648] sm:$0xff] }
 0x161   :  { %2374 = vmatprep.subr.bf16.mxu0 %v6323_v21  ;;  %v6395_v21 = vcombine.high %v841_v10, %v845_v14  ;;  %v901_v9 = vld [vmem:[%s10515_s5 + $0x668] sm:$0xff] }
 0x164   :  { %2375 = vmatpush1.bf16.msra.mxu0 %v6322_v24  ;;  %v856_v24 = vld [vmem:[%s10515_s5 + $0x500] sm:$0xff] }
 0x165   :  { %2376 = vmatprep.subr.bf16.mxu0 %v6331_v25  ;;  %v860_v25 = vld [vmem:[%s10515_s5 + $0x520] sm:$0xff] }
 0x166   :  { %v6409_v30 = vcombine.high %v856_v24, %v860_v25 }
 0x168   :  { %2377 = vmatpush1.bf16.msra.mxu0 %v6330_v28  ;;  %v6400_v28 = vcombine.low %v848_v22, %v852_v23 }
 0x169   :  { %2378 = vmatprep.subr.bf16.mxu0 %v6339_v29  ;;  %v6402_v29 = vcombine.low %v849_v11, %v853_v12 }
 0x16c   :  { %2379 = vmatpush1.bf16.msra.mxu0 %v6338_v32  ;;  %v864_v32 = vld [vmem:[%s10515_s5 + $0x540] sm:$0xff] }
 0x16d   :  { %2380 = vmatprep.subr.bf16.mxu0 %v6347_v33  ;;  %v868_v33 = vld [vmem:[%s10515_s5 + $0x560] sm:$0xff] }
 0x16e   :  { %v6417_v39 = vcombine.high %v864_v32, %v868_v33 }
 0x170   :  { %2381 = vmatpush1.bf16.msra.mxu0 %v6346_v37  ;;  %v6408_v37 = vcombine.low %v856_v24, %v860_v25  ;;  %v913_v24 = vld [vmem:[%s10515_s5 + $0x6c8] sm:$0xff] }
 0x171   :  { %2382 = vmatprep.subr.bf16.mxu0 %v6355_v38  ;;  %v6410_v38 = vcombine.low %v857_v26, %v861_v27  ;;  %v917_v25 = vld [vmem:[%s10515_s5 + $0x6e8] sm:$0xff] }
 0x174   :  { %2383 = vmatpush1.bf16.msra.mxu0 %v6354_v43  ;;  %v872_v43 = vld [vmem:[%s10515_s5 + $0x580] sm:$0xff] }
 0x175   :  { %2384 = vmatprep.subr.bf16.mxu0 %v6363_v44  ;;  %v876_v44 = vld [vmem:[%s10515_s5 + $0x5a0] sm:$0xff] }
 0x178   :  { %2385 = vmatpush1.bf16.msra.mxu0 %v6362_v47  ;;  %v6416_v47 = vcombine.low %v864_v32, %v868_v33  ;;  %v921_v32 = vld [vmem:[%s10515_s5 + $0x708] sm:$0xff] }
 0x179   :  { %2386 = vmatprep.subr.bf16.mxu0 %v6371_v48  ;;  %v6418_v48 = vcombine.low %v865_v34, %v869_v36  ;;  %v925_v33 = vld [vmem:[%s10515_s5 + $0x728] sm:$0xff]  ;;  %v6466_v36 = vcombine.low %v913_v24, %v917_v25 }
 0x17c   :  { %2387 = vmatpush1.bf16.msra.mxu0 %v6370_v49  ;;  %v6425_v49 = vcombine.high %v872_v43, %v876_v44 }
 0x17d   :  { %2397 = vmatprep.subr.bf16.mxu0 %v6379_v50  ;;  %v6427_v50 = vcombine.high %v873_v45, %v877_v46 }
 0x1d2   :  { %v632_v54 = vpop.f32.mrb[4].mxu0 }
 0x1d3   :  { %v633_v55 = vadd.f32 %v632_v54, %v261_v52  ;;  %v634_v56 = vpop.f32.mrb[5].mxu0  ;;  %v880_v52 = vld [vmem:[%s10515_s5 + $0x5c0] sm:$0xff]  ;;  %v881_v54 = vld [vmem:[%s10515_s5 + $0x5c8] sm:$0xff] }
 0x1d4   :  { %v635_v57 = vadd.f32 %v634_v56, %v265_v53  ;;  %v636_v58 = vpop.f32.mrb[6].mxu0  ;;  %v884_v53 = vld [vmem:[%s10515_s5 + $0x5e0] sm:$0xff]  ;;  %v6424_v56 = vcombine.low %v872_v43, %v876_v44  ;;  %v929_v43 = vld [vmem:[%s10515_s5 + $0x748] sm:$0xff] }
 0x1d5   :  { %vm680_vm2 = vcmp.gt.f32.partialorder %v633_v55, 0.0  ;;  %v684_v59 = vmul.f32 0.2, %v633_v55  ;;  %v637_v60 = vpop.f32.mrb[7].mxu0  ;;  %v6433_v58 = vcombine.high %v880_v52, %v884_v53  ;;  %v6432_v0 = vcombine.low %v880_v52, %v884_v53  ;;  %v933_v44 = vld [vmem:[%s10515_s5 + $0x768] sm:$0xff]  ;;  %v940_v52 = vld [vmem:[%s10515_s5 + $0x7a0] sm:$0xff] }
 0x1d6   :  { %vm681_vm3 = vcmp.gt.f32.partialorder %v635_v57, 0.0  ;;  %v685_v61 = vmul.f32 0.2, %v635_v57  ;;  %v888_v60 = vld [vmem:[%s10515_s5 + $0x600] sm:$0xff]  ;;  %v937_v53 = vld [vmem:[%s10515_s5 + $0x788] sm:$0xff] }
 0x1d7   :  { %v688_v63 = vsel %vm680_vm2, %v633_v55, %v684_v59  ;;  %v885_v55 = vld [vmem:[%s10515_s5 + $0x5e8] sm:$0xff] }
 0x1d8   :  { %v689_v3 = vsel %vm681_vm3, %v635_v57, %v685_v61  ;;  %v8461_v5 = vpack.c.bf16 %v688_v63, %v688_v63  ;;  %v6426_v57 = vcombine.low %v873_v45, %v877_v46  ;;  %v6435_v59 = vcombine.high %v881_v54, %v885_v55  ;;  %v892_v61 = vld [vmem:[%s10515_s5 + $0x620] sm:$0xff]  ;;  %v893_v63 = vld [vmem:[%s10515_s5 + $0x628] sm:$0xff] }
 0x1d9   :  { %v8459_v4 = vpack.c.bf16 %v689_v3, %v689_v3  ;;  %v6434_v1 = vcombine.low %v881_v54, %v885_v55  ;;  %v6441_v2 = vcombine.high %v888_v60, %v892_v61  ;;  %v6443_v3 = vcombine.high %v889_v62, %v893_v63  ;;  %v941_v54 = vld [vmem:[%s10515_s5 + $0x7a8] sm:$0xff] }
 0x1da   :  { %v6440_v10 = vcombine.low %v888_v60, %v892_v61  ;;  %v6442_v14 = vcombine.low %v889_v62, %v893_v63  ;;  %v6474_v46 = vcombine.low %v921_v32, %v925_v33  ;;  %v8633_v55 = vsub.s32 3, %v8180_v35  ;;  %v944_v60 = vld [vmem:[%s10515_s5 + $0x7c0] sm:$0xff]  ;;  %v945_v63 = vld [vmem:[%s10515_s5 + $0x7c8] sm:$0xff] }
 0x1db   :  { %2306 = vmatprep.mubr.bf16.mxu1 %v8459_v4  ;;  %2388 = vmatprep.mubr.bf16.mxu0 %v8459_v4  ;;  %v948_v62 = vld [vmem:[%s10515_s5 + $0x7e0] sm:$0xff] }
 0x1dc   :  { %2307 = vmatmul.mubr.bf16.vlgmr.msra.gmra.mrb[0].mxu1 %v8461_v5  ;;  %2389 = vmatmul.mubr.bf16.vlgmr.msra.gmra.mrb[12].mxu0 %v8461_v5 }
 0x1dd   :  { %2316 = vmatpush1.bf16.msra.mxu1 %v6376_v18  ;;  %2398 = vmatpush1.bf16.msra.mxu0 %v6378_v19  ;;  %v6401_v18 = vcombine.high %v848_v22, %v852_v23  ;;  %v6403_v19 = vcombine.high %v849_v11, %v853_v12  ;;  %v905_v22 = vld [vmem:[%s10515_s5 + $0x688] sm:$0xff]  ;;  %v6450_v12 = vcombine.low %v897_v8, %v901_v9 }
 0x1de   :  { %2317 = vmatprep.subr.bf16.mxu1 %v6385_v6  ;;  %2399 = vmatprep.subr.bf16.mxu0 %v6387_v7  ;;  %v896_v6 = vld [vmem:[%s10515_s5 + $0x640] sm:$0xff]  ;;  %v909_v23 = vld [vmem:[%s10515_s5 + $0x6a8] sm:$0xff] }
 0x1df   :  { %v900_v7 = vld [vmem:[%s10515_s5 + $0x660] sm:$0xff]  ;;  %v6458_v27 = vcombine.low %v905_v22, %v909_v23 }
 0x1e0   :  { %v6448_v11 = vcombine.low %v896_v6, %v900_v7 }
 0x1e1   :  { %2318 = vmatpush1.bf16.msra.mxu1 %v6384_v15  ;;  %2400 = vmatpush1.bf16.msra.mxu0 %v6386_v16  ;;  %v6449_v15 = vcombine.high %v896_v6, %v900_v7  ;;  %v6451_v16 = vcombine.high %v897_v8, %v901_v9  ;;  %v6497_v7 = vcombine.high %v944_v60, %v948_v62  ;;  %v698_v9 = vld [vmem:[%s10515_s5 + $0x10] sm:$0xff] }
 0x1e2   :  { %2319 = vmatprep.subr.bf16.mxu1 %v6393_v20  ;;  %2401 = vmatprep.subr.bf16.mxu0 %v6395_v21  ;;  %v904_v20 = vld [vmem:[%s10515_s5 + $0x680] sm:$0xff] }
 0x1e3   :  { %v908_v21 = vld [vmem:[%s10515_s5 + $0x6a0] sm:$0xff] }
 0x1e4   :  { %v6456_v26 = vcombine.low %v904_v20, %v908_v21 }
 0x1e5   :  { %2320 = vmatpush1.bf16.msra.mxu1 %v6392_v13  ;;  %2402 = vmatpush1.bf16.msra.mxu0 %v6394_v17  ;;  %v6457_v13 = vcombine.high %v904_v20, %v908_v21  ;;  %v6459_v17 = vcombine.high %v905_v22, %v909_v23 }
 0x1e6   :  { %2321 = vmatprep.subr.bf16.mxu1 %v6401_v18  ;;  %2403 = vmatprep.subr.bf16.mxu0 %v6403_v19  ;;  %v912_v18 = vld [vmem:[%s10515_s5 + $0x6c0] sm:$0xff] }
 0x1e7   :  { %v916_v19 = vld [vmem:[%s10515_s5 + $0x6e0] sm:$0xff] }
 0x1e8   :  { %v6464_v34 = vcombine.low %v912_v18, %v916_v19 }
 0x1e9   :  { %2322 = vmatpush1.bf16.msra.mxu1 %v6400_v28  ;;  %2404 = vmatpush1.bf16.msra.mxu0 %v6402_v29  ;;  %v6465_v28 = vcombine.high %v912_v18, %v916_v19  ;;  %v6467_v29 = vcombine.high %v913_v24, %v917_v25  ;;  %v706_v24 = vld [vmem:[%s10515_s5 + $0x50] sm:$0xff] }
 0x1ea   :  { %2323 = vmatprep.subr.bf16.mxu1 %v6409_v30  ;;  %2405 = vmatprep.subr.bf16.mxu0 %v6411_v31  ;;  %v920_v30 = vld [vmem:[%s10515_s5 + $0x700] sm:$0xff] }
 0x1eb   :  { %v924_v31 = vld [vmem:[%s10515_s5 + $0x720] sm:$0xff] }
 0x1ec   :  { %v6472_v45 = vcombine.low %v920_v30, %v924_v31 }
 0x1ed   :  { %2324 = vmatpush1.bf16.msra.mxu1 %v6408_v37  ;;  %2406 = vmatpush1.bf16.msra.mxu0 %v6410_v38  ;;  %v6473_v37 = vcombine.high %v920_v30, %v924_v31  ;;  %v6475_v38 = vcombine.high %v921_v32, %v925_v33 }
 0x1ee   :  { %2325 = vmatprep.subr.bf16.mxu1 %v6417_v39  ;;  %2407 = vmatprep.subr.bf16.mxu0 %v6419_v40  ;;  %v928_v39 = vld [vmem:[%s10515_s5 + $0x740] sm:$0xff] }
 0x1ef   :  { %v932_v40 = vld [vmem:[%s10515_s5 + $0x760] sm:$0xff] }
 0x1f1   :  { %2326 = vmatpush1.bf16.msra.mxu1 %v6416_v47  ;;  %2408 = vmatpush1.bf16.msra.mxu0 %v6418_v48  ;;  %v6481_v47 = vcombine.high %v928_v39, %v932_v40  ;;  %v6483_v48 = vcombine.high %v929_v43, %v933_v44 }
 0x1f2   :  { %2327 = vmatprep.subr.bf16.mxu1 %v6425_v49  ;;  %2409 = vmatprep.subr.bf16.mxu0 %v6427_v50  ;;  %v936_v49 = vld [vmem:[%s10515_s5 + $0x780] sm:$0xff]  ;;  %v8621_v50 = vsub.s32 2, %v8180_v35 }
 0x1f4   :  { %v269_v61 = vrot.slane %v8441_v51, %v8621_v50 }
 0x1f5   :  { %2328 = vmatpush1.bf16.msra.mxu1 %v6424_v56  ;;  %2410 = vmatpush1.bf16.msra.mxu0 %v6426_v57  ;;  %v6480_v56 = vcombine.low %v928_v39, %v932_v40  ;;  %v6482_v57 = vcombine.low %v929_v43, %v933_v44  ;;  %v719_v39 = vld [vmem:[%s10515_s5 + $0xb8] sm:$0xff] }
 0x1f6   :  { %2329 = vmatprep.subr.bf16.mxu1 %v6433_v58  ;;  %2411 = vmatprep.subr.bf16.mxu0 %v6435_v59  ;;  %v6489_v58 = vcombine.high %v936_v49, %v940_v52  ;;  %v6491_v59 = vcombine.high %v937_v53, %v941_v54 }
 0x1f9   :  { %2330 = vmatpush1.bf16.msra.mxu1 %v6432_v0  ;;  %2412 = vmatpush1.bf16.msra.mxu0 %v6434_v1  ;;  %v949_v0 = vld [vmem:[%s10515_s5 + $0x7e8] sm:$0xff]  ;;  %v273_v1 = vrot.slane %v8441_v51, %v8633_v55  ;;  %v699_v51 = vld [vmem:[%s10515_s5 + $0x18] sm:$0xff] }
 0x1fa   :  { %2331 = vmatprep.subr.bf16.mxu1 %v6441_v2  ;;  %2413 = vmatprep.subr.bf16.mxu0 %v6443_v3  ;;  %v6488_v2 = vcombine.low %v936_v49, %v940_v52  ;;  %v6490_v3 = vcombine.low %v937_v53, %v941_v54  ;;  %v6499_v8 = vcombine.high %v945_v63, %v949_v0 }
 0x1fd   :  { %2332 = vmatpush1.bf16.msra.mxu1 %v6440_v10  ;;  %2414 = vmatpush1.bf16.msra.mxu0 %v6442_v14 }
 0x1fe   :  { %2333 = vmatprep.subr.bf16.mxu1 %v6449_v15  ;;  %2415 = vmatprep.subr.bf16.mxu0 %v6451_v16  ;;  %v702_v15 = vld [vmem:[%s10515_s5 + $0x30] sm:$0xff]  ;;  %v703_v16 = vld [vmem:[%s10515_s5 + $0x38] sm:$0xff] }
 0x1ff   :  { %v6255_v18 = vcombine.high %v699_v51, %v703_v16  ;;  %v6252_v30 = vcombine.low %v698_v9, %v702_v15  ;;  %v6254_v32 = vcombine.low %v699_v51, %v703_v16  ;;  %v751_v51 = vld [vmem:[%s10515_s5 + $0x1b8] sm:$0xff] }
 0x201   :  { %2334 = vmatpush1.bf16.msra.mxu1 %v6448_v11  ;;  %2416 = vmatpush1.bf16.msra.mxu0 %v6450_v12  ;;  %v6496_v11 = vcombine.low %v944_v60, %v948_v62  ;;  %v6498_v12 = vcombine.low %v945_v63, %v949_v0  ;;  %v738_v0 = vld [vmem:[%s10515_s5 + $0x150] sm:$0xff] }
 0x202   :  { %2335 = vmatprep.subr.bf16.mxu1 %v6457_v13  ;;  %2417 = vmatprep.subr.bf16.mxu0 %v6459_v17  ;;  %v6253_v17 = vcombine.high %v698_v9, %v702_v15  ;;  %v747_v15 = vld [vmem:[%s10515_s5 + $0x198] sm:$0xff] }
 0x205   :  { %2336 = vmatpush1.bf16.msra.mxu1 %v6456_v26  ;;  %2418 = vmatpush1.bf16.msra.mxu0 %v6458_v27  ;;  %v710_v26 = vld [vmem:[%s10515_s5 + $0x70] sm:$0xff]  ;;  %v707_v27 = vld [vmem:[%s10515_s5 + $0x58] sm:$0xff] }
 0x206   :  { %2337 = vmatprep.subr.bf16.mxu1 %v6465_v28  ;;  %2419 = vmatprep.subr.bf16.mxu0 %v6467_v29  ;;  %v711_v28 = vld [vmem:[%s10515_s5 + $0x78] sm:$0xff]  ;;  %v6261_v33 = vcombine.high %v706_v24, %v710_v26  ;;  %v6260_v40 = vcombine.low %v706_v24, %v710_v26  ;;  %v766_v26 = vld [vmem:[%s10515_s5 + $0x230] sm:$0xff] }
 0x207   :  { %v6262_v43 = vcombine.low %v707_v27, %v711_v28 }
 0x209   :  { %2338 = vmatpush1.bf16.msra.mxu1 %v6464_v34  ;;  %2420 = vmatpush1.bf16.msra.mxu0 %v6466_v36  ;;  %v6263_v34 = vcombine.high %v707_v27, %v711_v28  ;;  %v714_v36 = vld [vmem:[%s10515_s5 + $0x90] sm:$0xff]  ;;  %v763_v27 = vld [vmem:[%s10515_s5 + $0x218] sm:$0xff] }
 0x20a   :  { %2339 = vmatprep.subr.bf16.mxu1 %v6473_v37  ;;  %2421 = vmatprep.subr.bf16.mxu0 %v6475_v38  ;;  %v718_v37 = vld [vmem:[%s10515_s5 + $0xb0] sm:$0xff]  ;;  %v715_v38 = vld [vmem:[%s10515_s5 + $0x98] sm:$0xff] }
 0x20b   :  { %v6269_v44 = vcombine.high %v714_v36, %v718_v37  ;;  %v6268_v49 = vcombine.low %v714_v36, %v718_v37  ;;  %v6270_v52 = vcombine.low %v715_v38, %v719_v39  ;;  %v767_v28 = vld [vmem:[%s10515_s5 + $0x238] sm:$0xff]  ;;  %v770_v36 = vld [vmem:[%s10515_s5 + $0x250] sm:$0xff] }
 0x20c   :  { %v774_v37 = vld [vmem:[%s10515_s5 + $0x270] sm:$0xff] }
 0x20d   :  { %2340 = vmatpush1.bf16.msra.mxu1 %v6472_v45  ;;  %2422 = vmatpush1.bf16.msra.mxu0 %v6474_v46  ;;  %v6271_v45 = vcombine.high %v715_v38, %v719_v39  ;;  %v722_v46 = vld [vmem:[%s10515_s5 + $0xd0] sm:$0xff]  ;;  %v771_v38 = vld [vmem:[%s10515_s5 + $0x258] sm:$0xff] }
 0x20e   :  { %2341 = vmatprep.subr.bf16.mxu1 %v6481_v47  ;;  %2423 = vmatprep.subr.bf16.mxu0 %v6483_v48  ;;  %v726_v47 = vld [vmem:[%s10515_s5 + $0xf0] sm:$0xff]  ;;  %v723_v48 = vld [vmem:[%s10515_s5 + $0xd8] sm:$0xff] }
 0x20f   :  { %v6277_v53 = vcombine.high %v722_v46, %v726_v47  ;;  %v6276_v60 = vcombine.low %v722_v46, %v726_v47  ;;  %v775_v39 = vld [vmem:[%s10515_s5 + $0x278] sm:$0xff]  ;;  %v778_v46 = vld [vmem:[%s10515_s5 + $0x290] sm:$0xff] }
 0x210   :  { %v782_v47 = vld [vmem:[%s10515_s5 + $0x2b0] sm:$0xff] }
 0x211   :  { %2342 = vmatpush1.bf16.msra.mxu1 %v6480_v56  ;;  %2424 = vmatpush1.bf16.msra.mxu0 %v6482_v57  ;;  %v730_v56 = vld [vmem:[%s10515_s5 + $0x110] sm:$0xff] }
 0x212   :  { %v673_v6 = vpop.f32.mrb[8].mxu0  ;;  %2343 = vmatprep.subr.bf16.mxu1 %v6489_v58  ;;  %2425 = vmatprep.subr.bf16.mxu0 %v6491_v59  ;;  %v734_v57 = vld [vmem:[%s10515_s5 + $0x130] sm:$0xff]  ;;  %v731_v58 = vld [vmem:[%s10515_s5 + $0x118] sm:$0xff] }
 0x213   :  { %v674_v10 = vadd.f32 %v673_v6, %v269_v61  ;;  %v675_v14 = vpop.f32.mrb[9].mxu0  ;;  %v735_v59 = vld [vmem:[%s10515_s5 + $0x138] sm:$0xff]  ;;  %v6285_v62 = vcombine.high %v730_v56, %v734_v57  ;;  %v6284_v6 = vcombine.low %v730_v56, %v734_v57  ;;  %v786_v56 = vld [vmem:[%s10515_s5 + $0x2d0] sm:$0xff] }
 0x214   :  { %v676_v20 = vadd.f32 %v675_v14, %v273_v1  ;;  %v677_v21 = vpop.f32.mrb[10].mxu0  ;;  %v6287_v63 = vcombine.high %v731_v58, %v735_v59  ;;  %v742_v1 = vld [vmem:[%s10515_s5 + $0x170] sm:$0xff] }
 0x215   :  { %vm682_vm4 = vcmp.gt.f32.partialorder %v674_v10, 0.0  ;;  %v686_v22 = vmul.f32 0.2, %v674_v10  ;;  %v678_v23 = vpop.f32.mrb[11].mxu0  ;;  %2344 = vmatpush1.bf16.msra.mxu1 %v6488_v2  ;;  %2426 = vmatpush1.bf16.msra.mxu0 %v6490_v3  ;;  %v739_v2 = vld [vmem:[%s10515_s5 + $0x158] sm:$0xff]  ;;  %v750_v14 = vld [vmem:[%s10515_s5 + $0x1b0] sm:$0xff]  ;;  %v6292_v16 = vcombine.low %v738_v0, %v742_v1 }
 0x216   :  { %vm683_vm5 = vcmp.gt.f32.partialorder %v676_v20, 0.0  ;;  %v687_v13 = vmul.f32 0.2, %v676_v20  ;;  %2345 = vmatprep.subr.bf16.mxu1 %v6497_v7  ;;  %2427 = vmatprep.subr.bf16.mxu0 %v6499_v8  ;;  %v743_v3 = vld [vmem:[%s10515_s5 + $0x178] sm:$0xff]  ;;  %v6286_v7 = vcombine.low %v731_v58, %v735_v59  ;;  %v6293_v8 = vcombine.high %v738_v0, %v742_v1  ;;  %v754_v23 = vld [vmem:[%s10515_s5 + $0x1d0] sm:$0xff] }
 0x217   :  { %v690_v19 = vsel %vm682_vm4, %v674_v10, %v686_v22  ;;  %v6295_v9 = vcombine.high %v739_v2, %v743_v3  ;;  %v746_v10 = vld [vmem:[%s10515_s5 + $0x190] sm:$0xff]  ;;  %v6303_v22 = vcombine.high %v747_v15, %v751_v51  ;;  %v787_v58 = vld [vmem:[%s10515_s5 + $0x2d8] sm:$0xff] }
 0x218   :  { %v691_v25 = vsel %vm683_vm5, %v676_v20, %v687_v13  ;;  %v8677_v31 = vpack.c.bf16 %v690_v19, %v690_v19  ;;  %v6294_v20 = vcombine.low %v739_v2, %v743_v3  ;;  %v6301_v21 = vcombine.high %v746_v10, %v750_v14  ;;  %v759_v13 = vld [vmem:[%s10515_s5 + $0x1f8] sm:$0xff]  ;;  %v790_v57 = vld [vmem:[%s10515_s5 + $0x2f0] sm:$0xff] }
 0x219   :  { %v8675_v29 = vpack.c.bf16 %v691_v25, %v691_v25  ;;  %2346 = vmatpush1.bf16.msra.mxu1 %v6496_v11  ;;  %2428 = vmatpush1.bf16.msra.mxu0 %v6498_v12  ;;  %v758_v11 = vld [vmem:[%s10515_s5 + $0x1f0] sm:$0xff]  ;;  %v755_v12 = vld [vmem:[%s10515_s5 + $0x1d8] sm:$0xff] }
 0x21a   :  { %2438 = vmatprep.subr.bf16.mxu1 %v6253_v17  ;;  %2520 = vmatprep.subr.bf16.mxu0 %v6255_v18  ;;  %v6300_v17 = vcombine.low %v746_v10, %v750_v14  ;;  %v6302_v18 = vcombine.low %v747_v15, %v751_v51  ;;  %v6309_v19 = vcombine.high %v754_v23, %v758_v11  ;;  %v762_v25 = vld [vmem:[%s10515_s5 + $0x210] sm:$0xff]  ;;  %v791_v59 = vld [vmem:[%s10515_s5 + $0x2f8] sm:$0xff] }
 0x21b   :  { %2347 = vmatprep.mubr.bf16.mxu1 %v8675_v29  ;;  %2429 = vmatprep.mubr.bf16.mxu0 %v8675_v29  ;;  %v6311_v24 = vcombine.high %v755_v12, %v759_v13  ;;  %v794_v0 = vld [vmem:[%s10515_s5 + $0x310] sm:$0xff]  ;;  %v795_v2 = vld [vmem:[%s10515_s5 + $0x318] sm:$0xff] }
 0x21c   :  { %2348 = vmatmul.mubr.bf16.vlgmr.msra.gmra.mrb[0].mxu1 %v8677_v31  ;;  %2430 = vmatmul.mubr.bf16.vlgmr.msra.gmra.mrb[12].mxu0 %v8677_v31  ;;  %v798_v1 = vld [vmem:[%s10515_s5 + $0x330] sm:$0xff]  ;;  %v799_v3 = vld [vmem:[%s10515_s5 + $0x338] sm:$0xff] }
 0x21d   :  { %2439 = vmatpush1.bf16.msra.mxu1 %v6252_v30  ;;  %2470 = vmatprep.mubr.bf16.mxu1 %v8459_v4  ;;  %v6308_v30 = vcombine.low %v754_v23, %v758_v11  ;;  %v802_v10 = vld [vmem:[%s10515_s5 + $0x350] sm:$0xff]  ;;  %v803_v15 = vld [vmem:[%s10515_s5 + $0x358] sm:$0xff] }
 0x21e   :  { %2521 = vmatpush1.bf16.msra.mxu0 %v6254_v32  ;;  %2552 = vmatprep.mubr.bf16.mxu0 %v8459_v4  ;;  %v727_v4 = vld [vmem:[%s10515_s5 + $0xf8] sm:$0xff]  ;;  %v6310_v32 = vcombine.low %v755_v12, %v759_v13  ;;  %v806_v14 = vld [vmem:[%s10515_s5 + $0x370] sm:$0xff] }
 0x21f   :  { %2440 = vmatprep.subr.bf16.mxu1 %v6261_v33  ;;  %2522 = vmatprep.subr.bf16.mxu0 %v6263_v34  ;;  %v6279_v54 = vcombine.high %v723_v48, %v727_v4  ;;  %v6278_v61 = vcombine.low %v723_v48, %v727_v4  ;;  %v6317_v33 = vcombine.high %v762_v25, %v766_v26  ;;  %v779_v48 = vld [vmem:[%s10515_s5 + $0x298] sm:$0xff]  ;;  %v810_v23 = vld [vmem:[%s10515_s5 + $0x390] sm:$0xff] }
 0x220   :  { %v6319_v34 = vcombine.high %v763_v27, %v767_v28  ;;  %v783_v4 = vld [vmem:[%s10515_s5 + $0x2b8] sm:$0xff]  ;;  %v814_v11 = vld [vmem:[%s10515_s5 + $0x3b0] sm:$0xff] }
 0x221   :  { %2441 = vmatpush1.bf16.msra.mxu1 %v6260_v40  ;;  %v6316_v40 = vcombine.low %v762_v25, %v766_v26  ;;  %v807_v51 = vld [vmem:[%s10515_s5 + $0x378] sm:$0xff]  ;;  %v818_v25 = vld [vmem:[%s10515_s5 + $0x3d0] sm:$0xff] }
 0x222   :  { %2523 = vmatpush1.bf16.msra.mxu0 %v6262_v43  ;;  %2442 = vmatprep.subr.bf16.mxu1 %v6269_v44  ;;  %v6318_v43 = vcombine.low %v763_v27, %v767_v28  ;;  %v6325_v44 = vcombine.high %v770_v36, %v774_v37  ;;  %v811_v12 = vld [vmem:[%s10515_s5 + $0x398] sm:$0xff]  ;;  %v822_v26 = vld [vmem:[%s10515_s5 + $0x3f0] sm:$0xff] }
 0x223   :  { %2524 = vmatprep.subr.bf16.mxu0 %v6271_v45  ;;  %v6327_v45 = vcombine.high %v771_v38, %v775_v39  ;;  %v815_v13 = vld [vmem:[%s10515_s5 + $0x3b8] sm:$0xff] }
 0x224   :  { %v819_v27 = vld [vmem:[%s10515_s5 + $0x3d8] sm:$0xff] }
 0x225   :  { %2443 = vmatpush1.bf16.msra.mxu1 %v6268_v49  ;;  %v6324_v49 = vcombine.low %v770_v36, %v774_v37  ;;  %v823_v28 = vld [vmem:[%s10515_s5 + $0x3f8] sm:$0xff]  ;;  %v826_v36 = vld [vmem:[%s10515_s5 + $0x410] sm:$0xff] }
 0x226   :  { %2525 = vmatpush1.bf16.msra.mxu0 %v6270_v52  ;;  %2444 = vmatprep.subr.bf16.mxu1 %v6277_v53  ;;  %v6326_v52 = vcombine.low %v771_v38, %v775_v39  ;;  %v6333_v53 = vcombine.high %v778_v46, %v782_v47  ;;  %v830_v37 = vld [vmem:[%s10515_s5 + $0x430] sm:$0xff]  ;;  %v827_v38 = vld [vmem:[%s10515_s5 + $0x418] sm:$0xff] }
 0x227   :  { %2526 = vmatprep.subr.bf16.mxu0 %v6279_v54  ;;  %v6335_v54 = vcombine.high %v779_v48, %v783_v4  ;;  %v831_v39 = vld [vmem:[%s10515_s5 + $0x438] sm:$0xff] }
 0x229   :  { %2445 = vmatpush1.bf16.msra.mxu1 %v6276_v60  ;;  %v6332_v60 = vcombine.low %v778_v46, %v782_v47  ;;  %v834_v46 = vld [vmem:[%s10515_s5 + $0x450] sm:$0xff] }
 0x22a   :  { %2527 = vmatpush1.bf16.msra.mxu0 %v6278_v61  ;;  %2446 = vmatprep.subr.bf16.mxu1 %v6285_v62  ;;  %v6334_v61 = vcombine.low %v779_v48, %v783_v4  ;;  %v6341_v62 = vcombine.high %v786_v56, %v790_v57  ;;  %v838_v47 = vld [vmem:[%s10515_s5 + $0x470] sm:$0xff]  ;;  %v6380_v48 = vcombine.low %v826_v36, %v830_v37  ;;  %v835_v4 = vld [vmem:[%s10515_s5 + $0x458] sm:$0xff] }
 0x22b   :  { %2528 = vmatprep.subr.bf16.mxu0 %v6287_v63  ;;  %v6343_v63 = vcombine.high %v787_v58, %v791_v59 }
 0x22d   :  { %2447 = vmatpush1.bf16.msra.mxu1 %v6284_v6  ;;  %v6340_v6 = vcombine.low %v786_v56, %v790_v57  ;;  %v846_v56 = vld [vmem:[%s10515_s5 + $0x4b0] sm:$0xff] }
 0x22e   :  { %2529 = vmatpush1.bf16.msra.mxu0 %v6286_v7  ;;  %2448 = vmatprep.subr.bf16.mxu1 %v6293_v8  ;;  %v6342_v7 = vcombine.low %v787_v58, %v791_v59  ;;  %v6349_v8 = vcombine.high %v794_v0, %v798_v1  ;;  %v843_v58 = vld [vmem:[%s10515_s5 + $0x498] sm:$0xff] }
 0x22f   :  { %2530 = vmatprep.subr.bf16.mxu0 %v6295_v9  ;;  %v6351_v9 = vcombine.high %v795_v2, %v799_v3  ;;  %v847_v59 = vld [vmem:[%s10515_s5 + $0x4b8] sm:$0xff] }
 0x231   :  { %2449 = vmatpush1.bf16.msra.mxu1 %v6292_v16  ;;  %v6348_v16 = vcombine.low %v794_v0, %v798_v1  ;;  %v850_v0 = vld [vmem:[%s10515_s5 + $0x4d0] sm:$0xff] }
 0x232   :  { %2531 = vmatpush1.bf16.msra.mxu0 %v6294_v20  ;;  %2450 = vmatprep.subr.bf16.mxu1 %v6301_v21  ;;  %v6350_v20 = vcombine.low %v795_v2, %v799_v3  ;;  %v6357_v21 = vcombine.high %v802_v10, %v806_v14  ;;  %v854_v1 = vld [vmem:[%s10515_s5 + $0x4f0] sm:$0xff]  ;;  %v855_v2 = vld [vmem:[%s10515_s5 + $0x4f8] sm:$0xff]  ;;  %v6398_v3 = vcombine.low %v843_v58, %v847_v59 }
 0x233   :  { %2532 = vmatprep.subr.bf16.mxu0 %v6303_v22  ;;  %v6359_v22 = vcombine.high %v803_v15, %v807_v51 }
 0x235   :  { %2451 = vmatpush1.bf16.msra.mxu1 %v6300_v17  ;;  %v6356_v17 = vcombine.low %v802_v10, %v806_v14  ;;  %v859_v10 = vld [vmem:[%s10515_s5 + $0x518] sm:$0xff] }
 0x236   :  { %2533 = vmatpush1.bf16.msra.mxu0 %v6302_v18  ;;  %2452 = vmatprep.subr.bf16.mxu1 %v6309_v19  ;;  %v6358_v18 = vcombine.low %v803_v15, %v807_v51  ;;  %v6365_v19 = vcombine.high %v810_v23, %v814_v11  ;;  %v863_v14 = vld [vmem:[%s10515_s5 + $0x538] sm:$0xff]  ;;  %v6404_v15 = vcombine.low %v850_v0, %v854_v1 }
 0x237   :  { %2534 = vmatprep.subr.bf16.mxu0 %v6311_v24  ;;  %v6367_v24 = vcombine.high %v811_v12, %v815_v13 }
 0x239   :  { %2453 = vmatpush1.bf16.msra.mxu1 %v6308_v30  ;;  %v6364_v30 = vcombine.low %v810_v23, %v814_v11  ;;  %v867_v23 = vld [vmem:[%s10515_s5 + $0x558] sm:$0xff] }
 0x23a   :  { %2535 = vmatpush1.bf16.msra.mxu0 %v6310_v32  ;;  %2454 = vmatprep.subr.bf16.mxu1 %v6317_v33  ;;  %v6366_v32 = vcombine.low %v811_v12, %v815_v13  ;;  %v6373_v33 = vcombine.high %v818_v25, %v822_v26  ;;  %v871_v11 = vld [vmem:[%s10515_s5 + $0x578] sm:$0xff]  ;;  %v6414_v13 = vcombine.low %v859_v10, %v863_v14 }
 0x23b   :  { %2536 = vmatprep.subr.bf16.mxu0 %v6319_v34  ;;  %v6375_v34 = vcombine.high %v819_v27, %v823_v28 }
 0x23d   :  { %2455 = vmatpush1.bf16.msra.mxu1 %v6316_v40  ;;  %v6372_v40 = vcombine.low %v818_v25, %v822_v26  ;;  %v875_v25 = vld [vmem:[%s10515_s5 + $0x598] sm:$0xff] }
 0x23e   :  { %2537 = vmatpush1.bf16.msra.mxu0 %v6318_v43  ;;  %2456 = vmatprep.subr.bf16.mxu1 %v6325_v44  ;;  %v6374_v43 = vcombine.low %v819_v27, %v823_v28  ;;  %v6381_v44 = vcombine.high %v826_v36, %v830_v37  ;;  %v879_v26 = vld [vmem:[%s10515_s5 + $0x5b8] sm:$0xff]  ;;  %v6422_v28 = vcombine.low %v867_v23, %v871_v11 }
 0x23f   :  { %2538 = vmatprep.subr.bf16.mxu0 %v6327_v45  ;;  %v6383_v45 = vcombine.high %v827_v38, %v831_v39  ;;  %v883_v36 = vld [vmem:[%s10515_s5 + $0x5d8] sm:$0xff] }
 0x240   :  { %v887_v37 = vld [vmem:[%s10515_s5 + $0x5f8] sm:$0xff] }
 0x241   :  { %2457 = vmatpush1.bf16.msra.mxu1 %v6324_v49  ;;  %v839_v49 = vld [vmem:[%s10515_s5 + $0x478] sm:$0xff] }
 0x242   :  { %2539 = vmatpush1.bf16.msra.mxu0 %v6326_v52  ;;  %2458 = vmatprep.subr.bf16.mxu1 %v6333_v53  ;;  %v6382_v52 = vcombine.low %v827_v38, %v831_v39  ;;  %v6389_v53 = vcombine.high %v834_v46, %v838_v47  ;;  %v6391_v57 = vcombine.high %v835_v4, %v839_v49 }
 0x243   :  { %2540 = vmatprep.subr.bf16.mxu0 %v6335_v54  ;;  %v842_v54 = vld [vmem:[%s10515_s5 + $0x490] sm:$0xff]  ;;  %v6430_v39 = vcombine.low %v875_v25, %v879_v26 }
 0x245   :  { %2459 = vmatpush1.bf16.msra.mxu1 %v6332_v60  ;;  %v6388_v60 = vcombine.low %v834_v46, %v838_v47  ;;  %v891_v46 = vld [vmem:[%s10515_s5 + $0x618] sm:$0xff] }
 0x246   :  { %2541 = vmatpush1.bf16.msra.mxu0 %v6334_v61  ;;  %2460 = vmatprep.subr.bf16.mxu1 %v6341_v62  ;;  %v6390_v61 = vcombine.low %v835_v4, %v839_v49  ;;  %v6397_v62 = vcombine.high %v842_v54, %v846_v56  ;;  %v895_v47 = vld [vmem:[%s10515_s5 + $0x638] sm:$0xff]  ;;  %v6438_v4 = vcombine.low %v883_v36, %v887_v37 }
 0x247   :  { %2542 = vmatprep.subr.bf16.mxu0 %v6343_v63  ;;  %v6399_v63 = vcombine.high %v843_v58, %v847_v59  ;;  %v6446_v59 = vcombine.low %v891_v46, %v895_v47 }
 0x249   :  { %2461 = vmatpush1.bf16.msra.mxu1 %v6340_v6  ;;  %v6405_v6 = vcombine.high %v850_v0, %v854_v1  ;;  %v907_v0 = vld [vmem:[%s10515_s5 + $0x698] sm:$0xff] }
 0x24a   :  { %2543 = vmatpush1.bf16.msra.mxu0 %v6342_v7  ;;  %2462 = vmatprep.subr.bf16.mxu1 %v6349_v8  ;;  %v858_v8 = vld [vmem:[%s10515_s5 + $0x510] sm:$0xff]  ;;  %v911_v1 = vld [vmem:[%s10515_s5 + $0x6b8] sm:$0xff] }
 0x24b   :  { %2544 = vmatprep.subr.bf16.mxu0 %v6351_v9  ;;  %v862_v9 = vld [vmem:[%s10515_s5 + $0x530] sm:$0xff] }
 0x24c   :  { %v6412_v12 = vcombine.low %v858_v8, %v862_v9 }
 0x24d   :  { %2463 = vmatpush1.bf16.msra.mxu1 %v6348_v16  ;;  %v6413_v16 = vcombine.high %v858_v8, %v862_v9  ;;  %v915_v8 = vld [vmem:[%s10515_s5 + $0x6d8] sm:$0xff] }
 0x24e   :  { %2545 = vmatpush1.bf16.msra.mxu0 %v6350_v20  ;;  %2464 = vmatprep.subr.bf16.mxu1 %v6357_v21  ;;  %v6415_v20 = vcombine.high %v859_v10, %v863_v14  ;;  %v866_v21 = vld [vmem:[%s10515_s5 + $0x550] sm:$0xff]  ;;  %v919_v9 = vld [vmem:[%s10515_s5 + $0x6f8] sm:$0xff]  ;;  %v6462_v14 = vcombine.low %v907_v0, %v911_v1 }
 0x24f   :  { %2546 = vmatprep.subr.bf16.mxu0 %v6359_v22  ;;  %v870_v22 = vld [vmem:[%s10515_s5 + $0x570] sm:$0xff] }
 0x250   :  { %v6420_v27 = vcombine.low %v866_v21, %v870_v22 }
 0x251   :  { %2465 = vmatpush1.bf16.msra.mxu1 %v6356_v17  ;;  %v6421_v17 = vcombine.high %v866_v21, %v870_v22  ;;  %v923_v21 = vld [vmem:[%s10515_s5 + $0x718] sm:$0xff] }
 0x252   :  { %2547 = vmatpush1.bf16.msra.mxu0 %v6358_v18  ;;  %2466 = vmatprep.subr.bf16.mxu1 %v6365_v19  ;;  %v6423_v18 = vcombine.high %v867_v23, %v871_v11  ;;  %v874_v19 = vld [vmem:[%s10515_s5 + $0x590] sm:$0xff]  ;;  %v927_v22 = vld [vmem:[%s10515_s5 + $0x738] sm:$0xff]  ;;  %v6470_v11 = vcombine.low %v915_v8, %v919_v9 }
 0x253   :  { %2548 = vmatprep.subr.bf16.mxu0 %v6367_v24  ;;  %v878_v24 = vld [vmem:[%s10515_s5 + $0x5b0] sm:$0xff] }
 0x254   :  { %v6428_v38 = vcombine.low %v874_v19, %v878_v24 }
 0x255   :  { %2467 = vmatpush1.bf16.msra.mxu1 %v6364_v30  ;;  %v6429_v30 = vcombine.high %v874_v19, %v878_v24  ;;  %v931_v19 = vld [vmem:[%s10515_s5 + $0x758] sm:$0xff] }
 0x256   :  { %2549 = vmatpush1.bf16.msra.mxu0 %v6366_v32  ;;  %2468 = vmatprep.subr.bf16.mxu1 %v6373_v33  ;;  %v6431_v32 = vcombine.high %v875_v25, %v879_v26  ;;  %v882_v33 = vld [vmem:[%s10515_s5 + $0x5d0] sm:$0xff]  ;;  %v935_v24 = vld [vmem:[%s10515_s5 + $0x778] sm:$0xff]  ;;  %v6478_v26 = vcombine.low %v923_v21, %v927_v22 }
 0x257   :  { %2550 = vmatprep.subr.bf16.mxu0 %v6375_v34  ;;  %v886_v34 = vld [vmem:[%s10515_s5 + $0x5f0] sm:$0xff] }
 0x259   :  { %2469 = vmatpush1.bf16.msra.mxu1 %v6372_v40  ;;  %v6437_v40 = vcombine.high %v882_v33, %v886_v34 }
 0x25a   :  { %2551 = vmatpush1.bf16.msra.mxu0 %v6374_v43  ;;  %2479 = vmatprep.subr.bf16.mxu1 %v6381_v44  ;;  %v6439_v43 = vcombine.high %v883_v36, %v887_v37  ;;  %v890_v44 = vld [vmem:[%s10515_s5 + $0x610] sm:$0xff]  ;;  %v6486_v37 = vcombine.low %v931_v19, %v935_v24 }
 0x25b   :  { %2561 = vmatprep.subr.bf16.mxu0 %v6383_v45  ;;  %v894_v45 = vld [vmem:[%s10515_s5 + $0x630] sm:$0xff] }
 0x25c   :  { %2471 = vmatmul.mubr.bf16.vlgmr.msra.gmra.mrb[4].mxu1 %v8461_v5  ;;  %v6445_v49 = vcombine.high %v890_v44, %v894_v45  ;;  %v6444_v58 = vcombine.low %v890_v44, %v894_v45  ;;  %v947_v44 = vld [vmem:[%s10515_s5 + $0x7d8] sm:$0xff] }
 0x25d   :  { %2553 = vmatmul.mubr.bf16.vlgmr.msra.gmra.mrb[16].mxu0 %v8461_v5  ;;  %2480 = vmatpush1.bf16.msra.mxu1 %v6380_v48  ;;  %v851_v5 = vld [vmem:[%s10515_s5 + $0x4d8] sm:$0xff]  ;;  %v6436_v48 = vcombine.low %v882_v33, %v886_v34 }
 0x25e   :  { %2511 = vmatprep.mubr.bf16.mxu1 %v8675_v29  ;;  %2562 = vmatpush1.bf16.msra.mxu0 %v6382_v52  ;;  %v6407_v7 = vcombine.high %v851_v5, %v855_v2  ;;  %v6406_v51 = vcombine.low %v851_v5, %v855_v2  ;;  %v6447_v52 = vcombine.high %v891_v46, %v895_v47  ;;  %v939_v33 = vld [vmem:[%s10515_s5 + $0x798] sm:$0xff] }
 0x25f   :  { %2593 = vmatprep.mubr.bf16.mxu0 %v8675_v29  ;;  %2481 = vmatprep.subr.bf16.mxu1 %v6389_v53  ;;  %v6396_v29 = vcombine.low %v842_v54, %v846_v56  ;;  %v898_v53 = vld [vmem:[%s10515_s5 + $0x650] sm:$0xff]  ;;  %v899_v56 = vld [vmem:[%s10515_s5 + $0x658] sm:$0xff] }
 0x260   :  { %2563 = vmatprep.subr.bf16.mxu0 %v6391_v57  ;;  %v902_v54 = vld [vmem:[%s10515_s5 + $0x670] sm:$0xff]  ;;  %v903_v57 = vld [vmem:[%s10515_s5 + $0x678] sm:$0xff] }
 0x261   :  { %2482 = vmatpush1.bf16.msra.mxu1 %v6388_v60  ;;  %v6453_v60 = vcombine.high %v898_v53, %v902_v54  ;;  %v6452_v5 = vcombine.low %v898_v53, %v902_v54  ;;  %v6454_v2 = vcombine.low %v899_v56, %v903_v57  ;;  %v943_v34 = vld [vmem:[%s10515_s5 + $0x7b8] sm:$0xff]  ;;  %v7230_v53 = vld [vmem:[%s10517_s7 + $0x4] ss:$28 sps:$4 sm:$0xff]   ;;  %v7233_v54 = vld [vmem:[%s10517_s7 + $0xc] ss:$28 sps:$4 sm:$0xff]  }
 0x262   :  { %2564 = vmatpush1.bf16.msra.mxu0 %v6390_v61  ;;  %2483 = vmatprep.subr.bf16.mxu1 %v6397_v62  ;;  %v6455_v61 = vcombine.high %v899_v56, %v903_v57  ;;  %v906_v62 = vld [vmem:[%s10515_s5 + $0x690] sm:$0xff]  ;;  %v951_v45 = vld [vmem:[%s10515_s5 + $0x7f8] sm:$0xff]  ;;  %v6494_v47 = vcombine.low %v939_v33, %v943_v34  ;;  %v7231_v57 = vld [vmem:[%s10517_s7 + $0x8] ss:$28 sps:$4 sm:$0xff]  }
 0x263   :  { %2565 = vmatprep.subr.bf16.mxu0 %v6399_v63  ;;  %v910_v63 = vld [vmem:[%s10515_s5 + $0x6b0] sm:$0xff]  ;;  %v7228_v56 = vld [vmem:[%s10517_s7] ss:$28 sps:$4 sm:$0xff]  }
 0x264   :  { %v6460_v10 = vcombine.low %v906_v62, %v910_v63 }
 0x265   :  { %2484 = vmatpush1.bf16.msra.mxu1 %v6396_v29  ;;  %v6461_v29 = vcombine.high %v906_v62, %v910_v63  ;;  %v7242_v62 = vld [vmem:[%s10517_s7 + $0x74] ss:$28 sps:$4 sm:$0xff]  }
 0x266   :  { %2566 = vmatpush1.bf16.msra.mxu0 %v6398_v3  ;;  %2485 = vmatprep.subr.bf16.mxu1 %v6405_v6  ;;  %v6463_v3 = vcombine.high %v907_v0, %v911_v1  ;;  %v914_v6 = vld [vmem:[%s10515_s5 + $0x6d0] sm:$0xff]  ;;  %v7248_v1 = vld [vmem:[%s10517_s7 + $0xac] ss:$28 sps:$4 sm:$0xff]  }
 0x267   :  { %2567 = vmatprep.subr.bf16.mxu0 %v6407_v7  ;;  %v918_v7 = vld [vmem:[%s10515_s5 + $0x6f0] sm:$0xff] }
 0x268   :  { %v6468_v23 = vcombine.low %v914_v6, %v918_v7  ;;  %v7240_v63 = vld [vmem:[%s10517_s7 + $0x70] ss:$28 sps:$4 sm:$0xff]   ;;  %v7243_v0 = vld [vmem:[%s10517_s7 + $0x78] ss:$28 sps:$4 sm:$0xff]  }
 0x269   :  { %2486 = vmatpush1.bf16.msra.mxu1 %v6404_v15  ;;  %v6469_v15 = vcombine.high %v914_v6, %v918_v7  ;;  %v7257_v6 = vld [vmem:[%s10517_s7 + $0xec] ss:$28 sps:$4 sm:$0xff]   ;;  %v7252_v7 = vld [vmem:[%s10517_s7 + $0xe0] ss:$28 sps:$4 sm:$0xff]  }
 0x26a   :  { %2568 = vmatpush1.bf16.msra.mxu0 %v6406_v51  ;;  %2487 = vmatprep.subr.bf16.mxu1 %v6413_v16  ;;  %v6471_v51 = vcombine.high %v915_v8, %v919_v9  ;;  %v922_v16 = vld [vmem:[%s10515_s5 + $0x710] sm:$0xff]  ;;  %v7255_v8 = vld [vmem:[%s10517_s7 + $0xe8] ss:$28 sps:$4 sm:$0xff]   ;;  %v7260_v9 = vld [vmem:[%s10517_s7 + $0x11c] ss:$28 sps:$4 sm:$0xff]  }
 0x26b   :  { %2569 = vmatprep.subr.bf16.mxu0 %v6415_v20  ;;  %v926_v20 = vld [vmem:[%s10515_s5 + $0x730] sm:$0xff] }
 0x26c   :  { %v6476_v25 = vcombine.low %v922_v16, %v926_v20 }
 0x26d   :  { %2488 = vmatpush1.bf16.msra.mxu1 %v6412_v12  ;;  %v6477_v12 = vcombine.high %v922_v16, %v926_v20  ;;  %v7269_v16 = vld [vmem:[%s10517_s7 + $0x15c] ss:$28 sps:$4 sm:$0xff]   ;;  %v7264_v20 = vld [vmem:[%s10517_s7 + $0x150] ss:$28 sps:$4 sm:$0xff]  }
 0x26e   :  { %2570 = vmatpush1.bf16.msra.mxu0 %v6414_v13  ;;  %2489 = vmatprep.subr.bf16.mxu1 %v6421_v17  ;;  %v6479_v13 = vcombine.high %v923_v21, %v927_v22  ;;  %v930_v17 = vld [vmem:[%s10515_s5 + $0x750] sm:$0xff]  ;;  %v7272_v22 = vld [vmem:[%s10517_s7 + $0x18c] ss:$28 sps:$4 sm:$0xff]  }
 0x26f   :  { %2571 = vmatprep.subr.bf16.mxu0 %v6423_v18  ;;  %v934_v18 = vld [vmem:[%s10515_s5 + $0x770] sm:$0xff] }
 0x270   :  { %v6484_v36 = vcombine.low %v930_v17, %v934_v18  ;;  %v7267_v21 = vld [vmem:[%s10517_s7 + $0x158] ss:$28 sps:$4 sm:$0xff]  }
 0x271   :  { %2490 = vmatpush1.bf16.msra.mxu1 %v6420_v27  ;;  %v6485_v27 = vcombine.high %v930_v17, %v934_v18  ;;  %v7281_v17 = vld [vmem:[%s10517_s7 + $0x1cc] ss:$28 sps:$4 sm:$0xff]   ;;  %v7276_v18 = vld [vmem:[%s10517_s7 + $0x1c0] ss:$28 sps:$4 sm:$0xff]  }
 0x272   :  { %2572 = vmatpush1.bf16.msra.mxu0 %v6422_v28  ;;  %2491 = vmatprep.subr.bf16.mxu1 %v6429_v30  ;;  %v6487_v28 = vcombine.high %v931_v19, %v935_v24  ;;  %v938_v30 = vld [vmem:[%s10515_s5 + $0x790] sm:$0xff]  ;;  %v7279_v19 = vld [vmem:[%s10517_s7 + $0x1c8] ss:$28 sps:$4 sm:$0xff]   ;;  %v7284_v24 = vld [vmem:[%s10517_s7 + $0x1fc] ss:$28 sps:$4 sm:$0xff]  }
 0x273   :  { %2573 = vmatprep.subr.bf16.mxu0 %v6431_v32  ;;  %v942_v32 = vld [vmem:[%s10515_s5 + $0x7b0] sm:$0xff] }
 0x274   :  { %v6492_v46 = vcombine.low %v938_v30, %v942_v32 }
 0x275   :  { %2492 = vmatpush1.bf16.msra.mxu1 %v6428_v38  ;;  %v6493_v38 = vcombine.high %v938_v30, %v942_v32  ;;  %v7293_v30 = vld [vmem:[%s10517_s7 + $0x23c] ss:$28 sps:$4 sm:$0xff]   ;;  %v7288_v32 = vld [vmem:[%s10517_s7 + $0x230] ss:$28 sps:$4 sm:$0xff]  }
 0x276   :  { %2574 = vmatpush1.bf16.msra.mxu0 %v6430_v39  ;;  %2493 = vmatprep.subr.bf16.mxu1 %v6437_v40  ;;  %v6495_v39 = vcombine.high %v939_v33, %v943_v34  ;;  %v946_v40 = vld [vmem:[%s10515_s5 + $0x7d0] sm:$0xff]  ;;  %v7296_v34 = vld [vmem:[%s10517_s7 + $0x26c] ss:$28 sps:$4 sm:$0xff]  }
 0x277   :  { %2575 = vmatprep.subr.bf16.mxu0 %v6439_v43  ;;  %v950_v43 = vld [vmem:[%s10515_s5 + $0x7f0] sm:$0xff] }
 0x278   :  { %v7291_v33 = vld [vmem:[%s10517_s7 + $0x238] ss:$28 sps:$4 sm:$0xff]  }
 0x279   :  { %2494 = vmatpush1.bf16.msra.mxu1 %v6436_v48  ;;  %v6501_v48 = vcombine.high %v946_v40, %v950_v43 }
 0x27a   :  { %2576 = vmatpush1.bf16.msra.mxu0 %v6438_v4  ;;  %2495 = vmatprep.subr.bf16.mxu1 %v6445_v49  ;;  %v6503_v4 = vcombine.high %v947_v44, %v951_v45  ;;  %v6500_v49 = vcombine.low %v946_v40, %v950_v43  ;;  %v7305_v40 = vld [vmem:[%s10517_s7 + $0x2ac] ss:$28 sps:$4 sm:$0xff]   ;;  %v7300_v43 = vld [vmem:[%s10517_s7 + $0x2a0] ss:$28 sps:$4 sm:$0xff]  }
 0x27b   :  { %2577 = vmatprep.subr.bf16.mxu0 %v6447_v52  ;;  %v6502_v52 = vcombine.low %v947_v44, %v951_v45  ;;  %v7303_v44 = vld [vmem:[%s10517_s7 + $0x2a8] ss:$28 sps:$4 sm:$0xff]   ;;  %v7308_v45 = vld [vmem:[%s10517_s7 + $0x2dc] ss:$28 sps:$4 sm:$0xff]  }
 0x27d   :  { %2496 = vmatpush1.bf16.msra.mxu1 %v6444_v58  ;;  %v7236_v58 = vld [vmem:[%s10517_s7 + $0x3c] ss:$28 sps:$4 sm:$0xff]  }
 0x27e   :  { %2578 = vmatpush1.bf16.msra.mxu0 %v6446_v59  ;;  %2497 = vmatprep.subr.bf16.mxu1 %v6453_v60  ;;  %v7239_v59 = vld [vmem:[%s10517_s7 + $0x44] ss:$28 sps:$4 sm:$0xff]   ;;  %v7234_v60 = vld [vmem:[%s10517_s7 + $0x38] ss:$28 sps:$4 sm:$0xff]  }
 0x27f   :  { %2579 = vmatprep.subr.bf16.mxu0 %v6455_v61  ;;  %v7237_v61 = vld [vmem:[%s10517_s7 + $0x40] ss:$28 sps:$4 sm:$0xff]  }
 0x281   :  { %2498 = vmatpush1.bf16.msra.mxu1 %v6452_v5  ;;  %v7251_v5 = vld [vmem:[%s10517_s7 + $0xb4] ss:$28 sps:$4 sm:$0xff]  }
 0x282   :  { %2580 = vmatpush1.bf16.msra.mxu0 %v6454_v2  ;;  %2499 = vmatprep.subr.bf16.mxu1 %v6461_v29  ;;  %v7246_v2 = vld [vmem:[%s10517_s7 + $0xa8] ss:$28 sps:$4 sm:$0xff]   ;;  %v7249_v29 = vld [vmem:[%s10517_s7 + $0xb0] ss:$28 sps:$4 sm:$0xff]  }
 0x283   :  { %2581 = vmatprep.subr.bf16.mxu0 %v6463_v3  ;;  %v7254_v3 = vld [vmem:[%s10517_s7 + $0xe4] ss:$28 sps:$4 sm:$0xff]  }
 0x285   :  { %2500 = vmatpush1.bf16.msra.mxu1 %v6460_v10  ;;  %v7263_v10 = vld [vmem:[%s10517_s7 + $0x124] ss:$28 sps:$4 sm:$0xff]  }
 0x286   :  { %2582 = vmatpush1.bf16.msra.mxu0 %v6462_v14  ;;  %2501 = vmatprep.subr.bf16.mxu1 %v6469_v15  ;;  %v7258_v14 = vld [vmem:[%s10517_s7 + $0x118] ss:$28 sps:$4 sm:$0xff]   ;;  %v7261_v15 = vld [vmem:[%s10517_s7 + $0x120] ss:$28 sps:$4 sm:$0xff]  }
 0x287   :  { %2583 = vmatprep.subr.bf16.mxu0 %v6471_v51  ;;  %v7266_v51 = vld [vmem:[%s10517_s7 + $0x154] ss:$28 sps:$4 sm:$0xff]  }
 0x289   :  { %2502 = vmatpush1.bf16.msra.mxu1 %v6468_v23  ;;  %v7275_v23 = vld [vmem:[%s10517_s7 + $0x194] ss:$28 sps:$4 sm:$0xff]  }
 0x28a   :  { %2584 = vmatpush1.bf16.msra.mxu0 %v6470_v11  ;;  %2503 = vmatprep.subr.bf16.mxu1 %v6477_v12  ;;  %v7270_v11 = vld [vmem:[%s10517_s7 + $0x188] ss:$28 sps:$4 sm:$0xff]   ;;  %v7273_v12 = vld [vmem:[%s10517_s7 + $0x190] ss:$28 sps:$4 sm:$0xff]  }
 0x28b   :  { %2585 = vmatprep.subr.bf16.mxu0 %v6479_v13  ;;  %v7278_v13 = vld [vmem:[%s10517_s7 + $0x1c4] ss:$28 sps:$4 sm:$0xff]  }
 0x28d   :  { %2504 = vmatpush1.bf16.msra.mxu1 %v6476_v25  ;;  %v7287_v25 = vld [vmem:[%s10517_s7 + $0x204] ss:$28 sps:$4 sm:$0xff]  }
 0x28e   :  { %2586 = vmatpush1.bf16.msra.mxu0 %v6478_v26  ;;  %2505 = vmatprep.subr.bf16.mxu1 %v6485_v27  ;;  %v7282_v26 = vld [vmem:[%s10517_s7 + $0x1f8] ss:$28 sps:$4 sm:$0xff]   ;;  %v7285_v27 = vld [vmem:[%s10517_s7 + $0x200] ss:$28 sps:$4 sm:$0xff]  }
 0x28f   :  { %2587 = vmatprep.subr.bf16.mxu0 %v6487_v28  ;;  %v7290_v28 = vld [vmem:[%s10517_s7 + $0x234] ss:$28 sps:$4 sm:$0xff]  }
 0x291   :  { %2506 = vmatpush1.bf16.msra.mxu1 %v6484_v36  ;;  %v7299_v36 = vld [vmem:[%s10517_s7 + $0x274] ss:$28 sps:$4 sm:$0xff]  }
 0x292   :  { %2588 = vmatpush1.bf16.msra.mxu0 %v6486_v37  ;;  %2507 = vmatprep.subr.bf16.mxu1 %v6493_v38  ;;  %v7294_v37 = vld [vmem:[%s10517_s7 + $0x268] ss:$28 sps:$4 sm:$0xff]   ;;  %v7297_v38 = vld [vmem:[%s10517_s7 + $0x270] ss:$28 sps:$4 sm:$0xff]  }
 0x293   :  { %2589 = vmatprep.subr.bf16.mxu0 %v6495_v39  ;;  %v7302_v39 = vld [vmem:[%s10517_s7 + $0x2a4] ss:$28 sps:$4 sm:$0xff]  }
 0x295   :  { %2508 = vmatpush1.bf16.msra.mxu1 %v6492_v46  ;;  %v7311_v46 = vld [vmem:[%s10517_s7 + $0x2e4] ss:$28 sps:$4 sm:$0xff]  }
 0x296   :  { %2590 = vmatpush1.bf16.msra.mxu0 %v6494_v47  ;;  %2509 = vmatprep.subr.bf16.mxu1 %v6501_v48  ;;  %v7306_v47 = vld [vmem:[%s10517_s7 + $0x2d8] ss:$28 sps:$4 sm:$0xff]   ;;  %v7309_v48 = vld [vmem:[%s10517_s7 + $0x2e0] ss:$28 sps:$4 sm:$0xff]  }
 0x297   :  { %2591 = vmatprep.subr.bf16.mxu0 %v6503_v4  ;;  %v7314_v4 = vld [vmem:[%s10517_s7 + $0x314] ss:$28 sps:$4 sm:$0xff]  }
 0x299   :  { %2510 = vmatpush1.bf16.msra.mxu1 %v6500_v49  ;;  %v7317_v49 = vld [vmem:[%s10517_s7 + $0x31c] ss:$28 sps:$4 sm:$0xff]  }
 0x29a   :  { %2592 = vmatpush1.bf16.msra.mxu0 %v6502_v52  ;;  %5487 = vmatprep.subr.bf16.mxu1 %v7230_v53  ;;  %v7312_v52 = vld [vmem:[%s10517_s7 + $0x310] ss:$28 sps:$4 sm:$0xff]   ;;  %v7315_v53 = vld [vmem:[%s10517_s7 + $0x318] ss:$28 sps:$4 sm:$0xff]  }
 0x29b   :  { %5651 = vmatprep.subr.bf16.mxu0 %v7233_v54  ;;  %v7320_v54 = vld [vmem:[%s10517_s7 + $0x34c] ss:$28 sps:$4 sm:$0xff]  }
 0x29c   :  { %2512 = vmatmul.mubr.bf16.vlgmr.msra.gmra.mrb[4].mxu1 %v8677_v31 }
 0x29d   :  { %2594 = vmatmul.mubr.bf16.vlgmr.msra.gmra.mrb[16].mxu0 %v8677_v31  ;;  %5488 = vmatpush1.bf16.msra.mxu1 %v7228_v56  ;;  %v7245_v31 = vld [vmem:[%s10517_s7 + $0x7c] ss:$28 sps:$4 sm:$0xff]   ;;  %v7323_v56 = vld [vmem:[%s10517_s7 + $0x354] ss:$28 sps:$4 sm:$0xff]  }
 0x29e   :  { %5652 = vmatpush1.bf16.msra.mxu0 %v7231_v57  ;;  %5489 = vmatprep.subr.bf16.mxu1 %v7236_v58  ;;  %v7318_v57 = vld [vmem:[%s10517_s7 + $0x348] ss:$28 sps:$4 sm:$0xff]   ;;  %v7321_v58 = vld [vmem:[%s10517_s7 + $0x350] ss:$28 sps:$4 sm:$0xff]  }
 0x29f   :  { %5653 = vmatprep.subr.bf16.mxu0 %v7239_v59  ;;  %v7326_v59 = vld [vmem:[%s10517_s7 + $0x384] ss:$28 sps:$4 sm:$0xff]  }
 0x2a1   :  { %5490 = vmatpush1.bf16.msra.mxu1 %v7234_v60  ;;  %v7329_v60 = vld [vmem:[%s10517_s7 + $0x38c] ss:$28 sps:$4 sm:$0xff]  }
 0x2a2   :  { %5654 = vmatpush1.bf16.msra.mxu0 %v7237_v61  ;;  %5491 = vmatprep.subr.bf16.mxu1 %v7242_v62  ;;  %v9252_v61 = vld [vmem:[%s10516_s6] sm:$0xff] }
 0x2a3   :  { %5655 = vmatprep.subr.bf16.mxu0 %v7245_v31  ;;  %v957_v62 = vrot.slane %v9252_v61, %v8192_v41  ;;  %v961_v31 = vrot.slane %v9252_v61, %v8195_v42 }
 0x2a5   :  { %5492 = vmatpush1.bf16.msra.mxu1 %v7240_v63  ;;  %v969_v63 = vrot.slane %v9252_v61, %v8633_v55 }
 0x2a6   :  { %5656 = vmatpush1.bf16.msra.mxu0 %v7243_v0  ;;  %5493 = vmatprep.subr.bf16.mxu1 %v7248_v1 }
 0x2a7   :  { %5657 = vmatprep.subr.bf16.mxu0 %v7251_v5 }
 0x2a9   :  { %5494 = vmatpush1.bf16.msra.mxu1 %v7246_v2 }
 0x2aa   :  { %5658 = vmatpush1.bf16.msra.mxu0 %v7249_v29  ;;  %5495 = vmatprep.subr.bf16.mxu1 %v7254_v3 }
 0x2ab   :  { %5659 = vmatprep.subr.bf16.mxu0 %v7257_v6 }
 0x2ad   :  { %5496 = vmatpush1.bf16.msra.mxu1 %v7252_v7 }
 0x2ae   :  { %5660 = vmatpush1.bf16.msra.mxu0 %v7255_v8  ;;  %5497 = vmatprep.subr.bf16.mxu1 %v7260_v9 }
 0x2af   :  { %5661 = vmatprep.subr.bf16.mxu0 %v7263_v10 }
 0x2b1   :  { %5498 = vmatpush1.bf16.msra.mxu1 %v7258_v14 }
 0x2b2   :  { %5662 = vmatpush1.bf16.msra.mxu0 %v7261_v15  ;;  %5499 = vmatprep.subr.bf16.mxu1 %v7266_v51 }
 0x2b3   :  { %5663 = vmatprep.subr.bf16.mxu0 %v7269_v16 }
 0x2b5   :  { %5500 = vmatpush1.bf16.msra.mxu1 %v7264_v20 }
 0x2b6   :  { %5664 = vmatpush1.bf16.msra.mxu0 %v7267_v21  ;;  %5501 = vmatprep.subr.bf16.mxu1 %v7272_v22 }
 0x2b7   :  { %5665 = vmatprep.subr.bf16.mxu0 %v7275_v23  ;;  %v7324_v23 = vld [vmem:[%s10517_s7 + $0x380] ss:$28 sps:$4 sm:$0xff]  }
 0x2b9   :  { %5502 = vmatpush1.bf16.msra.mxu1 %v7270_v11  ;;  %v7327_v11 = vld [vmem:[%s10517_s7 + $0x388] ss:$28 sps:$4 sm:$0xff]  }
 0x2ba   :  { %5666 = vmatpush1.bf16.msra.mxu0 %v7273_v12  ;;  %5503 = vmatprep.subr.bf16.mxu1 %v7278_v13  ;;  %v7332_v13 = vld [vmem:[%s10517_s7 + $0x3bc] ss:$28 sps:$4 sm:$0xff]  }
 0x2bb   :  { %5667 = vmatprep.subr.bf16.mxu0 %v7281_v17  ;;  %v7335_v17 = vld [vmem:[%s10517_s7 + $0x3c4] ss:$28 sps:$4 sm:$0xff]  }
 0x2bd   :  { %5504 = vmatpush1.bf16.msra.mxu1 %v7276_v18 }
 0x2be   :  { %5668 = vmatpush1.bf16.msra.mxu0 %v7279_v19  ;;  %5505 = vmatprep.subr.bf16.mxu1 %v7284_v24  ;;  %v7330_v19 = vld [vmem:[%s10517_s7 + $0x3b8] ss:$28 sps:$4 sm:$0xff]   ;;  %v7333_v24 = vld [vmem:[%s10517_s7 + $0x3c0] ss:$28 sps:$4 sm:$0xff]  }
 0x2bf   :  { %5669 = vmatprep.subr.bf16.mxu0 %v7287_v25  ;;  %v7338_v25 = vld [vmem:[%s10517_s7 + $0x3f4] ss:$28 sps:$4 sm:$0xff]  }
 0x2c1   :  { %5506 = vmatpush1.bf16.msra.mxu1 %v7282_v26  ;;  %v7341_v26 = vld [vmem:[%s10517_s7 + $0x3fc] ss:$28 sps:$4 sm:$0xff]  }
 0x2c2   :  { %5670 = vmatpush1.bf16.msra.mxu0 %v7285_v27  ;;  %5507 = vmatprep.subr.bf16.mxu1 %v7290_v28  ;;  %v7336_v27 = vld [vmem:[%s10517_s7 + $0x3f0] ss:$28 sps:$4 sm:$0xff]   ;;  %v7339_v28 = vld [vmem:[%s10517_s7 + $0x3f8] ss:$28 sps:$4 sm:$0xff]  }
 0x2c3   :  { %5671 = vmatprep.subr.bf16.mxu0 %v7293_v30  ;;  %v7344_v30 = vld [vmem:[%s10517_s7 + $0x42c] ss:$28 sps:$4 sm:$0xff]  }
 0x2c5   :  { %5508 = vmatpush1.bf16.msra.mxu1 %v7288_v32  ;;  %v7347_v32 = vld [vmem:[%s10517_s7 + $0x434] ss:$28 sps:$4 sm:$0xff]  }
 0x2c6   :  { %5672 = vmatpush1.bf16.msra.mxu0 %v7291_v33  ;;  %5509 = vmatprep.subr.bf16.mxu1 %v7296_v34  ;;  %v7342_v33 = vld [vmem:[%s10517_s7 + $0x428] ss:$28 sps:$4 sm:$0xff]   ;;  %v7345_v34 = vld [vmem:[%s10517_s7 + $0x430] ss:$28 sps:$4 sm:$0xff]  }
 0x2c7   :  { %5673 = vmatprep.subr.bf16.mxu0 %v7299_v36  ;;  %v7350_v36 = vld [vmem:[%s10517_s7 + $0x464] ss:$28 sps:$4 sm:$0xff]  }
 0x2c9   :  { %5510 = vmatpush1.bf16.msra.mxu1 %v7294_v37  ;;  %v7353_v37 = vld [vmem:[%s10517_s7 + $0x46c] ss:$28 sps:$4 sm:$0xff]  }
 0x2ca   :  { %5674 = vmatpush1.bf16.msra.mxu0 %v7297_v38  ;;  %5511 = vmatprep.subr.bf16.mxu1 %v7302_v39  ;;  %v7348_v38 = vld [vmem:[%s10517_s7 + $0x460] ss:$28 sps:$4 sm:$0xff]   ;;  %v7351_v39 = vld [vmem:[%s10517_s7 + $0x468] ss:$28 sps:$4 sm:$0xff]  }
 0x2cb   :  { %5675 = vmatprep.subr.bf16.mxu0 %v7305_v40  ;;  %v7356_v40 = vld [vmem:[%s10517_s7 + $0x49c] ss:$28 sps:$4 sm:$0xff]  }
 0x2cd   :  { %5512 = vmatpush1.bf16.msra.mxu1 %v7300_v43  ;;  %v7359_v43 = vld [vmem:[%s10517_s7 + $0x4a4] ss:$28 sps:$4 sm:$0xff]  }
 0x2ce   :  { %5676 = vmatpush1.bf16.msra.mxu0 %v7303_v44  ;;  %5513 = vmatprep.subr.bf16.mxu1 %v7308_v45  ;;  %v7354_v44 = vld [vmem:[%s10517_s7 + $0x498] ss:$28 sps:$4 sm:$0xff]   ;;  %v7357_v45 = vld [vmem:[%s10517_s7 + $0x4a0] ss:$28 sps:$4 sm:$0xff]  }
 0x2cf   :  { %5677 = vmatprep.subr.bf16.mxu0 %v7311_v46  ;;  %v7362_v46 = vld [vmem:[%s10517_s7 + $0x4d4] ss:$28 sps:$4 sm:$0xff]  }
 0x2d1   :  { %5514 = vmatpush1.bf16.msra.mxu1 %v7306_v47  ;;  %v7365_v47 = vld [vmem:[%s10517_s7 + $0x4dc] ss:$28 sps:$4 sm:$0xff]  }
 0x2d2   :  { %5678 = vmatpush1.bf16.msra.mxu0 %v7309_v48  ;;  %5515 = vmatprep.subr.bf16.mxu1 %v7314_v4  ;;  %v7360_v48 = vld [vmem:[%s10517_s7 + $0x4d0] ss:$28 sps:$4 sm:$0xff]   ;;  %v7363_v4 = vld [vmem:[%s10517_s7 + $0x4d8] ss:$28 sps:$4 sm:$0xff]  }
 0x2d3   :  { %5679 = vmatprep.subr.bf16.mxu0 %v7317_v49  ;;  %v7368_v49 = vld [vmem:[%s10517_s7 + $0x50c] ss:$28 sps:$4 sm:$0xff]  }
 0x2d5   :  { %5516 = vmatpush1.bf16.msra.mxu1 %v7312_v52  ;;  %v7371_v52 = vld [vmem:[%s10517_s7 + $0x514] ss:$28 sps:$4 sm:$0xff]  }
 0x2d6   :  { %5680 = vmatpush1.bf16.msra.mxu0 %v7315_v53  ;;  %5517 = vmatprep.subr.bf16.mxu1 %v7320_v54  ;;  %v7366_v53 = vld [vmem:[%s10517_s7 + $0x508] ss:$28 sps:$4 sm:$0xff]   ;;  %v7369_v54 = vld [vmem:[%s10517_s7 + $0x510] ss:$28 sps:$4 sm:$0xff]  }
 0x2d7   :  { %5681 = vmatprep.subr.bf16.mxu0 %v7323_v56  ;;  %v7374_v56 = vld [vmem:[%s10517_s7 + $0x544] ss:$28 sps:$4 sm:$0xff]  }
 0x2d9   :  { %5518 = vmatpush1.bf16.msra.mxu1 %v7318_v57  ;;  %v7377_v57 = vld [vmem:[%s10517_s7 + $0x54c] ss:$28 sps:$4 sm:$0xff]  }
 0x2da   :  { %5682 = vmatpush1.bf16.msra.mxu0 %v7321_v58  ;;  %5528 = vmatprep.subr.bf16.mxu1 %v7326_v59  ;;  %v7372_v58 = vld [vmem:[%s10517_s7 + $0x540] ss:$28 sps:$4 sm:$0xff]   ;;  %v7375_v59 = vld [vmem:[%s10517_s7 + $0x548] ss:$28 sps:$4 sm:$0xff]  }
 0x2db   :  { %5692 = vmatprep.subr.bf16.mxu0 %v7329_v60  ;;  %v7380_v60 = vld [vmem:[%s10517_s7 + $0x57c] ss:$28 sps:$4 sm:$0xff]  }
 0x2ef   :  { %v2349_v0 = vpop.f32.mrb[0].mxu1  ;;  %v9260_v1 = vpop.f32.mrb[12].mxu0 }
 0x2f0   :  { %v7040_v5 = vadd.f32 %v2349_v0, %v957_v62  ;;  %v2351_v2 = vpop.f32.mrb[1].mxu1  ;;  %v2433_v29 = vpop.f32.mrb[13].mxu0  ;;  %v7383_v62 = vld [vmem:[%s10517_s7 + $0x584] ss:$28 sps:$4 sm:$0xff]   ;;  %v7386_v0 = vld [vmem:[%s10517_s7 + $0x5b4] ss:$28 sps:$4 sm:$0xff]  }
 0x2f1   :  { %v7041_v3 = vadd.f32 %v2351_v2, %v961_v31  ;;  %v7043_v6 = vadd.f32 %v2433_v29, %v969_v63  ;;  %v2353_v7 = vpop.f32.mrb[2].mxu1  ;;  %v2435_v8 = vpop.f32.mrb[14].mxu0  ;;  %v7378_v31 = vld [vmem:[%s10517_s7 + $0x578] ss:$28 sps:$4 sm:$0xff]   ;;  %v7381_v63 = vld [vmem:[%s10517_s7 + $0x580] ss:$28 sps:$4 sm:$0xff]  }
 0x2f2   :  { %vm2602_vm6 = vcmp.gt.f32.partialorder %v7040_v5, 0.0  ;;  %v2610_v9 = vmul.f32 0.2, %v7040_v5  ;;  %v2354_v51 = vpop.f32.mrb[3].mxu1  ;;  %v2436_v16 = vpop.f32.mrb[15].mxu0 }
 0x2f3   :  { %vm2603_vm7 = vcmp.gt.f32.partialorder %v7041_v3, 0.0  ;;  %v2611_v10 = vmul.f32 0.2, %v7041_v3  ;;  %vm2605_vm8 = vcmp.gt.f32.partialorder %v7043_v6, 0.0  ;;  %v2613_v14 = vmul.f32 0.2, %v7043_v6 }
 0x2f4   :  { %v2618_v15 = vsel %vm2602_vm6, %v7040_v5, %v2610_v9  ;;  %v7389_v5 = vld [vmem:[%s10517_s7 + $0x5bc] ss:$28 sps:$4 sm:$0xff]   ;;  %v7384_v2 = vld [vmem:[%s10517_s7 + $0x5b0] ss:$28 sps:$4 sm:$0xff]   ;;  %v7390_v7 = vld [vmem:[%s10517_s7 + $0x5e8] ss:$28 sps:$4 sm:$0xff]  }
 0x2f5   :  { %v2619_v20 = vsel %vm2603_vm7, %v7041_v3, %v2611_v10  ;;  %v2621_v22 = vsel %vm2605_vm8, %v7043_v6, %v2613_v14  ;;  %v9270_v12 = vpack.c.bf16 %v2618_v15, %v2618_v15  ;;  %v7387_v29 = vld [vmem:[%s10517_s7 + $0x5b8] ss:$28 sps:$4 sm:$0xff]   ;;  %v7392_v3 = vld [vmem:[%s10517_s7 + $0x5ec] ss:$28 sps:$4 sm:$0xff]   ;;  %v7398_v9 = vld [vmem:[%s10517_s7 + $0x624] ss:$28 sps:$4 sm:$0xff]  }
 0x2f6   :  { %v9262_v21 = vpack.c.bf16 %v2619_v20, %v2619_v20  ;;  %v9280_v18 = vpack.c.bf16 %v2621_v22, %v2621_v22  ;;  %v7395_v6 = vld [vmem:[%s10517_s7 + $0x5f4] ss:$28 sps:$4 sm:$0xff]   ;;  %v7401_v10 = vld [vmem:[%s10517_s7 + $0x62c] ss:$28 sps:$4 sm:$0xff]   ;;  %v7396_v14 = vld [vmem:[%s10517_s7 + $0x620] ss:$28 sps:$4 sm:$0xff]   ;;  %v965_v20 = vrot.slane %v9252_v61, %v8621_v50 }
 0x2f7   :  { %v7393_v8 = vld [vmem:[%s10517_s7 + $0x5f0] ss:$28 sps:$4 sm:$0xff]   ;;  %v7399_v15 = vld [vmem:[%s10517_s7 + $0x628] ss:$28 sps:$4 sm:$0xff]   ;;  %v7404_v51 = vld [vmem:[%s10517_s7 + $0x65c] ss:$28 sps:$4 sm:$0xff]  }
 0x2f8   :  { %5519 = vmatprep.mubr.bf16.mxu1 %v9262_v21  ;;  %5683 = vmatprep.mubr.bf16.mxu0 %v9262_v21  ;;  %v7407_v16 = vld [vmem:[%s10517_s7 + $0x664] ss:$28 sps:$4 sm:$0xff]   ;;  %v7402_v22 = vld [vmem:[%s10517_s7 + $0x658] ss:$28 sps:$4 sm:$0xff]  }
 0x2f9   :  { %5520 = vmatmul.mubr.bf16.vlgmr.msra.gmra.mrb[8].mxu1 %v9270_v12  ;;  %5684 = vmatmul.mubr.bf16.vlgmr.msra.gmra.mrb[20].mxu0 %v9270_v12 }
 0x2fa   :  { %5529 = vmatpush1.bf16.msra.mxu1 %v7324_v23  ;;  %5693 = vmatpush1.bf16.msra.mxu0 %v7327_v11  ;;  %v7405_v23 = vld [vmem:[%s10517_s7 + $0x660] ss:$28 sps:$4 sm:$0xff]   ;;  %v7410_v11 = vld [vmem:[%s10517_s7 + $0x694] ss:$28 sps:$4 sm:$0xff]  }
 0x2fb   :  { %5560 = vmatprep.mubr.bf16.mxu1 %v9280_v18  ;;  %5724 = vmatprep.mubr.bf16.mxu0 %v9280_v18 }
 0x2fc   :  { %5530 = vmatprep.subr.bf16.mxu1 %v7332_v13  ;;  %5694 = vmatprep.subr.bf16.mxu0 %v7335_v17  ;;  %v7413_v13 = vld [vmem:[%s10517_s7 + $0x69c] ss:$28 sps:$4 sm:$0xff]   ;;  %v7042_v17 = vadd.f32 %v9260_v1, %v965_v20  ;;  %v7419_v1 = vld [vmem:[%s10517_s7 + $0x6d4] ss:$28 sps:$4 sm:$0xff]  }
 0x2fd   :  { %v7482_v20 = vld [vmem:[%s10517_s7 + $0x934] ss:$28 sps:$4 sm:$0xff]  }
 0x2fe   :  { %5531 = vmatpush1.bf16.msra.mxu1 %v7330_v19  ;;  %5695 = vmatpush1.bf16.msra.mxu0 %v7333_v24  ;;  %v7408_v19 = vld [vmem:[%s10517_s7 + $0x690] ss:$28 sps:$4 sm:$0xff]   ;;  %v7411_v24 = vld [vmem:[%s10517_s7 + $0x698] ss:$28 sps:$4 sm:$0xff]   ;;  %vm2604_vm9 = vcmp.gt.f32.partialorder %v7042_v17, 0.0 }
 0x2ff   :  { %5532 = vmatprep.subr.bf16.mxu1 %v7338_v25  ;;  %5696 = vmatprep.subr.bf16.mxu0 %v7341_v26  ;;  %v7416_v25 = vld [vmem:[%s10517_s7 + $0x6cc] ss:$28 sps:$4 sm:$0xff]   ;;  %v2612_v26 = vmul.f32 0.2, %v7042_v17 }
 0x302   :  { %5533 = vmatpush1.bf16.msra.mxu1 %v7336_v27  ;;  %5697 = vmatpush1.bf16.msra.mxu0 %v7339_v28  ;;  %v7414_v27 = vld [vmem:[%s10517_s7 + $0x6c8] ss:$28 sps:$4 sm:$0xff]   ;;  %v7417_v28 = vld [vmem:[%s10517_s7 + $0x6d0] ss:$28 sps:$4 sm:$0xff]  }
 0x303   :  { %5534 = vmatprep.subr.bf16.mxu1 %v7344_v30  ;;  %5698 = vmatprep.subr.bf16.mxu0 %v7347_v32  ;;  %v7422_v30 = vld [vmem:[%s10517_s7 + $0x704] ss:$28 sps:$4 sm:$0xff]   ;;  %v7425_v32 = vld [vmem:[%s10517_s7 + $0x70c] ss:$28 sps:$4 sm:$0xff]  }
 0x306   :  { %5535 = vmatpush1.bf16.msra.mxu1 %v7342_v33  ;;  %5699 = vmatpush1.bf16.msra.mxu0 %v7345_v34  ;;  %v2620_v33 = vsel %vm2604_vm9, %v7042_v17, %v2612_v26  ;;  %v7420_v34 = vld [vmem:[%s10517_s7 + $0x700] ss:$28 sps:$4 sm:$0xff]   ;;  %v7491_v17 = vld [vmem:[%s10517_s7 + $0x974] ss:$28 sps:$4 sm:$0xff]  }
 0x307   :  { %5536 = vmatprep.subr.bf16.mxu1 %v7350_v36  ;;  %5700 = vmatprep.subr.bf16.mxu0 %v7353_v37  ;;  %v7423_v36 = vld [vmem:[%s10517_s7 + $0x708] ss:$28 sps:$4 sm:$0xff]   ;;  %v9475_v37 = vpack.c.bf16 %v2620_v33, %v2620_v33  ;;  %v7492_v26 = vld [vmem:[%s10517_s7 + $0x9a0] ss:$28 sps:$4 sm:$0xff]   ;;  %v976_v33 = vsub.s32 5, %v8180_v35 }
 0x30a   :  { %5537 = vmatpush1.bf16.msra.mxu1 %v7348_v38  ;;  %5701 = vmatpush1.bf16.msra.mxu0 %v7351_v39  ;;  %v7428_v38 = vld [vmem:[%s10517_s7 + $0x73c] ss:$28 sps:$4 sm:$0xff]   ;;  %v7431_v39 = vld [vmem:[%s10517_s7 + $0x744] ss:$28 sps:$4 sm:$0xff]  }
 0x30b   :  { %5538 = vmatprep.subr.bf16.mxu1 %v7356_v40  ;;  %5702 = vmatprep.subr.bf16.mxu0 %v7359_v43  ;;  %v7426_v40 = vld [vmem:[%s10517_s7 + $0x738] ss:$28 sps:$4 sm:$0xff]   ;;  %v7429_v43 = vld [vmem:[%s10517_s7 + $0x740] ss:$28 sps:$4 sm:$0xff]  }
 0x30e   :  { %5539 = vmatpush1.bf16.msra.mxu1 %v7354_v44  ;;  %5703 = vmatpush1.bf16.msra.mxu0 %v7357_v45  ;;  %v7434_v44 = vld [vmem:[%s10517_s7 + $0x774] ss:$28 sps:$4 sm:$0xff]   ;;  %v7437_v45 = vld [vmem:[%s10517_s7 + $0x77c] ss:$28 sps:$4 sm:$0xff]  }
 0x30f   :  { %5540 = vmatprep.subr.bf16.mxu1 %v7362_v46  ;;  %5704 = vmatprep.subr.bf16.mxu0 %v7365_v47  ;;  %v7432_v46 = vld [vmem:[%s10517_s7 + $0x770] ss:$28 sps:$4 sm:$0xff]   ;;  %v7435_v47 = vld [vmem:[%s10517_s7 + $0x778] ss:$28 sps:$4 sm:$0xff]  }
 0x312   :  { %5541 = vmatpush1.bf16.msra.mxu1 %v7360_v48  ;;  %5705 = vmatpush1.bf16.msra.mxu0 %v7363_v4  ;;  %v7440_v48 = vld [vmem:[%s10517_s7 + $0x7ac] ss:$28 sps:$4 sm:$0xff]   ;;  %v7443_v4 = vld [vmem:[%s10517_s7 + $0x7b4] ss:$28 sps:$4 sm:$0xff]  }
 0x313   :  { %5542 = vmatprep.subr.bf16.mxu1 %v7368_v49  ;;  %5706 = vmatprep.subr.bf16.mxu0 %v7371_v52  ;;  %v7438_v49 = vld [vmem:[%s10517_s7 + $0x7a8] ss:$28 sps:$4 sm:$0xff]   ;;  %v7441_v52 = vld [vmem:[%s10517_s7 + $0x7b0] ss:$28 sps:$4 sm:$0xff]  }
 0x316   :  { %5543 = vmatpush1.bf16.msra.mxu1 %v7366_v53  ;;  %5707 = vmatpush1.bf16.msra.mxu0 %v7369_v54  ;;  %v7446_v53 = vld [vmem:[%s10517_s7 + $0x7e4] ss:$28 sps:$4 sm:$0xff]   ;;  %v7449_v54 = vld [vmem:[%s10517_s7 + $0x7ec] ss:$28 sps:$4 sm:$0xff]  }
 0x317   :  { %5544 = vmatprep.subr.bf16.mxu1 %v7374_v56  ;;  %5708 = vmatprep.subr.bf16.mxu0 %v7377_v57  ;;  %v7444_v56 = vld [vmem:[%s10517_s7 + $0x7e0] ss:$28 sps:$4 sm:$0xff]   ;;  %v7447_v57 = vld [vmem:[%s10517_s7 + $0x7e8] ss:$28 sps:$4 sm:$0xff]  }
 0x31a   :  { %5545 = vmatpush1.bf16.msra.mxu1 %v7372_v58  ;;  %5709 = vmatpush1.bf16.msra.mxu0 %v7375_v59  ;;  %v7452_v58 = vld [vmem:[%s10517_s7 + $0x81c] ss:$28 sps:$4 sm:$0xff]   ;;  %v7455_v59 = vld [vmem:[%s10517_s7 + $0x824] ss:$28 sps:$4 sm:$0xff]  }
 0x31b   :  { %5546 = vmatprep.subr.bf16.mxu1 %v7380_v60  ;;  %5710 = vmatprep.subr.bf16.mxu0 %v7383_v62  ;;  %v7450_v60 = vld [vmem:[%s10517_s7 + $0x818] ss:$28 sps:$4 sm:$0xff]   ;;  %v7453_v62 = vld [vmem:[%s10517_s7 + $0x820] ss:$28 sps:$4 sm:$0xff]  }
 0x31e   :  { %5547 = vmatpush1.bf16.msra.mxu1 %v7378_v31  ;;  %5711 = vmatpush1.bf16.msra.mxu0 %v7381_v63  ;;  %v7458_v31 = vld [vmem:[%s10517_s7 + $0x854] ss:$28 sps:$4 sm:$0xff]   ;;  %v7461_v63 = vld [vmem:[%s10517_s7 + $0x85c] ss:$28 sps:$4 sm:$0xff]  }
 0x31f   :  { %5548 = vmatprep.subr.bf16.mxu1 %v7386_v0  ;;  %5712 = vmatprep.subr.bf16.mxu0 %v7389_v5  ;;  %v7456_v0 = vld [vmem:[%s10517_s7 + $0x850] ss:$28 sps:$4 sm:$0xff]   ;;  %v7459_v5 = vld [vmem:[%s10517_s7 + $0x858] ss:$28 sps:$4 sm:$0xff]  }
 0x322   :  { %5549 = vmatpush1.bf16.msra.mxu1 %v7384_v2  ;;  %5713 = vmatpush1.bf16.msra.mxu0 %v7387_v29  ;;  %v7464_v2 = vld [vmem:[%s10517_s7 + $0x88c] ss:$28 sps:$4 sm:$0xff]   ;;  %v7467_v29 = vld [vmem:[%s10517_s7 + $0x894] ss:$28 sps:$4 sm:$0xff]  }
 0x323   :  { %5550 = vmatprep.subr.bf16.mxu1 %v7392_v3  ;;  %5714 = vmatprep.subr.bf16.mxu0 %v7395_v6  ;;  %v7462_v3 = vld [vmem:[%s10517_s7 + $0x888] ss:$28 sps:$4 sm:$0xff]   ;;  %v7465_v6 = vld [vmem:[%s10517_s7 + $0x890] ss:$28 sps:$4 sm:$0xff]  }
 0x326   :  { %5551 = vmatpush1.bf16.msra.mxu1 %v7390_v7  ;;  %5715 = vmatpush1.bf16.msra.mxu0 %v7393_v8  ;;  %v7470_v7 = vld [vmem:[%s10517_s7 + $0x8c4] ss:$28 sps:$4 sm:$0xff]   ;;  %v7473_v8 = vld [vmem:[%s10517_s7 + $0x8cc] ss:$28 sps:$4 sm:$0xff]  }
 0x327   :  { %5552 = vmatprep.subr.bf16.mxu1 %v7398_v9  ;;  %5716 = vmatprep.subr.bf16.mxu0 %v7401_v10  ;;  %v7468_v9 = vld [vmem:[%s10517_s7 + $0x8c0] ss:$28 sps:$4 sm:$0xff]   ;;  %v7471_v10 = vld [vmem:[%s10517_s7 + $0x8c8] ss:$28 sps:$4 sm:$0xff]  }
 0x32a   :  { %5553 = vmatpush1.bf16.msra.mxu1 %v7396_v14  ;;  %5717 = vmatpush1.bf16.msra.mxu0 %v7399_v15  ;;  %v7476_v14 = vld [vmem:[%s10517_s7 + $0x8fc] ss:$28 sps:$4 sm:$0xff]   ;;  %v7479_v15 = vld [vmem:[%s10517_s7 + $0x904] ss:$28 sps:$4 sm:$0xff]  }
 0x32b   :  { %5554 = vmatprep.subr.bf16.mxu1 %v7404_v51  ;;  %5718 = vmatprep.subr.bf16.mxu0 %v7407_v16  ;;  %v7474_v51 = vld [vmem:[%s10517_s7 + $0x8f8] ss:$28 sps:$4 sm:$0xff]   ;;  %v7477_v16 = vld [vmem:[%s10517_s7 + $0x900] ss:$28 sps:$4 sm:$0xff]  }
 0x32e   :  { %5555 = vmatpush1.bf16.msra.mxu1 %v7402_v22  ;;  %5719 = vmatpush1.bf16.msra.mxu0 %v7405_v23  ;;  %v7485_v22 = vld [vmem:[%s10517_s7 + $0x93c] ss:$28 sps:$4 sm:$0xff]   ;;  %v7480_v23 = vld [vmem:[%s10517_s7 + $0x930] ss:$28 sps:$4 sm:$0xff]  }
 0x32f   :  { %5556 = vmatprep.subr.bf16.mxu1 %v7410_v11  ;;  %5720 = vmatprep.subr.bf16.mxu0 %v7413_v13  ;;  %v7483_v11 = vld [vmem:[%s10517_s7 + $0x938] ss:$28 sps:$4 sm:$0xff]   ;;  %v7488_v13 = vld [vmem:[%s10517_s7 + $0x96c] ss:$28 sps:$4 sm:$0xff]  }
 0x332   :  { %5557 = vmatpush1.bf16.msra.mxu1 %v7408_v19  ;;  %5721 = vmatpush1.bf16.msra.mxu0 %v7411_v24  ;;  %v7486_v19 = vld [vmem:[%s10517_s7 + $0x968] ss:$28 sps:$4 sm:$0xff]   ;;  %v7489_v24 = vld [vmem:[%s10517_s7 + $0x970] ss:$28 sps:$4 sm:$0xff]  }
 0x333   :  { %5558 = vmatprep.subr.bf16.mxu1 %v7416_v25  ;;  %5722 = vmatprep.subr.bf16.mxu0 %v7419_v1  ;;  %v7494_v25 = vld [vmem:[%s10517_s7 + $0x9a4] ss:$28 sps:$4 sm:$0xff]   ;;  %v7497_v1 = vld [vmem:[%s10517_s7 + $0x9ac] ss:$28 sps:$4 sm:$0xff]  }
 0x336   :  { %5559 = vmatpush1.bf16.msra.mxu1 %v7414_v27  ;;  %5723 = vmatpush1.bf16.msra.mxu0 %v7417_v28  ;;  %v7495_v27 = vld [vmem:[%s10517_s7 + $0x9a8] ss:$28 sps:$4 sm:$0xff]   ;;  %v7500_v28 = vld [vmem:[%s10517_s7 + $0x9dc] ss:$28 sps:$4 sm:$0xff]  }
 0x337   :  { %5569 = vmatprep.subr.bf16.mxu1 %v7422_v30  ;;  %5733 = vmatprep.subr.bf16.mxu0 %v7425_v32  ;;  %v7503_v30 = vld [vmem:[%s10517_s7 + $0x9e4] ss:$28 sps:$4 sm:$0xff]   ;;  %v972_v32 = vsub.s32 4, %v8180_v35 }
 0x339   :  { %5561 = vmatmul.mubr.bf16.vlgmr.msra.gmra.mrb[8].mxu1 %v9475_v37  ;;  %5725 = vmatmul.mubr.bf16.vlgmr.msra.gmra.mrb[20].mxu0 %v9475_v37 }
 0x33a   :  { %5570 = vmatpush1.bf16.msra.mxu1 %v7420_v34  ;;  %5734 = vmatpush1.bf16.msra.mxu0 %v7423_v36  ;;  %v7498_v34 = vld [vmem:[%s10517_s7 + $0x9d8] ss:$28 sps:$4 sm:$0xff]   ;;  %v7501_v36 = vld [vmem:[%s10517_s7 + $0x9e0] ss:$28 sps:$4 sm:$0xff]  }
 0x33b   :  { %5571 = vmatprep.subr.bf16.mxu1 %v7428_v38  ;;  %5735 = vmatprep.subr.bf16.mxu0 %v7431_v39  ;;  %v984_v38 = vsub.s32 7, %v8180_v35  ;;  %v7506_v39 = vld [vmem:[%s10517_s7 + $0xa14] ss:$28 sps:$4 sm:$0xff]  }
 0x33e   :  { %5572 = vmatpush1.bf16.msra.mxu1 %v7426_v40  ;;  %5736 = vmatpush1.bf16.msra.mxu0 %v7429_v43  ;;  %v7509_v40 = vld [vmem:[%s10517_s7 + $0xa1c] ss:$28 sps:$4 sm:$0xff]   ;;  %v973_v43 = vrot.slane %v9252_v61, %v972_v32 }
 0x33f   :  { %5573 = vmatprep.subr.bf16.mxu1 %v7434_v44  ;;  %5737 = vmatprep.subr.bf16.mxu0 %v7437_v45  ;;  %v977_v44 = vrot.slane %v9252_v61, %v976_v33  ;;  %v985_v45 = vrot.slane %v9252_v61, %v984_v38  ;;  %v7548_v38 = vld [vmem:[%s10517_s7 + $0xb9c] ss:$28 sps:$4 sm:$0xff]  }
 0x342   :  { %5574 = vmatpush1.bf16.msra.mxu1 %v7432_v46  ;;  %5738 = vmatpush1.bf16.msra.mxu0 %v7435_v47  ;;  %v7504_v46 = vld [vmem:[%s10517_s7 + $0xa10] ss:$28 sps:$4 sm:$0xff]   ;;  %v7507_v47 = vld [vmem:[%s10517_s7 + $0xa18] ss:$28 sps:$4 sm:$0xff]  }
 0x343   :  { %5575 = vmatprep.subr.bf16.mxu1 %v7440_v48  ;;  %5739 = vmatprep.subr.bf16.mxu0 %v7443_v4  ;;  %v7512_v4 = vld [vmem:[%s10517_s7 + $0xa4c] ss:$28 sps:$4 sm:$0xff]  }
 0x346   :  { %5576 = vmatpush1.bf16.msra.mxu1 %v7438_v49  ;;  %5740 = vmatpush1.bf16.msra.mxu0 %v7441_v52  ;;  %v7515_v49 = vld [vmem:[%s10517_s7 + $0xa54] ss:$28 sps:$4 sm:$0xff]  }
 0x347   :  { %5577 = vmatprep.subr.bf16.mxu1 %v7446_v53  ;;  %5741 = vmatprep.subr.bf16.mxu0 %v7449_v54 }
 0x34a   :  { %5578 = vmatpush1.bf16.msra.mxu1 %v7444_v56  ;;  %5742 = vmatpush1.bf16.msra.mxu0 %v7447_v57  ;;  %v7510_v56 = vld [vmem:[%s10517_s7 + $0xa48] ss:$28 sps:$4 sm:$0xff]  }
 0x34b   :  { %5579 = vmatprep.subr.bf16.mxu1 %v7452_v58  ;;  %5743 = vmatprep.subr.bf16.mxu0 %v7455_v59 }
 0x34e   :  { %5580 = vmatpush1.bf16.msra.mxu1 %v7450_v60  ;;  %5744 = vmatpush1.bf16.msra.mxu0 %v7453_v62  ;;  %v7513_v60 = vld [vmem:[%s10517_s7 + $0xa50] ss:$28 sps:$4 sm:$0xff]   ;;  %v7518_v62 = vld [vmem:[%s10517_s7 + $0xa84] ss:$28 sps:$4 sm:$0xff]  }
 0x34f   :  { %5581 = vmatprep.subr.bf16.mxu1 %v7458_v31  ;;  %5745 = vmatprep.subr.bf16.mxu0 %v7461_v63 }
 0x352   :  { %5582 = vmatpush1.bf16.msra.mxu1 %v7456_v0  ;;  %5746 = vmatpush1.bf16.msra.mxu0 %v7459_v5 }
 0x353   :  { %5583 = vmatprep.subr.bf16.mxu1 %v7464_v2  ;;  %5747 = vmatprep.subr.bf16.mxu0 %v7467_v29  ;;  %v7521_v29 = vld [vmem:[%s10517_s7 + $0xa8c] ss:$28 sps:$4 sm:$0xff]  }
 0x356   :  { %5584 = vmatpush1.bf16.msra.mxu1 %v7462_v3  ;;  %5748 = vmatpush1.bf16.msra.mxu0 %v7465_v6 }
 0x357   :  { %5585 = vmatprep.subr.bf16.mxu1 %v7470_v7  ;;  %5749 = vmatprep.subr.bf16.mxu0 %v7473_v8 }
 0x35a   :  { %5586 = vmatpush1.bf16.msra.mxu1 %v7468_v9  ;;  %5750 = vmatpush1.bf16.msra.mxu0 %v7471_v10 }
 0x35b   :  { %5587 = vmatprep.subr.bf16.mxu1 %v7476_v14  ;;  %5751 = vmatprep.subr.bf16.mxu0 %v7479_v15  ;;  %v7516_v14 = vld [vmem:[%s10517_s7 + $0xa80] ss:$28 sps:$4 sm:$0xff]   ;;  %v7519_v15 = vld [vmem:[%s10517_s7 + $0xa88] ss:$28 sps:$4 sm:$0xff]  }
 0x35e   :  { %5588 = vmatpush1.bf16.msra.mxu1 %v7474_v51  ;;  %5752 = vmatpush1.bf16.msra.mxu0 %v7477_v16  ;;  %v7524_v16 = vld [vmem:[%s10517_s7 + $0xabc] ss:$28 sps:$4 sm:$0xff]  }
 0x35f   :  { %5589 = vmatprep.subr.bf16.mxu1 %v7482_v20  ;;  %5753 = vmatprep.subr.bf16.mxu0 %v7485_v22  ;;  %v7527_v20 = vld [vmem:[%s10517_s7 + $0xac4] ss:$28 sps:$4 sm:$0xff]  }
 0x362   :  { %5590 = vmatpush1.bf16.msra.mxu1 %v7480_v23  ;;  %5754 = vmatpush1.bf16.msra.mxu0 %v7483_v11  ;;  %v7522_v23 = vld [vmem:[%s10517_s7 + $0xab8] ss:$28 sps:$4 sm:$0xff]   ;;  %v7525_v11 = vld [vmem:[%s10517_s7 + $0xac0] ss:$28 sps:$4 sm:$0xff]  }
 0x363   :  { %5591 = vmatprep.subr.bf16.mxu1 %v7488_v13  ;;  %5755 = vmatprep.subr.bf16.mxu0 %v7491_v17  ;;  %v7530_v13 = vld [vmem:[%s10517_s7 + $0xaf4] ss:$28 sps:$4 sm:$0xff]   ;;  %v7533_v17 = vld [vmem:[%s10517_s7 + $0xafc] ss:$28 sps:$4 sm:$0xff]  }
 0x366   :  { %5592 = vmatpush1.bf16.msra.mxu1 %v7486_v19  ;;  %5756 = vmatpush1.bf16.msra.mxu0 %v7489_v24  ;;  %v7528_v19 = vld [vmem:[%s10517_s7 + $0xaf0] ss:$28 sps:$4 sm:$0xff]   ;;  %v7531_v24 = vld [vmem:[%s10517_s7 + $0xaf8] ss:$28 sps:$4 sm:$0xff]  }
 0x367   :  { %5593 = vmatprep.subr.bf16.mxu1 %v7494_v25  ;;  %5757 = vmatprep.subr.bf16.mxu0 %v7497_v1  ;;  %v7536_v25 = vld [vmem:[%s10517_s7 + $0xb2c] ss:$28 sps:$4 sm:$0xff]   ;;  %v7539_v1 = vld [vmem:[%s10517_s7 + $0xb34] ss:$28 sps:$4 sm:$0xff]  }
 0x36a   :  { %5594 = vmatpush1.bf16.msra.mxu1 %v7492_v26  ;;  %5758 = vmatpush1.bf16.msra.mxu0 %v7495_v27  ;;  %v7534_v26 = vld [vmem:[%s10517_s7 + $0xb28] ss:$28 sps:$4 sm:$0xff]   ;;  %v7537_v27 = vld [vmem:[%s10517_s7 + $0xb30] ss:$28 sps:$4 sm:$0xff]  }
 0x36b   :  { %5595 = vmatprep.subr.bf16.mxu1 %v7500_v28  ;;  %5759 = vmatprep.subr.bf16.mxu0 %v7503_v30  ;;  %v7542_v28 = vld [vmem:[%s10517_s7 + $0xb64] ss:$28 sps:$4 sm:$0xff]   ;;  %v7545_v30 = vld [vmem:[%s10517_s7 + $0xb6c] ss:$28 sps:$4 sm:$0xff]  }
 0x36e   :  { %5596 = vmatpush1.bf16.msra.mxu1 %v7498_v34  ;;  %5760 = vmatpush1.bf16.msra.mxu0 %v7501_v36  ;;  %v7540_v34 = vld [vmem:[%s10517_s7 + $0xb60] ss:$28 sps:$4 sm:$0xff]   ;;  %v7543_v36 = vld [vmem:[%s10517_s7 + $0xb68] ss:$28 sps:$4 sm:$0xff]  }
 0x36f   :  { %v2513_v48 = vpop.f32.mrb[4].mxu1  ;;  %5597 = vmatprep.subr.bf16.mxu1 %v7506_v39  ;;  %5761 = vmatprep.subr.bf16.mxu0 %v7509_v40  ;;  %v7551_v39 = vld [vmem:[%s10517_s7 + $0xba4] ss:$28 sps:$4 sm:$0xff]   ;;  %v7546_v40 = vld [vmem:[%s10517_s7 + $0xb98] ss:$28 sps:$4 sm:$0xff]  }
 0x370   :  { %v7044_v52 = vadd.f32 %v2513_v48, %v973_v43  ;;  %v9663_v53 = vpop.f32.mrb[16].mxu0  ;;  %v2515_v54 = vpop.f32.mrb[5].mxu1  ;;  %v7549_v43 = vld [vmem:[%s10517_s7 + $0xba0] ss:$28 sps:$4 sm:$0xff]   ;;  %v7560_v48 = vld [vmem:[%s10517_s7 + $0xc0c] ss:$28 sps:$4 sm:$0xff]  }
 0x371   :  { %v7045_v57 = vadd.f32 %v2515_v54, %v977_v44  ;;  %v2597_v58 = vpop.f32.mrb[17].mxu0  ;;  %v2517_v59 = vpop.f32.mrb[6].mxu1  ;;  %v7554_v44 = vld [vmem:[%s10517_s7 + $0xbd4] ss:$28 sps:$4 sm:$0xff]   ;;  %v7566_v54 = vld [vmem:[%s10517_s7 + $0xc44] ss:$28 sps:$4 sm:$0xff]  }
 0x372   :  { %vm2606_vm10 = vcmp.gt.f32.partialorder %v7044_v52, 0.0  ;;  %v2614_v31 = vmul.f32 0.2, %v7044_v52  ;;  %v7047_v63 = vadd.f32 %v2597_v58, %v985_v45  ;;  %v2599_v0 = vpop.f32.mrb[18].mxu0  ;;  %5598 = vmatpush1.bf16.msra.mxu1 %v7504_v46  ;;  %5762 = vmatpush1.bf16.msra.mxu0 %v7507_v47  ;;  %v2518_v5 = vpop.f32.mrb[7].mxu1 }
 0x373   :  { %vm2607_vm11 = vcmp.gt.f32.partialorder %v7045_v57, 0.0  ;;  %v2615_v2 = vmul.f32 0.2, %v7045_v57  ;;  %5599 = vmatprep.subr.bf16.mxu1 %v7512_v4  ;;  %5763 = vmatprep.subr.bf16.mxu0 %v7515_v49  ;;  %v2600_v7 = vpop.f32.mrb[19].mxu0  ;;  %v7557_v45 = vld [vmem:[%s10517_s7 + $0xbdc] ss:$28 sps:$4 sm:$0xff]  }
 0x374   :  { %v2622_v3 = vsel %vm2606_vm10, %v7044_v52, %v2614_v31  ;;  %vm2609_vm12 = vcmp.gt.f32.partialorder %v7047_v63, 0.0  ;;  %v2617_v6 = vmul.f32 0.2, %v7047_v63  ;;  %v7552_v46 = vld [vmem:[%s10517_s7 + $0xbd0] ss:$28 sps:$4 sm:$0xff]  }
 0x375   :  { %v2623_v8 = vsel %vm2607_vm11, %v7045_v57, %v2615_v2  ;;  %v9685_v51 = vpack.c.bf16 %v2622_v3, %v2622_v3  ;;  %v7555_v47 = vld [vmem:[%s10517_s7 + $0xbd8] ss:$28 sps:$4 sm:$0xff]   ;;  %v7558_v49 = vld [vmem:[%s10517_s7 + $0xc08] ss:$28 sps:$4 sm:$0xff]   ;;  %v7561_v52 = vld [vmem:[%s10517_s7 + $0xc10] ss:$28 sps:$4 sm:$0xff]  }
 0x376   :  { %v9677_v9 = vpack.c.bf16 %v2623_v8, %v2623_v8  ;;  %v2625_v10 = vsel %vm2609_vm12, %v7047_v63, %v2617_v6  ;;  %5600 = vmatpush1.bf16.msra.mxu1 %v7510_v56  ;;  %5764 = vmatpush1.bf16.msra.mxu0 %v7513_v60  ;;  %v7563_v4 = vld [vmem:[%s10517_s7 + $0xc14] ss:$28 sps:$4 sm:$0xff]   ;;  %v7569_v56 = vld [vmem:[%s10517_s7 + $0xc4c] ss:$28 sps:$4 sm:$0xff]   ;;  %v7564_v57 = vld [vmem:[%s10517_s7 + $0xc40] ss:$28 sps:$4 sm:$0xff]  }
 0x377   :  { %5610 = vmatprep.subr.bf16.mxu1 %v7518_v62  ;;  %5774 = vmatprep.subr.bf16.mxu0 %v7521_v29  ;;  %v9695_v22 = vpack.c.bf16 %v2625_v10, %v2625_v10  ;;  %v7567_v58 = vld [vmem:[%s10517_s7 + $0xc48] ss:$28 sps:$4 sm:$0xff]   ;;  %v7572_v59 = vld [vmem:[%s10517_s7 + $0xc7c] ss:$28 sps:$4 sm:$0xff]   ;;  %v7578_v63 = vld [vmem:[%s10517_s7 + $0xcb4] ss:$28 sps:$4 sm:$0xff]  }
 0x378   :  { %5601 = vmatprep.mubr.bf16.mxu1 %v9677_v9  ;;  %5765 = vmatprep.mubr.bf16.mxu0 %v9677_v9  ;;  %v7575_v60 = vld [vmem:[%s10517_s7 + $0xc84] ss:$28 sps:$4 sm:$0xff]   ;;  %v7570_v62 = vld [vmem:[%s10517_s7 + $0xc78] ss:$28 sps:$4 sm:$0xff]   ;;  %v7576_v5 = vld [vmem:[%s10517_s7 + $0xcb0] ss:$28 sps:$4 sm:$0xff]  }
 0x379   :  { %5602 = vmatmul.mubr.bf16.vlgmr.msra.gmra.mrb[8].mxu1 %v9685_v51  ;;  %5766 = vmatmul.mubr.bf16.vlgmr.msra.gmra.mrb[20].mxu0 %v9685_v51  ;;  %v7573_v31 = vld [vmem:[%s10517_s7 + $0xc80] ss:$28 sps:$4 sm:$0xff]   ;;  %v7579_v2 = vld [vmem:[%s10517_s7 + $0xcb8] ss:$28 sps:$4 sm:$0xff]   ;;  %v7584_v29 = vld [vmem:[%s10517_s7 + $0xcec] ss:$28 sps:$4 sm:$0xff]  }
 0x37a   :  { %5611 = vmatpush1.bf16.msra.mxu1 %v7516_v14  ;;  %5775 = vmatpush1.bf16.msra.mxu0 %v7519_v15  ;;  %v7581_v0 = vld [vmem:[%s10517_s7 + $0xcbc] ss:$28 sps:$4 sm:$0xff]   ;;  %v7587_v3 = vld [vmem:[%s10517_s7 + $0xcf4] ss:$28 sps:$4 sm:$0xff]   ;;  %v7582_v6 = vld [vmem:[%s10517_s7 + $0xce8] ss:$28 sps:$4 sm:$0xff]  }
 0x37b   :  { %5642 = vmatprep.mubr.bf16.mxu1 %v9695_v22  ;;  %5806 = vmatprep.mubr.bf16.mxu0 %v9695_v22  ;;  %v7585_v7 = vld [vmem:[%s10517_s7 + $0xcf0] ss:$28 sps:$4 sm:$0xff]   ;;  %v7590_v8 = vld [vmem:[%s10517_s7 + $0xd24] ss:$28 sps:$4 sm:$0xff]   ;;  %v980_v14 = vsub.s32 6, %v8180_v35 }
 0x37c   :  { %5612 = vmatprep.subr.bf16.mxu1 %v7524_v16  ;;  %5776 = vmatprep.subr.bf16.mxu0 %v7527_v20  ;;  %v7593_v10 = vld [vmem:[%s10517_s7 + $0xd2c] ss:$28 sps:$4 sm:$0xff]   ;;  %v7588_v15 = vld [vmem:[%s10517_s7 + $0xd20] ss:$28 sps:$4 sm:$0xff]  }
 0x37d   :  { %v7591_v16 = vld [vmem:[%s10517_s7 + $0xd28] ss:$28 sps:$4 sm:$0xff]   ;;  %v7596_v20 = vld [vmem:[%s10517_s7 + $0xd5c] ss:$28 sps:$4 sm:$0xff]  }
 0x37e   :  { %5613 = vmatpush1.bf16.msra.mxu1 %v7522_v23  ;;  %5777 = vmatpush1.bf16.msra.mxu0 %v7525_v11  ;;  %v7599_v23 = vld [vmem:[%s10517_s7 + $0xd64] ss:$28 sps:$4 sm:$0xff]   ;;  %v981_v11 = vrot.slane %v9252_v61, %v980_v14  ;;  %v7605_v61 = vld [vmem:[%s10517_s7 + $0xd9c] ss:$28 sps:$4 sm:$0xff]  }
 0x37f   :  { %5614 = vmatprep.subr.bf16.mxu1 %v7530_v13  ;;  %5778 = vmatprep.subr.bf16.mxu0 %v7533_v17  ;;  %v7594_v13 = vld [vmem:[%s10517_s7 + $0xd58] ss:$28 sps:$4 sm:$0xff]   ;;  %v7597_v17 = vld [vmem:[%s10517_s7 + $0xd60] ss:$28 sps:$4 sm:$0xff]  }
 0x382   :  { %5615 = vmatpush1.bf16.msra.mxu1 %v7528_v19  ;;  %5779 = vmatpush1.bf16.msra.mxu0 %v7531_v24  ;;  %v7602_v19 = vld [vmem:[%s10517_s7 + $0xd94] ss:$28 sps:$4 sm:$0xff]   ;;  %v7046_v24 = vadd.f32 %v9663_v53, %v981_v11 }
 0x383   :  { %5616 = vmatprep.subr.bf16.mxu1 %v7536_v25  ;;  %5780 = vmatprep.subr.bf16.mxu0 %v7539_v1  ;;  %v7600_v25 = vld [vmem:[%s10517_s7 + $0xd90] ss:$28 sps:$4 sm:$0xff]   ;;  %v7603_v1 = vld [vmem:[%s10517_s7 + $0xd98] ss:$28 sps:$4 sm:$0xff]  }
 0x384   :  { %v7611_v53 = vld [vmem:[%s10517_s7 + $0xdd4] ss:$28 sps:$4 sm:$0xff]   ;;  %vm2608_vm13 = vcmp.gt.f32.partialorder %v7046_v24, 0.0 }
 0x385   :  { %v7656_v11 = vld [vmem:[%s10517_s7 + $0x398] ss:$28 sps:$4 sm:$0xff]  }
 0x386   :  { %5617 = vmatpush1.bf16.msra.mxu1 %v7534_v26  ;;  %5781 = vmatpush1.bf16.msra.mxu0 %v7537_v27  ;;  %v7608_v26 = vld [vmem:[%s10517_s7 + $0xdcc] ss:$28 sps:$4 sm:$0xff]   ;;  %v2616_v27 = vmul.f32 0.2, %v7046_v24 }
 0x387   :  { %5618 = vmatprep.subr.bf16.mxu1 %v7542_v28  ;;  %5782 = vmatprep.subr.bf16.mxu0 %v7545_v30  ;;  %v7606_v28 = vld [vmem:[%s10517_s7 + $0xdc8] ss:$28 sps:$4 sm:$0xff]   ;;  %v7609_v30 = vld [vmem:[%s10517_s7 + $0xdd0] ss:$28 sps:$4 sm:$0xff]  }
 0x38a   :  { %5619 = vmatpush1.bf16.msra.mxu1 %v7540_v34  ;;  %5783 = vmatpush1.bf16.msra.mxu0 %v7543_v36  ;;  %v7614_v34 = vld [vmem:[%s10517_s7 + $0x14] ss:$28 sps:$4 sm:$0xff]  }
 0x38b   :  { %5620 = vmatprep.subr.bf16.mxu1 %v7548_v38  ;;  %5784 = vmatprep.subr.bf16.mxu0 %v7551_v39  ;;  %v7615_v36 = vld [vmem:[%s10517_s7 + $0x1d8] ss:$28 sps:$4 sm:$0xff]   ;;  %v2624_v38 = vsel %vm2608_vm13, %v7046_v24, %v2616_v27  ;;  %v7612_v39 = vld [vmem:[%s10517_s7 + $0x10] ss:$28 sps:$4 sm:$0xff]   ;;  %v7664_v24 = vld [vmem:[%s10517_s7 + $0x244] ss:$28 sps:$4 sm:$0xff]  }
 0x38c   :  { %v7670_v27 = vld [vmem:[%s10517_s7 + $0x600] ss:$28 sps:$4 sm:$0xff]  }
 0x38e   :  { %5621 = vmatpush1.bf16.msra.mxu1 %v7546_v40  ;;  %5785 = vmatpush1.bf16.msra.mxu0 %v7549_v43  ;;  %v9889_v40 = vpack.c.bf16 %v2624_v38, %v2624_v38  ;;  %v7616_v43 = vld [vmem:[%s10517_s7 + $0x18] ss:$28 sps:$4 sm:$0xff]   ;;  %v7672_v38 = vld [vmem:[%s10517_s7 + $0x2b0] ss:$28 sps:$4 sm:$0xff]  }
 0x38f   :  { %5622 = vmatprep.subr.bf16.mxu1 %v7554_v44  ;;  %5786 = vmatprep.subr.bf16.mxu0 %v7557_v45  ;;  %v7619_v44 = vld [vmem:[%s10517_s7 + $0x4c] ss:$28 sps:$4 sm:$0xff]  }
 0x390   :  { %v7620_v45 = vld [vmem:[%s10517_s7 + $0x210] ss:$28 sps:$4 sm:$0xff]  }
 0x392   :  { %5623 = vmatpush1.bf16.msra.mxu1 %v7552_v46  ;;  %5787 = vmatpush1.bf16.msra.mxu0 %v7555_v47  ;;  %v7617_v46 = vld [vmem:[%s10517_s7 + $0x48] ss:$28 sps:$4 sm:$0xff]   ;;  %v7621_v47 = vld [vmem:[%s10517_s7 + $0x50] ss:$28 sps:$4 sm:$0xff]  }
 0x393   :  { %5624 = vmatprep.subr.bf16.mxu1 %v7560_v48  ;;  %5788 = vmatprep.subr.bf16.mxu0 %v7563_v4  ;;  %v7624_v48 = vld [vmem:[%s10517_s7 + $0x84] ss:$28 sps:$4 sm:$0xff]  }
 0x394   :  { %v7625_v4 = vld [vmem:[%s10517_s7 + $0x248] ss:$28 sps:$4 sm:$0xff]  }
 0x396   :  { %5625 = vmatpush1.bf16.msra.mxu1 %v7558_v49  ;;  %5789 = vmatpush1.bf16.msra.mxu0 %v7561_v52  ;;  %v7622_v49 = vld [vmem:[%s10517_s7 + $0x80] ss:$28 sps:$4 sm:$0xff]  }
 0x397   :  { %5626 = vmatprep.subr.bf16.mxu1 %v7566_v54  ;;  %5790 = vmatprep.subr.bf16.mxu0 %v7569_v56  ;;  %v7629_v52 = vld [vmem:[%s10517_s7 + $0xbc] ss:$28 sps:$4 sm:$0xff]  }
 0x398   :  { %v7630_v54 = vld [vmem:[%s10517_s7 + $0x280] ss:$28 sps:$4 sm:$0xff]   ;;  %v7627_v56 = vld [vmem:[%s10517_s7 + $0xb8] ss:$28 sps:$4 sm:$0xff]  }
 0x39a   :  { %5627 = vmatpush1.bf16.msra.mxu1 %v7564_v57  ;;  %5791 = vmatpush1.bf16.msra.mxu0 %v7567_v58  ;;  %v7631_v57 = vld [vmem:[%s10517_s7 + $0xc0] ss:$28 sps:$4 sm:$0xff]   ;;  %v7634_v58 = vld [vmem:[%s10517_s7 + $0xf4] ss:$28 sps:$4 sm:$0xff]  }
 0x39b   :  { %5628 = vmatprep.subr.bf16.mxu1 %v7572_v59  ;;  %5792 = vmatprep.subr.bf16.mxu0 %v7575_v60  ;;  %v7635_v59 = vld [vmem:[%s10517_s7 + $0x2b8] ss:$28 sps:$4 sm:$0xff]   ;;  %v7632_v60 = vld [vmem:[%s10517_s7 + $0xf0] ss:$28 sps:$4 sm:$0xff]  }
 0x39e   :  { %5629 = vmatpush1.bf16.msra.mxu1 %v7570_v62  ;;  %5793 = vmatpush1.bf16.msra.mxu0 %v7573_v31  ;;  %v7636_v62 = vld [vmem:[%s10517_s7 + $0xf8] ss:$28 sps:$4 sm:$0xff]   ;;  %v7639_v31 = vld [vmem:[%s10517_s7 + $0x12c] ss:$28 sps:$4 sm:$0xff]  }
 0x39f   :  { %5630 = vmatprep.subr.bf16.mxu1 %v7578_v63  ;;  %5794 = vmatprep.subr.bf16.mxu0 %v7581_v0  ;;  %v7640_v63 = vld [vmem:[%s10517_s7 + $0x2f0] ss:$28 sps:$4 sm:$0xff]   ;;  %v7637_v0 = vld [vmem:[%s10517_s7 + $0x128] ss:$28 sps:$4 sm:$0xff]  }
 0x3a2   :  { %5631 = vmatpush1.bf16.msra.mxu1 %v7576_v5  ;;  %5795 = vmatpush1.bf16.msra.mxu0 %v7579_v2  ;;  %v7641_v5 = vld [vmem:[%s10517_s7 + $0x130] ss:$28 sps:$4 sm:$0xff]   ;;  %v7644_v2 = vld [vmem:[%s10517_s7 + $0x164] ss:$28 sps:$4 sm:$0xff]  }
 0x3a3   :  { %5632 = vmatprep.subr.bf16.mxu1 %v7584_v29  ;;  %5796 = vmatprep.subr.bf16.mxu0 %v7587_v3  ;;  %v7645_v29 = vld [vmem:[%s10517_s7 + $0x328] ss:$28 sps:$4 sm:$0xff]   ;;  %v7642_v3 = vld [vmem:[%s10517_s7 + $0x160] ss:$28 sps:$4 sm:$0xff]  }
 0x3a6   :  { %5633 = vmatpush1.bf16.msra.mxu1 %v7582_v6  ;;  %5797 = vmatpush1.bf16.msra.mxu0 %v7585_v7  ;;  %v7646_v6 = vld [vmem:[%s10517_s7 + $0x168] ss:$28 sps:$4 sm:$0xff]   ;;  %v7649_v7 = vld [vmem:[%s10517_s7 + $0x19c] ss:$28 sps:$4 sm:$0xff]  }
 0x3a7   :  { %5634 = vmatprep.subr.bf16.mxu1 %v7590_v8  ;;  %5798 = vmatprep.subr.bf16.mxu0 %v7593_v10  ;;  %v7650_v8 = vld [vmem:[%s10517_s7 + $0x360] ss:$28 sps:$4 sm:$0xff]   ;;  %v7647_v10 = vld [vmem:[%s10517_s7 + $0x198] ss:$28 sps:$4 sm:$0xff]  }
 0x3aa   :  { %5635 = vmatpush1.bf16.msra.mxu1 %v7588_v15  ;;  %5799 = vmatpush1.bf16.msra.mxu0 %v7591_v16  ;;  %v7651_v15 = vld [vmem:[%s10517_s7 + $0x1a0] ss:$28 sps:$4 sm:$0xff]   ;;  %v7654_v16 = vld [vmem:[%s10517_s7 + $0x1d4] ss:$28 sps:$4 sm:$0xff]  }
 0x3ab   :  { %5636 = vmatprep.subr.bf16.mxu1 %v7596_v20  ;;  %5800 = vmatprep.subr.bf16.mxu0 %v7599_v23  ;;  %v7655_v20 = vld [vmem:[%s10517_s7 + $0x558] ss:$28 sps:$4 sm:$0xff]   ;;  %v7652_v23 = vld [vmem:[%s10517_s7 + $0x1d0] ss:$28 sps:$4 sm:$0xff]  }
 0x3ae   :  { %5637 = vmatpush1.bf16.msra.mxu1 %v7594_v13  ;;  %5801 = vmatpush1.bf16.msra.mxu0 %v7597_v17  ;;  %v7659_v13 = vld [vmem:[%s10517_s7 + $0x20c] ss:$28 sps:$4 sm:$0xff]  }
 0x3af   :  { %5638 = vmatprep.subr.bf16.mxu1 %v7602_v19  ;;  %5802 = vmatprep.subr.bf16.mxu0 %v7605_v61  ;;  %v7660_v17 = vld [vmem:[%s10517_s7 + $0x590] ss:$28 sps:$4 sm:$0xff]   ;;  %v7657_v19 = vld [vmem:[%s10517_s7 + $0x208] ss:$28 sps:$4 sm:$0xff]  }
 0x3b0   :  { %v7661_v61 = vld [vmem:[%s10517_s7 + $0x3d0] ss:$28 sps:$4 sm:$0xff]  }
 0x3b2   :  { %5639 = vmatpush1.bf16.msra.mxu1 %v7600_v25  ;;  %5803 = vmatpush1.bf16.msra.mxu0 %v7603_v1  ;;  %v7665_v25 = vld [vmem:[%s10517_s7 + $0x5c8] ss:$28 sps:$4 sm:$0xff]   ;;  %v7662_v1 = vld [vmem:[%s10517_s7 + $0x240] ss:$28 sps:$4 sm:$0xff]  }
 0x3b3   :  { %5640 = vmatprep.subr.bf16.mxu1 %v7608_v26  ;;  %5804 = vmatprep.subr.bf16.mxu0 %v7611_v53  ;;  %v7666_v26 = vld [vmem:[%s10517_s7 + $0x408] ss:$28 sps:$4 sm:$0xff]   ;;  %v7669_v53 = vld [vmem:[%s10517_s7 + $0x27c] ss:$28 sps:$4 sm:$0xff]  }
 0x3b6   :  { %5641 = vmatpush1.bf16.msra.mxu1 %v7606_v28  ;;  %5805 = vmatpush1.bf16.msra.mxu0 %v7609_v30  ;;  %v7667_v28 = vld [vmem:[%s10517_s7 + $0x278] ss:$28 sps:$4 sm:$0xff]   ;;  %v7671_v30 = vld [vmem:[%s10517_s7 + $0x440] ss:$28 sps:$4 sm:$0xff]  }
 0x3b7   :  { %5815 = vmatprep.subr.bf16.mxu1 %v7614_v34  ;;  %6952 = vmatprep.subr.bf16.mxu0 %v7615_v36  ;;  %v7674_v34 = vld [vmem:[%s10517_s7 + $0x2b4] ss:$28 sps:$4 sm:$0xff]  }
 0x3b8   :  { %v7675_v36 = vld [vmem:[%s10517_s7 + $0x638] ss:$28 sps:$4 sm:$0xff]  }
 0x3b9   :  { %5643 = vmatmul.mubr.bf16.vlgmr.msra.gmra.mrb[8].mxu1 %v9889_v40  ;;  %5807 = vmatmul.mubr.bf16.vlgmr.msra.gmra.mrb[20].mxu0 %v9889_v40 }
 0x3ba   :  { %5816 = vmatpush1.bf16.msra.mxu1 %v7612_v39  ;;  %5847 = vmatprep.mubr.bf16.mxu1 %v9262_v21  ;;  %v7676_v39 = vld [vmem:[%s10517_s7 + $0x478] ss:$28 sps:$4 sm:$0xff]  }
 0x3bb   :  { %6953 = vmatpush3.bf16.msra.mxu0 %v7616_v43  ;;  %6011 = vmatprep.mubr.bf16.mxu0 %v9262_v21  ;;  %v7626_v21 = vld [vmem:[%s10517_s7 + $0x88] ss:$28 sps:$4 sm:$0xff]  }
 0x3bc   :  { %5817 = vmatprep.subr.bf16.mxu1 %v7619_v44  ;;  %6954 = vmatprep.subr.bf16.mxu0 %v7620_v45  ;;  %v7679_v43 = vld [vmem:[%s10517_s7 + $0x2ec] ss:$28 sps:$4 sm:$0xff]  }
 0x3bd   :  { %v7680_v44 = vld [vmem:[%s10517_s7 + $0x670] ss:$28 sps:$4 sm:$0xff]   ;;  %v7677_v45 = vld [vmem:[%s10517_s7 + $0x2e8] ss:$28 sps:$4 sm:$0xff]  }
 0x3be   :  { %5818 = vmatpush1.bf16.msra.mxu1 %v7617_v46  ;;  %v7681_v46 = vld [vmem:[%s10517_s7 + $0x4b0] ss:$28 sps:$4 sm:$0xff]  }
 0x3bf   :  { %6955 = vmatpush3.bf16.msra.mxu0 %v7621_v47  ;;  %5819 = vmatprep.subr.bf16.mxu1 %v7624_v48  ;;  %v7684_v47 = vld [vmem:[%s10517_s7 + $0x324] ss:$28 sps:$4 sm:$0xff]  }
 0x3c0   :  { %6956 = vmatprep.subr.bf16.mxu0 %v7625_v4  ;;  %v7685_v48 = vld [vmem:[%s10517_s7 + $0x6a8] ss:$28 sps:$4 sm:$0xff]   ;;  %v7682_v4 = vld [vmem:[%s10517_s7 + $0x320] ss:$28 sps:$4 sm:$0xff]  }
 0x3c2   :  { %5820 = vmatpush1.bf16.msra.mxu1 %v7622_v49  ;;  %v7686_v49 = vld [vmem:[%s10517_s7 + $0x4e8] ss:$28 sps:$4 sm:$0xff]  }
 0x3c3   :  { %6957 = vmatpush3.bf16.msra.mxu0 %v7626_v21  ;;  %5821 = vmatprep.subr.bf16.mxu1 %v7629_v52  ;;  %v7689_v21 = vld [vmem:[%s10517_s7 + $0x35c] ss:$28 sps:$4 sm:$0xff]  }
 0x3c4   :  { %6958 = vmatprep.subr.bf16.mxu0 %v7630_v54  ;;  %v7690_v52 = vld [vmem:[%s10517_s7 + $0x6e0] ss:$28 sps:$4 sm:$0xff]   ;;  %v7687_v54 = vld [vmem:[%s10517_s7 + $0x358] ss:$28 sps:$4 sm:$0xff]  }
 0x3c6   :  { %5822 = vmatpush1.bf16.msra.mxu1 %v7627_v56  ;;  %v7691_v56 = vld [vmem:[%s10517_s7 + $0x520] ss:$28 sps:$4 sm:$0xff]  }
 0x3c7   :  { %6959 = vmatpush3.bf16.msra.mxu0 %v7631_v57  ;;  %5823 = vmatprep.subr.bf16.mxu1 %v7634_v58  ;;  %v7694_v57 = vld [vmem:[%s10517_s7 + $0x394] ss:$28 sps:$4 sm:$0xff]  }
 0x3c8   :  { %6960 = vmatprep.subr.bf16.mxu0 %v7635_v59  ;;  %v7695_v58 = vld [vmem:[%s10517_s7 + $0x8d8] ss:$28 sps:$4 sm:$0xff]   ;;  %v7692_v59 = vld [vmem:[%s10517_s7 + $0x390] ss:$28 sps:$4 sm:$0xff]  }
 0x3ca   :  { %5824 = vmatpush1.bf16.msra.mxu1 %v7632_v60  ;;  %v7696_v60 = vld [vmem:[%s10517_s7 + $0x718] ss:$28 sps:$4 sm:$0xff]  }
 0x3cb   :  { %6961 = vmatpush3.bf16.msra.mxu0 %v7636_v62  ;;  %5825 = vmatprep.subr.bf16.mxu1 %v7639_v31  ;;  %v7699_v62 = vld [vmem:[%s10517_s7 + $0x3cc] ss:$28 sps:$4 sm:$0xff]  }
 0x3cc   :  { %6962 = vmatprep.subr.bf16.mxu0 %v7640_v63  ;;  %v7700_v31 = vld [vmem:[%s10517_s7 + $0x910] ss:$28 sps:$4 sm:$0xff]   ;;  %v7697_v63 = vld [vmem:[%s10517_s7 + $0x3c8] ss:$28 sps:$4 sm:$0xff]  }
 0x3ce   :  { %5826 = vmatpush1.bf16.msra.mxu1 %v7637_v0  ;;  %v7701_v0 = vld [vmem:[%s10517_s7 + $0x750] ss:$28 sps:$4 sm:$0xff]  }
 0x3cf   :  { %6963 = vmatpush3.bf16.msra.mxu0 %v7641_v5  ;;  %5827 = vmatprep.subr.bf16.mxu1 %v7644_v2  ;;  %v7705_v5 = vld [vmem:[%s10517_s7 + $0x948] ss:$28 sps:$4 sm:$0xff]  }
 0x3d0   :  { %6964 = vmatprep.subr.bf16.mxu0 %v7645_v29  ;;  %v7706_v2 = vld [vmem:[%s10517_s7 + $0x788] ss:$28 sps:$4 sm:$0xff]   ;;  %v7709_v29 = vld [vmem:[%s10517_s7 + $0x43c] ss:$28 sps:$4 sm:$0xff]  }
 0x3d2   :  { %5828 = vmatpush1.bf16.msra.mxu1 %v7642_v3  ;;  %v7710_v3 = vld [vmem:[%s10517_s7 + $0x980] ss:$28 sps:$4 sm:$0xff]  }
 0x3d3   :  { %6965 = vmatpush3.bf16.msra.mxu0 %v7646_v6  ;;  %5829 = vmatprep.subr.bf16.mxu1 %v7649_v7  ;;  %v7707_v6 = vld [vmem:[%s10517_s7 + $0x438] ss:$28 sps:$4 sm:$0xff]   ;;  %v7711_v7 = vld [vmem:[%s10517_s7 + $0x7c0] ss:$28 sps:$4 sm:$0xff]  }
 0x3d4   :  { %6966 = vmatprep.subr.bf16.mxu0 %v7650_v8  ;;  %v7714_v8 = vld [vmem:[%s10517_s7 + $0x474] ss:$28 sps:$4 sm:$0xff]  }
 0x3d6   :  { %5830 = vmatpush1.bf16.msra.mxu1 %v7647_v10  ;;  %v7715_v10 = vld [vmem:[%s10517_s7 + $0x9b8] ss:$28 sps:$4 sm:$0xff]  }
 0x3d7   :  { %6967 = vmatpush3.bf16.msra.mxu0 %v7651_v15  ;;  %5831 = vmatprep.subr.bf16.mxu1 %v7654_v16  ;;  %v7712_v15 = vld [vmem:[%s10517_s7 + $0x470] ss:$28 sps:$4 sm:$0xff]   ;;  %v7716_v16 = vld [vmem:[%s10517_s7 + $0x7f8] ss:$28 sps:$4 sm:$0xff]  }
 0x3d8   :  { %6974 = vmatprep.subr.bf16.mxu0 %v7655_v20  ;;  %v7719_v20 = vld [vmem:[%s10517_s7 + $0x4ac] ss:$28 sps:$4 sm:$0xff]  }
 0x3da   :  { %6012 = vmatmul.mubr.bf16.vlgmr.msra.gmra.mrb[24].mxu0 %v9270_v12  ;;  %5832 = vmatpush1.bf16.msra.mxu1 %v7652_v23  ;;  %v7720_v23 = vld [vmem:[%s10517_s7 + $0x9f0] ss:$28 sps:$4 sm:$0xff]  }
 0x3db   :  { %6975 = vmatpush3.bf16.msra.mxu0 %v7656_v11  ;;  %6051 = vmatprep.mubr.bf16.mxu0 %v9280_v18  ;;  %v7717_v11 = vld [vmem:[%s10517_s7 + $0x4a8] ss:$28 sps:$4 sm:$0xff]  }
 0x3dc   :  { %5833 = vmatprep.subr.bf16.mxu1 %v7659_v13  ;;  %6976 = vmatprep.subr.bf16.mxu0 %v7660_v17  ;;  %v7721_v13 = vld [vmem:[%s10517_s7 + $0x830] ss:$28 sps:$4 sm:$0xff]   ;;  %v7724_v17 = vld [vmem:[%s10517_s7 + $0x4e4] ss:$28 sps:$4 sm:$0xff]  }
 0x3de   :  { %5834 = vmatpush1.bf16.msra.mxu1 %v7657_v19  ;;  %v7725_v19 = vld [vmem:[%s10517_s7 + $0xa28] ss:$28 sps:$4 sm:$0xff]  }
 0x3df   :  { %6977 = vmatpush3.bf16.msra.mxu0 %v7661_v61  ;;  %5835 = vmatprep.subr.bf16.mxu1 %v7664_v24  ;;  %v7722_v61 = vld [vmem:[%s10517_s7 + $0x4e0] ss:$28 sps:$4 sm:$0xff]   ;;  %v7726_v24 = vld [vmem:[%s10517_s7 + $0x868] ss:$28 sps:$4 sm:$0xff]  }
 0x3e0   :  { %6978 = vmatprep.subr.bf16.mxu0 %v7665_v25  ;;  %v7729_v25 = vld [vmem:[%s10517_s7 + $0x51c] ss:$28 sps:$4 sm:$0xff]  }
 0x3e2   :  { %5836 = vmatpush1.bf16.msra.mxu1 %v7662_v1  ;;  %v7730_v1 = vld [vmem:[%s10517_s7 + $0xa60] ss:$28 sps:$4 sm:$0xff]  }
 0x3e3   :  { %6979 = vmatpush3.bf16.msra.mxu0 %v7666_v26  ;;  %5837 = vmatprep.subr.bf16.mxu1 %v7669_v53  ;;  %v7727_v26 = vld [vmem:[%s10517_s7 + $0x518] ss:$28 sps:$4 sm:$0xff]   ;;  %v7731_v53 = vld [vmem:[%s10517_s7 + $0x8a0] ss:$28 sps:$4 sm:$0xff]  }
 0x3e4   :  { %6980 = vmatprep.subr.bf16.mxu0 %v7670_v27  ;;  %v7734_v27 = vld [vmem:[%s10517_s7 + $0x554] ss:$28 sps:$4 sm:$0xff]  }
 0x3e6   :  { %5838 = vmatpush1.bf16.msra.mxu1 %v7667_v28  ;;  %v7735_v28 = vld [vmem:[%s10517_s7 + $0xc58] ss:$28 sps:$4 sm:$0xff]  }
 0x3e7   :  { %6981 = vmatpush3.bf16.msra.mxu0 %v7671_v30  ;;  %5839 = vmatprep.subr.bf16.mxu1 %v7674_v34  ;;  %v7732_v30 = vld [vmem:[%s10517_s7 + $0x550] ss:$28 sps:$4 sm:$0xff]   ;;  %v7736_v34 = vld [vmem:[%s10517_s7 + $0xa98] ss:$28 sps:$4 sm:$0xff]  }
 0x3e8   :  { %6982 = vmatprep.subr.bf16.mxu0 %v7675_v36  ;;  %v7739_v36 = vld [vmem:[%s10517_s7 + $0x58c] ss:$28 sps:$4 sm:$0xff]  }
 0x3ea   :  { %5840 = vmatpush1.bf16.msra.mxu1 %v7672_v38  ;;  %v7740_v38 = vld [vmem:[%s10517_s7 + $0xc90] ss:$28 sps:$4 sm:$0xff]  }
 0x3eb   :  { %6983 = vmatpush3.bf16.msra.mxu0 %v7676_v39  ;;  %5841 = vmatprep.subr.bf16.mxu1 %v7679_v43  ;;  %v7737_v39 = vld [vmem:[%s10517_s7 + $0x588] ss:$28 sps:$4 sm:$0xff]   ;;  %v7741_v43 = vld [vmem:[%s10517_s7 + $0xad0] ss:$28 sps:$4 sm:$0xff]  }
 0x3ec   :  { %6984 = vmatprep.subr.bf16.mxu0 %v7680_v44  ;;  %v7744_v44 = vld [vmem:[%s10517_s7 + $0x5c4] ss:$28 sps:$4 sm:$0xff]  }
 0x3ee   :  { %5842 = vmatpush1.bf16.msra.mxu1 %v7677_v45  ;;  %v7745_v45 = vld [vmem:[%s10517_s7 + $0xcc8] ss:$28 sps:$4 sm:$0xff]  }
 0x3ef   :  { %6985 = vmatpush3.bf16.msra.mxu0 %v7681_v46  ;;  %5843 = vmatprep.subr.bf16.mxu1 %v7684_v47  ;;  %v7742_v46 = vld [vmem:[%s10517_s7 + $0x5c0] ss:$28 sps:$4 sm:$0xff]   ;;  %v7746_v47 = vld [vmem:[%s10517_s7 + $0xb08] ss:$28 sps:$4 sm:$0xff]  }
 0x3f0   :  { %6986 = vmatprep.subr.bf16.mxu0 %v7685_v48  ;;  %v7749_v48 = vld [vmem:[%s10517_s7 + $0x5fc] ss:$28 sps:$4 sm:$0xff]  }
 0x3f2   :  { %5844 = vmatpush1.bf16.msra.mxu1 %v7682_v4  ;;  %v7750_v4 = vld [vmem:[%s10517_s7 + $0xd00] ss:$28 sps:$4 sm:$0xff]  }
 0x3f3   :  { %6987 = vmatpush3.bf16.msra.mxu0 %v7686_v49  ;;  %5845 = vmatprep.subr.bf16.mxu1 %v7689_v21  ;;  %v7747_v49 = vld [vmem:[%s10517_s7 + $0x5f8] ss:$28 sps:$4 sm:$0xff]   ;;  %v7751_v21 = vld [vmem:[%s10517_s7 + $0xb40] ss:$28 sps:$4 sm:$0xff]  }
 0x3f4   :  { %6988 = vmatprep.subr.bf16.mxu0 %v7690_v52  ;;  %v7754_v52 = vld [vmem:[%s10517_s7 + $0x634] ss:$28 sps:$4 sm:$0xff]  }
 0x3f6   :  { %5846 = vmatpush1.bf16.msra.mxu1 %v7687_v54  ;;  %v7755_v54 = vld [vmem:[%s10517_s7 + $0xd38] ss:$28 sps:$4 sm:$0xff]  }
 0x3f7   :  { %6989 = vmatpush3.bf16.msra.mxu0 %v7691_v56  ;;  %5856 = vmatprep.subr.bf16.mxu1 %v7694_v57  ;;  %v7752_v56 = vld [vmem:[%s10517_s7 + $0x630] ss:$28 sps:$4 sm:$0xff]   ;;  %v7756_v57 = vld [vmem:[%s10517_s7 + $0xb78] ss:$28 sps:$4 sm:$0xff]  }
 0x3f8   :  { %6996 = vmatprep.subr.bf16.mxu0 %v7695_v58  ;;  %v7759_v58 = vld [vmem:[%s10517_s7 + $0x66c] ss:$28 sps:$4 sm:$0xff]  }
 0x3f9   :  { %5848 = vmatmul.mubr.bf16.vlgmr.msra.gmra.mrb[12].mxu1 %v9270_v12  ;;  %v7704_v12 = vld [vmem:[%s10517_s7 + $0x404] ss:$28 sps:$4 sm:$0xff]  }
 0x3fa   :  { %6052 = vmatmul.mubr.bf16.vlgmr.msra.gmra.mrb[28].mxu0 %v9475_v37  ;;  %5857 = vmatpush1.bf16.msra.mxu1 %v7692_v59  ;;  %v7760_v59 = vld [vmem:[%s10517_s7 + $0xd70] ss:$28 sps:$4 sm:$0xff]  }
 0x3fb   :  { %5888 = vmatprep.mubr.bf16.mxu1 %v9280_v18  ;;  %6997 = vmatpush3.bf16.msra.mxu0 %v7696_v60  ;;  %v7702_v18 = vld [vmem:[%s10517_s7 + $0x400] ss:$28 sps:$4 sm:$0xff]   ;;  %v7757_v60 = vld [vmem:[%s10517_s7 + $0x668] ss:$28 sps:$4 sm:$0xff]  }
 0x3fc   :  { %6091 = vmatprep.mubr.bf16.mxu0 %v9677_v9  ;;  %5858 = vmatprep.subr.bf16.mxu1 %v7699_v62  ;;  %v7761_v62 = vld [vmem:[%s10517_s7 + $0xbb0] ss:$28 sps:$4 sm:$0xff]  }
 0x3fd   :  { %6998 = vmatprep.subr.bf16.mxu0 %v7700_v31  ;;  %v7764_v31 = vld [vmem:[%s10517_s7 + $0x6a4] ss:$28 sps:$4 sm:$0xff]  }
 0x3fe   :  { %5859 = vmatpush1.bf16.msra.mxu1 %v7697_v63  ;;  %v7765_v63 = vld [vmem:[%s10517_s7 + $0xda8] ss:$28 sps:$4 sm:$0xff]  }
 0x3ff   :  { %6999 = vmatpush3.bf16.msra.mxu0 %v7701_v0  ;;  %5860 = vmatprep.subr.bf16.mxu1 %v7704_v12  ;;  %v7762_v0 = vld [vmem:[%s10517_s7 + $0x6a0] ss:$28 sps:$4 sm:$0xff]   ;;  %v7766_v12 = vld [vmem:[%s10517_s7 + $0xbe8] ss:$28 sps:$4 sm:$0xff]  }
 0x400   :  { %7000 = vmatprep.subr.bf16.mxu0 %v7705_v5  ;;  %v7769_v5 = vld [vmem:[%s10517_s7 + $0x6dc] ss:$28 sps:$4 sm:$0xff]  }
 0x402   :  { %5861 = vmatpush1.bf16.msra.mxu1 %v7702_v18  ;;  %v7770_v18 = vld [vmem:[%s10517_s7 + $0xde0] ss:$28 sps:$4 sm:$0xff]  }
 0x403   :  { %7001 = vmatpush3.bf16.msra.mxu0 %v7706_v2  ;;  %5862 = vmatprep.subr.bf16.mxu1 %v7709_v29  ;;  %v7767_v2 = vld [vmem:[%s10517_s7 + $0x6d8] ss:$28 sps:$4 sm:$0xff]   ;;  %v7771_v29 = vld [vmem:[%s10517_s7 + $0xc20] ss:$28 sps:$4 sm:$0xff]  }
 0x404   :  { %7002 = vmatprep.subr.bf16.mxu0 %v7710_v3  ;;  %v7774_v3 = vld [vmem:[%s10517_s7 + $0x714] ss:$28 sps:$4 sm:$0xff]  }
 0x406   :  { %5863 = vmatpush1.bf16.msra.mxu1 %v7707_v6  ;;  %v7772_v6 = vld [vmem:[%s10517_s7 + $0x710] ss:$28 sps:$4 sm:$0xff]  }
 0x407   :  { %7003 = vmatpush3.bf16.msra.mxu0 %v7711_v7  ;;  %5864 = vmatprep.subr.bf16.mxu1 %v7714_v8  ;;  %v7777_v7 = vld [vmem:[%s10517_s7 + $0x74c] ss:$28 sps:$4 sm:$0xff]  }
 0x408   :  { %7004 = vmatprep.subr.bf16.mxu0 %v7715_v10  ;;  %v7775_v8 = vld [vmem:[%s10517_s7 + $0x748] ss:$28 sps:$4 sm:$0xff]  }
 0x409   :  { %v7780_v10 = vld [vmem:[%s10517_s7 + $0x784] ss:$28 sps:$4 sm:$0xff]  }
 0x40a   :  { %5865 = vmatpush1.bf16.msra.mxu1 %v7712_v15  ;;  %v7778_v15 = vld [vmem:[%s10517_s7 + $0x780] ss:$28 sps:$4 sm:$0xff]  }
 0x40b   :  { %7005 = vmatpush3.bf16.msra.mxu0 %v7716_v16  ;;  %5866 = vmatprep.subr.bf16.mxu1 %v7719_v20  ;;  %v7786_v16 = vld [vmem:[%s10517_s7 + $0x7f4] ss:$28 sps:$4 sm:$0xff]  }
 0x40c   :  { %7006 = vmatprep.subr.bf16.mxu0 %v7720_v23  ;;  %v7784_v20 = vld [vmem:[%s10517_s7 + $0x7f0] ss:$28 sps:$4 sm:$0xff]  }
 0x40d   :  { %v7789_v23 = vld [vmem:[%s10517_s7 + $0x82c] ss:$28 sps:$4 sm:$0xff]  }
 0x40e   :  { %5867 = vmatpush1.bf16.msra.mxu1 %v7717_v11  ;;  %v7787_v11 = vld [vmem:[%s10517_s7 + $0x828] ss:$28 sps:$4 sm:$0xff]  }
 0x40f   :  { %7007 = vmatpush3.bf16.msra.mxu0 %v7721_v13  ;;  %5868 = vmatprep.subr.bf16.mxu1 %v7724_v17  ;;  %v7792_v13 = vld [vmem:[%s10517_s7 + $0x864] ss:$28 sps:$4 sm:$0xff]  }
 0x410   :  { %7008 = vmatprep.subr.bf16.mxu0 %v7725_v19  ;;  %v7790_v17 = vld [vmem:[%s10517_s7 + $0x860] ss:$28 sps:$4 sm:$0xff]  }
 0x411   :  { %v7795_v19 = vld [vmem:[%s10517_s7 + $0x89c] ss:$28 sps:$4 sm:$0xff]  }
 0x412   :  { %5869 = vmatpush1.bf16.msra.mxu1 %v7722_v61  ;;  %v7793_v61 = vld [vmem:[%s10517_s7 + $0x898] ss:$28 sps:$4 sm:$0xff]  }
 0x413   :  { %7009 = vmatpush3.bf16.msra.mxu0 %v7726_v24  ;;  %5870 = vmatprep.subr.bf16.mxu1 %v7729_v25  ;;  %v7798_v24 = vld [vmem:[%s10517_s7 + $0x8d4] ss:$28 sps:$4 sm:$0xff]  }
 0x414   :  { %7010 = vmatprep.subr.bf16.mxu0 %v7730_v1  ;;  %v7796_v25 = vld [vmem:[%s10517_s7 + $0x8d0] ss:$28 sps:$4 sm:$0xff]  }
 0x415   :  { %v7801_v1 = vld [vmem:[%s10517_s7 + $0x90c] ss:$28 sps:$4 sm:$0xff]  }
 0x416   :  { %5871 = vmatpush1.bf16.msra.mxu1 %v7727_v26  ;;  %v7799_v26 = vld [vmem:[%s10517_s7 + $0x908] ss:$28 sps:$4 sm:$0xff]  }
 0x417   :  { %7011 = vmatpush3.bf16.msra.mxu0 %v7731_v53  ;;  %5872 = vmatprep.subr.bf16.mxu1 %v7734_v27  ;;  %v7804_v53 = vld [vmem:[%s10517_s7 + $0x944] ss:$28 sps:$4 sm:$0xff]  }
 0x418   :  { %7018 = vmatprep.subr.bf16.mxu0 %v7735_v28  ;;  %v7802_v27 = vld [vmem:[%s10517_s7 + $0x940] ss:$28 sps:$4 sm:$0xff]  }
 0x419   :  { %v7807_v28 = vld [vmem:[%s10517_s7 + $0x97c] ss:$28 sps:$4 sm:$0xff]  }
 0x41a   :  { %6092 = vmatmul.mubr.bf16.vlgmr.msra.gmra.mrb[32].mxu0 %v9685_v51  ;;  %5873 = vmatpush1.bf16.msra.mxu1 %v7732_v30  ;;  %v7805_v30 = vld [vmem:[%s10517_s7 + $0x978] ss:$28 sps:$4 sm:$0xff]  }
 0x41b   :  { %7019 = vmatpush3.bf16.msra.mxu0 %v7736_v34  ;;  %6131 = vmatprep.mubr.bf16.mxu0 %v9695_v22  ;;  %v7810_v34 = vld [vmem:[%s10517_s7 + $0x9b4] ss:$28 sps:$4 sm:$0xff]  }
 0x41c   :  { %5874 = vmatprep.subr.bf16.mxu1 %v7739_v36  ;;  %7020 = vmatprep.subr.bf16.mxu0 %v7740_v38  ;;  %v7808_v36 = vld [vmem:[%s10517_s7 + $0x9b0] ss:$28 sps:$4 sm:$0xff]  }
 0x41d   :  { %v7813_v38 = vld [vmem:[%s10517_s7 + $0x9ec] ss:$28 sps:$4 sm:$0xff]  }
 0x41e   :  { %5875 = vmatpush1.bf16.msra.mxu1 %v7737_v39  ;;  %v7811_v39 = vld [vmem:[%s10517_s7 + $0x9e8] ss:$28 sps:$4 sm:$0xff]  }
 0x41f   :  { %7021 = vmatpush3.bf16.msra.mxu0 %v7741_v43  ;;  %5876 = vmatprep.subr.bf16.mxu1 %v7744_v44  ;;  %v7816_v43 = vld [vmem:[%s10517_s7 + $0xa24] ss:$28 sps:$4 sm:$0xff]  }
 0x420   :  { %7022 = vmatprep.subr.bf16.mxu0 %v7745_v45  ;;  %v7814_v44 = vld [vmem:[%s10517_s7 + $0xa20] ss:$28 sps:$4 sm:$0xff]  }
 0x421   :  { %v7819_v45 = vld [vmem:[%s10517_s7 + $0xa5c] ss:$28 sps:$4 sm:$0xff]  }
 0x422   :  { %5877 = vmatpush1.bf16.msra.mxu1 %v7742_v46  ;;  %v7817_v46 = vld [vmem:[%s10517_s7 + $0xa58] ss:$28 sps:$4 sm:$0xff]  }
 0x423   :  { %7023 = vmatpush3.bf16.msra.mxu0 %v7746_v47  ;;  %5878 = vmatprep.subr.bf16.mxu1 %v7749_v48  ;;  %v7822_v47 = vld [vmem:[%s10517_s7 + $0xa94] ss:$28 sps:$4 sm:$0xff]  }
 0x424   :  { %7024 = vmatprep.subr.bf16.mxu0 %v7750_v4  ;;  %v7820_v48 = vld [vmem:[%s10517_s7 + $0xa90] ss:$28 sps:$4 sm:$0xff]  }
 0x425   :  { %v7825_v4 = vld [vmem:[%s10517_s7 + $0xacc] ss:$28 sps:$4 sm:$0xff]  }
 0x426   :  { %5879 = vmatpush1.bf16.msra.mxu1 %v7747_v49  ;;  %v7823_v49 = vld [vmem:[%s10517_s7 + $0xac8] ss:$28 sps:$4 sm:$0xff]  }
 0x427   :  { %7025 = vmatpush3.bf16.msra.mxu0 %v7751_v21  ;;  %5880 = vmatprep.subr.bf16.mxu1 %v7754_v52  ;;  %v7828_v21 = vld [vmem:[%s10517_s7 + $0xb04] ss:$28 sps:$4 sm:$0xff]  }
 0x428   :  { %7026 = vmatprep.subr.bf16.mxu0 %v7755_v54  ;;  %v7826_v52 = vld [vmem:[%s10517_s7 + $0xb00] ss:$28 sps:$4 sm:$0xff]   ;;  %v7834_v54 = vld [vmem:[%s10517_s7 + $0xb74] ss:$28 sps:$4 sm:$0xff]  }
 0x42a   :  { %5881 = vmatpush1.bf16.msra.mxu1 %v7752_v56  ;;  %v7832_v56 = vld [vmem:[%s10517_s7 + $0xb70] ss:$28 sps:$4 sm:$0xff]  }
 0x42b   :  { %7027 = vmatpush3.bf16.msra.mxu0 %v7756_v57  ;;  %5882 = vmatprep.subr.bf16.mxu1 %v7759_v58  ;;  %v10412_v57 = vld [vmem:[%s10518_s8] sm:$0x7f]  ;;  %v7837_v58 = vld [vmem:[%s10517_s7 + $0xbac] ss:$28 sps:$4 sm:$0xff]  }
 0x42c   :  { %7028 = vmatprep.subr.bf16.mxu0 %v7760_v59  ;;  %v3151_v59 = vrot.slane %v10412_v57, %v8192_v41 }
 0x42e   :  { %5883 = vmatpush1.bf16.msra.mxu1 %v7757_v60  ;;  %v3159_v60 = vrot.slane %v10412_v57, %v8621_v50 }
 0x42f   :  { %7029 = vmatpush3.bf16.msra.mxu0 %v7761_v62  ;;  %5884 = vmatprep.subr.bf16.mxu1 %v7764_v31  ;;  %v3155_v62 = vrot.slane %v10412_v57, %v8195_v42  ;;  %v3163_v31 = vrot.slane %v10412_v57, %v8633_v55  ;;  %v7838_v55 = vld [vmem:[%s10517_s7 + $0xbe0] ss:$28 sps:$4 sm:$0xff]  }
 0x430   :  { %7030 = vmatprep.subr.bf16.mxu0 %v7765_v63  ;;  %v7835_v63 = vld [vmem:[%s10517_s7 + $0xba8] ss:$28 sps:$4 sm:$0xff]  }
 0x432   :  { %5885 = vmatpush1.bf16.msra.mxu1 %v7762_v0  ;;  %v7840_v0 = vld [vmem:[%s10517_s7 + $0xbe4] ss:$28 sps:$4 sm:$0xff]  }
 0x433   :  { %7031 = vmatpush3.bf16.msra.mxu0 %v7766_v12  ;;  %5886 = vmatprep.subr.bf16.mxu1 %v7769_v5 }
 0x434   :  { %7032 = vmatprep.subr.bf16.mxu0 %v7770_v18 }
 0x436   :  { %5887 = vmatpush1.bf16.msra.mxu1 %v7767_v2 }
 0x437   :  { %7033 = vmatpush3.bf16.msra.mxu0 %v7771_v29  ;;  %5897 = vmatprep.subr.bf16.mxu1 %v7774_v3 }
 0x439   :  { %5889 = vmatmul.mubr.bf16.vlgmr.msra.gmra.mrb[12].mxu1 %v9475_v37  ;;  %v7783_v37 = vld [vmem:[%s10517_s7 + $0x7bc] ss:$28 sps:$4 sm:$0xff]  }
 0x43a   :  { %6132 = vmatmul.mubr.bf16.vlgmr.msra.gmra.mrb[36].mxu0 %v9889_v40  ;;  %5898 = vmatpush1.bf16.msra.mxu1 %v7772_v6 }
 0x43b   :  { %5929 = vmatprep.mubr.bf16.mxu1 %v9677_v9  ;;  %5899 = vmatprep.subr.bf16.mxu1 %v7777_v7  ;;  %v7781_v9 = vld [vmem:[%s10517_s7 + $0x7b8] ss:$28 sps:$4 sm:$0xff]  }
 0x43e   :  { %5900 = vmatpush1.bf16.msra.mxu1 %v7775_v8 }
 0x43f   :  { %5901 = vmatprep.subr.bf16.mxu1 %v7780_v10  ;;  %v7843_v10 = vld [vmem:[%s10517_s7 + $0xc1c] ss:$28 sps:$4 sm:$0xff]  }
 0x442   :  { %5902 = vmatpush1.bf16.msra.mxu1 %v7778_v15  ;;  %v7841_v15 = vld [vmem:[%s10517_s7 + $0xc18] ss:$28 sps:$4 sm:$0xff]  }
 0x443   :  { %5903 = vmatprep.subr.bf16.mxu1 %v7783_v37  ;;  %v7846_v37 = vld [vmem:[%s10517_s7 + $0xc54] ss:$28 sps:$4 sm:$0xff]  }
 0x446   :  { %5904 = vmatpush1.bf16.msra.mxu1 %v7781_v9  ;;  %v7844_v9 = vld [vmem:[%s10517_s7 + $0xc50] ss:$28 sps:$4 sm:$0xff]  }
 0x447   :  { %5905 = vmatprep.subr.bf16.mxu1 %v7786_v16  ;;  %v7849_v16 = vld [vmem:[%s10517_s7 + $0xc8c] ss:$28 sps:$4 sm:$0xff]  }
 0x44a   :  { %5906 = vmatpush1.bf16.msra.mxu1 %v7784_v20 }
 0x44b   :  { %5907 = vmatprep.subr.bf16.mxu1 %v7789_v23 }
 0x44e   :  { %5908 = vmatpush1.bf16.msra.mxu1 %v7787_v11  ;;  %v7847_v11 = vld [vmem:[%s10517_s7 + $0xc88] ss:$28 sps:$4 sm:$0xff]  }
 0x44f   :  { %5909 = vmatprep.subr.bf16.mxu1 %v7792_v13 }
 0x452   :  { %5910 = vmatpush1.bf16.msra.mxu1 %v7790_v17  ;;  %v7852_v17 = vld [vmem:[%s10517_s7 + $0xcc4] ss:$28 sps:$4 sm:$0xff]  }
 0x453   :  { %5911 = vmatprep.subr.bf16.mxu1 %v7795_v19 }
 0x456   :  { %5912 = vmatpush1.bf16.msra.mxu1 %v7793_v61  ;;  %v7850_v61 = vld [vmem:[%s10517_s7 + $0xcc0] ss:$28 sps:$4 sm:$0xff]  }
 0x457   :  { %5913 = vmatprep.subr.bf16.mxu1 %v7798_v24  ;;  %v7855_v24 = vld [vmem:[%s10517_s7 + $0xcfc] ss:$28 sps:$4 sm:$0xff]  }
 0x45a   :  { %5914 = vmatpush1.bf16.msra.mxu1 %v7796_v25  ;;  %v7853_v25 = vld [vmem:[%s10517_s7 + $0xcf8] ss:$28 sps:$4 sm:$0xff]  }
 0x45b   :  { %5915 = vmatprep.subr.bf16.mxu1 %v7801_v1  ;;  %v7858_v1 = vld [vmem:[%s10517_s7 + $0xd34] ss:$28 sps:$4 sm:$0xff]  }
 0x45e   :  { %5916 = vmatpush1.bf16.msra.mxu1 %v7799_v26  ;;  %v7856_v26 = vld [vmem:[%s10517_s7 + $0xd30] ss:$28 sps:$4 sm:$0xff]  }
 0x45f   :  { %5917 = vmatprep.subr.bf16.mxu1 %v7804_v53  ;;  %v7861_v53 = vld [vmem:[%s10517_s7 + $0xd6c] ss:$28 sps:$4 sm:$0xff]  }
 0x462   :  { %5918 = vmatpush1.bf16.msra.mxu1 %v7802_v27  ;;  %v7859_v27 = vld [vmem:[%s10517_s7 + $0xd68] ss:$28 sps:$4 sm:$0xff]  }
 0x463   :  { %5919 = vmatprep.subr.bf16.mxu1 %v7807_v28  ;;  %v7864_v28 = vld [vmem:[%s10517_s7 + $0xda4] ss:$28 sps:$4 sm:$0xff]  }
 0x466   :  { %5920 = vmatpush1.bf16.msra.mxu1 %v7805_v30 }
 0x467   :  { %5921 = vmatprep.subr.bf16.mxu1 %v7810_v34 }
 0x46a   :  { %5922 = vmatpush1.bf16.msra.mxu1 %v7808_v36  ;;  %v7862_v36 = vld [vmem:[%s10517_s7 + $0xda0] ss:$28 sps:$4 sm:$0xff]  }
 0x46b   :  { %5923 = vmatprep.subr.bf16.mxu1 %v7813_v38 }
 0x46e   :  { %5924 = vmatpush1.bf16.msra.mxu1 %v7811_v39 }
 0x46f   :  { %5925 = vmatprep.subr.bf16.mxu1 %v7816_v43  ;;  %v7867_v43 = vld [vmem:[%s10517_s7 + $0xddc] ss:$28 sps:$4 sm:$0xff]  }
 0x472   :  { %5926 = vmatpush1.bf16.msra.mxu1 %v7814_v44 }
 0x473   :  { %5927 = vmatprep.subr.bf16.mxu1 %v7819_v45  ;;  %v7865_v45 = vld [vmem:[%s10517_s7 + $0xdd8] ss:$28 sps:$4 sm:$0xff]  }
 0x476   :  { %5928 = vmatpush1.bf16.msra.mxu1 %v7817_v46  ;;  %v3175_v46 = vrot.slane %v10412_v57, %v980_v14 }
 0x477   :  { %5938 = vmatprep.subr.bf16.mxu1 %v7822_v47 }
 0x479   :  { %5930 = vmatmul.mubr.bf16.vlgmr.msra.gmra.mrb[12].mxu1 %v9685_v51  ;;  %v7831_v51 = vld [vmem:[%s10517_s7 + $0xb3c] ss:$28 sps:$4 sm:$0xff]  }
 0x47a   :  { %5939 = vmatpush1.bf16.msra.mxu1 %v7820_v48  ;;  %5970 = vmatprep.mubr.bf16.mxu1 %v9695_v22  ;;  %v7829_v22 = vld [vmem:[%s10517_s7 + $0xb38] ss:$28 sps:$4 sm:$0xff]   ;;  %s7907_s7 = smov [#allocation2]  }
 0x47b   :  { %5940 = vmatprep.subr.bf16.mxu1 %v7825_v4  ;;  %s6160_s19 = sshll.u32 %s7907_s7, 4  ;;  %s6161_s19 = int_to_ptr.vmem [resolvable:$true] %s6160_s19 }
 0x47c   :  { %s7882_s20 = scalar_lea.vmem %s6161_s19, 896  ;;  %p7887_p1 = scmp.lt.s32.totalorder %s6161_s19, %s6161_s19 }
 0x47d   :  { %p7883_p0 = scmp.ne.s32.totalorder %s6161_s19, %s7882_s20  ;;  %p7888_p2 = scmp.lt.s32.totalorder %s7882_s20, %s7882_s20 }
 0x47e   :  { %5941 = vmatpush1.bf16.msra.mxu1 %v7823_v49 }
 0x47f   :  { %5942 = vmatprep.subr.bf16.mxu1 %v7828_v21  ;;  %p7889_p3 = por %p7888_p2, %p7887_p1 }
 0x481   :  { %p7890_p4 = pnand %p7889_p3, %p7883_p0 }
 0x482   :  { %5943 = vmatpush1.bf16.msra.mxu1 %v7826_v52 }
 0x483   :  { %5944 = vmatprep.subr.bf16.mxu1 %v7831_v51 }
 0x486   :  { %5945 = vmatpush1.bf16.msra.mxu1 %v7829_v22 }
 0x487   :  { %5946 = vmatprep.subr.bf16.mxu1 %v7834_v54 }
 0x48a   :  { %5947 = vmatpush1.bf16.msra.mxu1 %v7832_v56 }
 0x48b   :  { %5948 = vmatprep.subr.bf16.mxu1 %v7837_v58 }
 0x48c   :  { %v5644_v41 = vpop.f32.mrb[8].mxu1  ;;  %v5808_v12 = vpop.f32.mrb[20].mxu0 }
 0x48d   :  { %v7048_v5 = vadd.f32 %v5644_v41, %v3151_v59  ;;  %v7050_v50 = vadd.f32 %v5808_v12, %v3159_v60  ;;  %v5646_v18 = vpop.f32.mrb[9].mxu1  ;;  %v5810_v2 = vpop.f32.mrb[21].mxu0  ;;  %v3167_v12 = vrot.slane %v10412_v57, %v972_v32 }
 0x48e   :  { %v7049_v29 = vadd.f32 %v5646_v18, %v3155_v62  ;;  %v7051_v42 = vadd.f32 %v5810_v2, %v3163_v31  ;;  %v5648_v3 = vpop.f32.mrb[10].mxu1  ;;  %v5812_v6 = vpop.f32.mrb[22].mxu0  ;;  %5949 = vmatpush1.bf16.msra.mxu1 %v7835_v63 }
 0x48f   :  { %7868 = vtanh.f32 %v7048_v5  ;;  %v5649_v7 = vpop.f32.mrb[11].mxu1  ;;  %v5813_v8 = vpop.f32.mrb[23].mxu0  ;;  %5950 = vmatprep.subr.bf16.mxu1 %v7840_v0  ;;  %v3171_v5 = vrot.slane %v10412_v57, %v976_v33 }
 0x490   :  { %7870 = vtanh.f32 %v7050_v50 }
 0x491   :  { %7872 = vtanh.f32 %v7049_v29 }
 0x492   :  { %7874 = vtanh.f32 %v7051_v42  ;;  %5951 = vmatpush1.bf16.msra.mxu1 %v7838_v55 }
 0x493   :  { %5952 = vmatprep.subr.bf16.mxu1 %v7843_v10 }
 0x496   :  { %5953 = vmatpush1.bf16.msra.mxu1 %v7841_v15 }
 0x497   :  { %5954 = vmatprep.subr.bf16.mxu1 %v7846_v37 }
 0x499   :  { %v7869_v20 = vpop.eup %7868 }
 0x49a   :  { %v7871_v23 = vpop.eup %7870  ;;  %6146 = vst [vmem:[#allocation2] sm:$0xff] %v7869_v20  ;;  %5955 = vmatpush1.bf16.msra.mxu1 %v7844_v9 }
 0x49b   :  { %v7873_v13 = vpop.eup %7872  ;;  %6148 = vst [vmem:[#allocation2 + $0x10] sm:$0xff] %v7871_v23  ;;  %5956 = vmatprep.subr.bf16.mxu1 %v7849_v16 }
 0x49c   :  { %v7875_v19 = vpop.eup %7874  ;;  %6147 = vst [vmem:[#allocation2 + $0x8] sm:$0xff] %v7873_v13 }
 0x49d   :  { %6149 = vst [vmem:[#allocation2 + $0x18] sm:$0xff] %v7875_v19 }
 0x49e   :  { %5957 = vmatpush1.bf16.msra.mxu1 %v7847_v11 }
 0x49f   :  { %5958 = vmatprep.subr.bf16.mxu1 %v7852_v17 }
 0x4a2   :  { %5959 = vmatpush1.bf16.msra.mxu1 %v7850_v61 }
 0x4a3   :  { %5960 = vmatprep.subr.bf16.mxu1 %v7855_v24 }
 0x4a6   :  { %5961 = vmatpush1.bf16.msra.mxu1 %v7853_v25 }
 0x4a7   :  { %5962 = vmatprep.subr.bf16.mxu1 %v7858_v1 }
 0x4aa   :  { %5963 = vmatpush1.bf16.msra.mxu1 %v7856_v26 }
 0x4ab   :  { %5964 = vmatprep.subr.bf16.mxu1 %v7861_v53 }
 0x4ad   :  { %v6968_v30 = vpop.f32.mrb[24].mxu0 }
 0x4ae   :  { %v6969_v34 = vpop.f32.mrb[25].mxu0  ;;  %5965 = vmatpush1.bf16.msra.mxu1 %v7859_v27 }
 0x4af   :  { %v6970_v38 = vadd.f32 %v6969_v34, %v6968_v30  ;;  %v6971_v39 = vpop.f32.mrb[26].mxu0  ;;  %5966 = vmatprep.subr.bf16.mxu1 %v7864_v28 }
 0x4b0   :  { %v6972_v44 = vpop.f32.mrb[27].mxu0 }
 0x4b1   :  { %v6014_v4 = vadd.f32 %v6970_v38, %v3175_v46 }
 0x4b2   :  { %5967 = vmatpush1.bf16.msra.mxu1 %v7862_v36 }
 0x4b3   :  { %5968 = vmatprep.subr.bf16.mxu1 %v7867_v43 }
 0x4b6   :  { %5969 = vmatpush1.bf16.msra.mxu1 %v7865_v45 }
 0x4b9   :  { %5971 = vmatmul.mubr.bf16.vlgmr.msra.gmra.mrb[12].mxu1 %v9889_v40 }
 0x4cd   :  { %v6990_v47 = vpop.f32.mrb[28].mxu0 }
 0x4ce   :  { %v6991_v48 = vpop.f32.mrb[29].mxu0 }
 0x4cf   :  { %v6992_v49 = vadd.f32 %v6991_v48, %v6990_v47  ;;  %v6993_v21 = vpop.f32.mrb[30].mxu0 }
 0x4d0   :  { %v6994_v52 = vpop.f32.mrb[31].mxu0 }
 0x4d1   :  { %v6054_v51 = vadd.f32 %v6992_v49, %v6014_v4 }
 0x4ed   :  { %v7012_v22 = vpop.f32.mrb[32].mxu0 }
 0x4ee   :  { %v7013_v54 = vpop.f32.mrb[33].mxu0 }
 0x4ef   :  { %v7014_v56 = vadd.f32 %v7013_v54, %v7012_v22  ;;  %v7015_v58 = vpop.f32.mrb[34].mxu0 }
 0x4f0   :  { %v7016_v59 = vpop.f32.mrb[35].mxu0 }
 0x4f1   :  { %v6094_v60 = vadd.f32 %v7014_v56, %v6054_v51 }
 0x50d   :  { %v7034_v62 = vpop.f32.mrb[36].mxu0 }
 0x50e   :  { %v7035_v31 = vpop.f32.mrb[37].mxu0 }
 0x50f   :  { %v7036_v40 = vadd.f32 %v7035_v31, %v7034_v62  ;;  %v7037_v63 = vpop.f32.mrb[38].mxu0 }
 0x510   :  { %v7038_v0 = vpop.f32.mrb[39].mxu0 }
 0x511   :  { %v6134_v41 = vadd.f32 %v7036_v40, %v6094_v60 }
 0x513   :  { %7876 = vtanh.f32 %v6134_v41 }
 0x51d   :  { %v7877_v14 = vpop.eup %7876 }
 0x51e   :  { %6153 = vst.msk [vmem:[#allocation2 + $0x30] sm:$0xff] %vm6152_vm14, %v7877_v14 }
 0x58c   :  { %v5972_v50 = vpop.f32.mrb[12].mxu1 }
 0x58d   :  { %v7052_v18 = vadd.f32 %v5972_v50, %v3167_v12  ;;  %v5974_v2 = vpop.f32.mrb[13].mxu1 }
 0x58e   :  { %v7053_v29 = vadd.f32 %v5974_v2, %v3171_v5  ;;  %v5976_v42 = vpop.f32.mrb[14].mxu1 }
 0x58f   :  { %7878 = vtanh.f32 %v7052_v18  ;;  %v5977_v3 = vpop.f32.mrb[15].mxu1 }
 0x590   :  { %7880 = vtanh.f32 %v7053_v29 }
 0x599   :  { %v7879_v6 = vpop.eup %7878 }
 0x59a   :  { %v7881_v55 = vpop.eup %7880  ;;  %6150 = vst [vmem:[#allocation2 + $0x20] sm:$0xff] %v7879_v6 }
 0x59b   :  { %6151 = vst [vmem:[#allocation2 + $0x28] sm:$0xff] %v7881_v55 }
 0x59c   :  { %7893 = shalt.err (!%p7890_p4)
}
 0x59d   :  { %s7894_s23 = scalar_lea.hbm %s10519_s9, 896 }
 0x59e   :  { %p7895_p5 = scmp.ne.s32.totalorder %s10519_s9, %s7894_s23  ;;  %p7898_p6 = scmp.lt.u32.totalorder %s7894_s23, %s10519_s9 }
 0x5a0   :  { %p7900_p7 = pnand %p7898_p6, %p7895_p5 }
 0x5a2   :  { %7903 = shalt.err (!%p7900_p7)
}
 0x5a3   :  { %6163 = dma.vmem_to_hbm [thread:$0]  %s6161_s19, 896, %s10519_s9, [#allocation3]  }
 0x5a4   :  { %7904 = dma.done.wait [#allocation3], 896  }
 0x5a5   :  { %7905 = vsyncadd [#allocation3], 4294966400 }
 0x5a6   :  { %6167 = vsyncpa [#allocation3], 1 }

</bundles_post_ra>
